<compile_context>
chip_gen: v7x
topology: tpu7x:2x2x1
jax: 0.10.0
libtpu: 0.0.40
codegen_flags: <defaults>
</compile_context>

<pallas_src>
import jax
import jax.numpy as jnp
from jax import lax
from jax.experimental import pallas as pl
from jax.experimental.pallas import tpu as pltpu

_BN_EPS = 1e-5  # torch.nn.BatchNorm1d default (blocks used by forward())


# --------------------------------------------------------------------------
# Fused whole-model forward kernel
# --------------------------------------------------------------------------
def _fused_forward_kernel(*refs):
    # refs = (x_rgb, x_flow, x_audio, *folded_params, out)
    x_rgb_ref, x_flow_ref, x_audio_ref = refs[:3]
    out_ref = refs[-1]
    p = refs[3:-1]
    rgb_p, flow_p, aud_p, cls_p = p[0:8], p[8:16], p[16:18], p[18:22]

    def mlp(h, layer_refs):
        # Folded (Linear+BN) -> bias -> ReLU chain.  Matmuls on the MXU,
        # bias/ReLU on the VPU; intermediates never leave on-chip memory.
        for li in range(0, len(layer_refs), 2):
            w_ref, b_ref = layer_refs[li], layer_refs[li + 1]
            h = jnp.dot(h, w_ref[...], preferred_element_type=jnp.float32)
            h = jnp.maximum(h + b_ref[...], 0.0)
        return h

    h_rgb = mlp(x_rgb_ref[...].astype(jnp.float32), rgb_p)      # (bB, 64)
    h_flow = mlp(x_flow_ref[...].astype(jnp.float32), flow_p)   # (bB, 64)
    h_aud = mlp(x_audio_ref[...].astype(jnp.float32), aud_p)    # (bB, 64)

    # Classifier head: concat avoided by splitting the (1,192) weight into
    # three per-branch (1,64) row vectors -> elementwise mul + lane reduce.
    wr_ref, wf_ref, wa_ref, b_ref = cls_p
    logit = (jnp.sum(h_rgb * wr_ref[...], axis=-1, keepdims=True)
             + jnp.sum(h_flow * wf_ref[...], axis=-1, keepdims=True)
             + jnp.sum(h_aud * wa_ref[...], axis=-1, keepdims=True)
             + b_ref[...])                                        # (bB, 1)

    # sigmoid(x) = 1/(1+exp(-x)): exp on the EUP, divide replaced by the EUP
    # approximate reciprocal + one Newton step (restores ~f32 accuracy).
    denom = 1.0 + jnp.exp(-logit)
    r = pl.reciprocal(denom, approx=True)
    sig = r * (2.0 - denom * r)
    sig = jnp.where(jnp.isinf(denom), 0.0, sig)   # exp overflow -> sigmoid = 0
    out_ref[...] = sig.astype(out_ref.dtype)


def _fold_linear_bn(w, b, gamma, beta, mean, var, eps=_BN_EPS):
    """Fold inference-mode BatchNorm1d into the preceding Linear.

    PyTorch layout: w (out, in), b (out,).  Returns (w_folded (in, out),
    b_folded (1, out)) so the kernel computes relu(x @ w_f + b_f) directly.
    """
    scale = gamma / jnp.sqrt(var + eps)                       # (out,)
    w_f = (w * scale[:, None]).T                              # (in, out)
    b_f = ((b - mean) * scale + beta)[None, :]                # (1, out)
    return w_f.astype(jnp.float32), b_f.astype(jnp.float32)


def action_classification_forward(x_rgb, x_flow, x_audio, params):
    """Forward pass of Action_Classification_Model (eval semantics)."""
    B = x_rgb.shape[0]
    assert x_flow.shape[0] == B and x_audio.shape[0] == B
    out_dtype = x_rgb.dtype

    # ---- fold BN into each Linear; collect flat param list (all 2-D) -------
    flat = []
    for name in ("rgb", "flow", "audio"):
        for (w, b, g, bt, mu, var) in params[name]:
            w_f, b_f = _fold_linear_bn(w, b, g, bt, mu, var)
            flat += [w_f, b_f]
    w_cls, b_cls = params["cls"]                              # (1,192), (1,)
    w_cls_f = jnp.asarray(w_cls, jnp.float32)
    flat += [w_cls_f[:, 0:64],        # rgb slice   (1, 64)
             w_cls_f[:, 64:128],      # flow slice  (1, 64)
             w_cls_f[:, 128:192],     # audio slice (1, 64)
             jnp.asarray(b_cls, jnp.float32).reshape(1, 1)]

    # ---- batch tiling: blocks of up to 128 rows, (8,128)-aligned -----------
    B_pad = ((B + 7) // 8) * 8
    block_B = min(B_pad, 128)
    B_pad = ((B_pad + block_B - 1) // block_B) * block_B
    grid = (B_pad // block_B,)

    def pad_rows(x):
        if x.shape[0] == B_pad:
            return x
        return jnp.pad(x, ((0, B_pad - x.shape[0]), (0, 0)))

    x_rgb_p, x_flow_p, x_audio_p = map(pad_rows, (x_rgb, x_flow, x_audio))

    in_specs = [
        pl.BlockSpec((block_B, x_rgb_p.shape[1]), lambda i: (i, 0)),
        pl.BlockSpec((block_B, x_flow_p.shape[1]), lambda i: (i, 0)),
        pl.BlockSpec((block_B, x_audio_p.shape[1]), lambda i: (i, 0)),
    ] + [
        # Weights/biases: same block for every grid step -> VMEM-resident,
        # DMA'd from HBM only once per call.
        pl.BlockSpec(p.shape, lambda i: (0, 0)) for p in flat
    ]

    out = pl.pallas_call(
        _fused_forward_kernel,
        out_shape=jax.ShapeDtypeStruct((B_pad, 1), out_dtype),
        grid_spec=pltpu.PrefetchScalarGridSpec(
            num_scalar_prefetch=0,
            grid=grid,
            in_specs=in_specs,
            out_specs=pl.BlockSpec((block_B, 1), lambda i: (i, 0)),
        ),
        compiler_params=pltpu.CompilerParams(
            dimension_semantics=("parallel",),
            # ~5.6 MB of resident weights (+ double-buffered batch tiles)
            # exceeds v5e's 16 MiB scoped-VMEM default; raise it while staying
            # well under v7x's 64 MiB physical per-core VMEM.
            vmem_limit_bytes=48 << 20,
        ),
    )(x_rgb_p, x_flow_p, x_audio_p, *flat)

    return out[:B]


# --------------------------------------------------------------------------
# Custom Swish activation (the module's Swish class; used by block_1)
# --------------------------------------------------------------------------
def _swish_kernel(x_ref, o_ref):
    x = x_ref[...]
    xf = x.astype(jnp.float32)
    denom = 1.0 + jnp.exp(-xf)
    r = pl.reciprocal(denom, approx=True)
    sig = r * (2.0 - denom * r)                 # Newton step for ~f32 accuracy
    sig = jnp.where(jnp.isinf(denom), 0.0, sig)
    o_ref[...] = (xf * sig).astype(o_ref.dtype)


def swish(x, *, min_pallas_elems=1 << 16, target_block_bytes=2 << 20):
    """Elementwise swish(x) = x * sigmoid(x) for an arbitrary-shaped array."""
    n = x.size
    # Tiny inputs (or sizes not divisible by 128 lanes): one fused XLA op,
    # no pallas_call launch overhead and no pad/slice copies.
    if n < min_pallas_elems or n % 128 != 0:
        return x * jax.nn.sigmoid(x)

    # Lane-dense slab: widest last dim in {1024, 512, 256, 128} dividing n.
    wide = 128
    for cand in (1024, 512, 256):
        if n % cand == 0:
            wide = cand
            break
    rows = n // wide
    x2d = x.reshape(rows, wide)          # contiguous reshape: no pad, no copy

    bytes_per_row = wide * x.dtype.itemsize
    target_rows = max(8, (target_block_bytes // bytes_per_row) // 8 * 8)
    block_rows = min(rows, target_rows)
    if rows >= 16:                       # keep >= 2 blocks for megacore/pipe
        block_rows = min(block_rows, max(8, ((rows + 1) // 2) // 8 * 8))
    if block_rows != rows:
        block_rows = max(8, (block_rows // 8) * 8)   # (8, 128) tiling rule
    grid = (pl.cdiv(rows, block_rows),)

    out2d = pl.pallas_call(
        _swish_kernel,
        out_shape=jax.ShapeDtypeStruct((rows, wide), x.dtype),
        grid_spec=pltpu.PrefetchScalarGridSpec(
            num_scalar_prefetch=0,
            grid=grid,
            in_specs=[pl.BlockSpec((block_rows, wide), lambda i: (i, 0))],
            out_specs=pl.BlockSpec((block_rows, wide), lambda i: (i, 0)),
        ),
        compiler_params=pltpu.CompilerParams(
            dimension_semantics=("parallel",),
        ),
    )(x2d)
    return out2d.reshape(x.shape)


# --------------------------------------------------------------------------
# Parameter construction + pure-JAX reference (for correctness checks)
# --------------------------------------------------------------------------
def init_params(key):
    def linear(k, fan_in, fan_out):
        kw, kb = jax.random.split(k)
        limit = (6.0 / (fan_in + fan_out)) ** 0.5          # xavier_uniform
        w = jax.random.uniform(kw, (fan_out, fan_in), jnp.float32, -limit, limit)
        b = jax.random.uniform(kb, (fan_out,), jnp.float32, -1.0, 1.0) / (fan_in ** 0.5)
        return w, b

    def bn(k, n):
        kg, kb, km, kv = jax.random.split(k, 4)
        gamma = 1.0 + 0.1 * jax.random.normal(kg, (n,), jnp.float32)
        beta = 0.1 * jax.random.normal(kb, (n,), jnp.float32)
        mean = 0.1 * jax.random.normal(km, (n,), jnp.float32)
        var = 1.0 + 0.1 * jax.random.uniform(kv, (n,), jnp.float32)
        return gamma, beta, mean, var

    def block(k, dims):
        layers = []
        for d_in, d_out in dims:
            k, k1, k2 = jax.random.split(k, 3)
            w, b = linear(k1, d_in, d_out)
            layers.append((w, b) + bn(k2, d_out))
        return layers

    dims_big = [(1024, 512), (512, 256), (256, 128), (128, 64)]
    k_rgb, k_flow, k_aud, k_cls = jax.random.split(key, 4)
    params = {
        "rgb": block(k_rgb, dims_big),
        "flow": block(k_flow, dims_big),
        "audio": block(k_aud, [(128, 64)]),
        "cls": linear(k_cls, 192, 1),
    }
    return params


def ref_forward(x_rgb, x_flow, x_audio, params):
    prec = lax.Precision.HIGHEST

    def block(x, layers):
        for (w, b, g, bt, mu, var) in layers:
            x = jnp.dot(x, w.T, precision=prec) + b
            x = (x - mu) / jnp.sqrt(var + _BN_EPS) * g + bt
            x = jnp.maximum(x, 0.0)
        return x

    h_r = block(x_rgb, params["rgb"])
    h_f = block(x_flow, params["flow"])
    h_a = block(x_audio, params["audio"])
    h = jnp.concatenate([h_r, h_f, h_a], axis=1)
    w, b = params["cls"]
    return jax.nn.sigmoid(jnp.dot(h, w.T, precision=prec) + b)


if __name__ == "__main__":
    key = jax.random.PRNGKey(0)
    k_rgb, k_flow, k_aud, k_par, k_sw = jax.random.split(key, 5)

    B = 8
    x_rgb = jax.random.normal(k_rgb, (B, 1024), dtype=jnp.float32)
    x_flow = jax.random.normal(k_flow, (B, 1024), dtype=jnp.float32)
    x_audio = jax.random.normal(k_aud, (B, 128), dtype=jnp.float32)
    params = init_params(k_par)

    # Fused Pallas forward vs. pure-JAX reference (eval-mode BN, exact sigmoid).
    out = jax.block_until_ready(
        action_classification_forward(x_rgb, x_flow, x_audio, params))
    ref = ref_forward(x_rgb, x_flow, x_audio, params)
    assert out.shape == (B, 1) and out.dtype == x_rgb.dtype
    # Tolerance covers BN-folding order, MXU f32 pass decomposition and the
    # EUP approximate-reciprocal sigmoid vs. the exact reference.
    assert jnp.max(jnp.abs(out - ref)) < 1e-3, float(jnp.max(jnp.abs(out - ref)))

    # Custom Swish activation kernel (block_1's activation, shape (B, 512)).
    xs = jax.random.normal(k_sw, (B, 512), dtype=jnp.float32)
    sw = jax.block_until_ready(swish(xs, min_pallas_elems=0))
    assert sw.shape == xs.shape and sw.dtype == xs.dtype
    assert jnp.max(jnp.abs(sw - xs * jax.nn.sigmoid(xs))) < 1e-4

    print("KERNEL_OK")
</pallas_src>

<mosaic_0001>
module attributes {stable_mosaic.version = 11 : i64} {
  func.func @_fused_forward_kernel(%arg0: i32, %arg1: memref<8x1024xf32, #tpu.memory_space<vmem>>, %arg2: memref<8x1024xf32, #tpu.memory_space<vmem>>, %arg3: memref<8x128xf32, #tpu.memory_space<vmem>>, %arg4: memref<1024x512xf32, #tpu.memory_space<vmem>>, %arg5: memref<1x512xf32, #tpu.memory_space<vmem>>, %arg6: memref<512x256xf32, #tpu.memory_space<vmem>>, %arg7: memref<1x256xf32, #tpu.memory_space<vmem>>, %arg8: memref<256x128xf32, #tpu.memory_space<vmem>>, %arg9: memref<1x128xf32, #tpu.memory_space<vmem>>, %arg10: memref<128x64xf32, #tpu.memory_space<vmem>>, %arg11: memref<1x64xf32, #tpu.memory_space<vmem>>, %arg12: memref<1024x512xf32, #tpu.memory_space<vmem>>, %arg13: memref<1x512xf32, #tpu.memory_space<vmem>>, %arg14: memref<512x256xf32, #tpu.memory_space<vmem>>, %arg15: memref<1x256xf32, #tpu.memory_space<vmem>>, %arg16: memref<256x128xf32, #tpu.memory_space<vmem>>, %arg17: memref<1x128xf32, #tpu.memory_space<vmem>>, %arg18: memref<128x64xf32, #tpu.memory_space<vmem>>, %arg19: memref<1x64xf32, #tpu.memory_space<vmem>>, %arg20: memref<128x64xf32, #tpu.memory_space<vmem>>, %arg21: memref<1x64xf32, #tpu.memory_space<vmem>>, %arg22: memref<1x64xf32, #tpu.memory_space<vmem>>, %arg23: memref<1x64xf32, #tpu.memory_space<vmem>>, %arg24: memref<1x64xf32, #tpu.memory_space<vmem>>, %arg25: memref<1x1xf32, #tpu.memory_space<vmem>>, %arg26: memref<8x1xf32, #tpu.memory_space<vmem>>) attributes {dimension_semantics = [#tpu.dimension_semantics<parallel>], iteration_bounds = array<i64: 1>, scalar_prefetch = 0 : i64, scratch_operands = 0 : i64, tpu.core_type = #tpu.core_type<tc>, window_params = [{transform_indices = @transform_0, window_bounds = array<i64: 8, 1024>}, {transform_indices = @transform_1, window_bounds = array<i64: 8, 1024>}, {transform_indices = @transform_2, window_bounds = array<i64: 8, 128>}, {pipeline_mode = #tpu.pipeline_mode<synchronous>, transform_indices = @transform_3, window_bounds = array<i64: 1024, 512>}, {pipeline_mode = #tpu.pipeline_mode<synchronous>, transform_indices = @transform_4, window_bounds = array<i64: 1, 512>}, {pipeline_mode = #tpu.pipeline_mode<synchronous>, transform_indices = @transform_5, window_bounds = array<i64: 512, 256>}, {pipeline_mode = #tpu.pipeline_mode<synchronous>, transform_indices = @transform_6, window_bounds = array<i64: 1, 256>}, {pipeline_mode = #tpu.pipeline_mode<synchronous>, transform_indices = @transform_7, window_bounds = array<i64: 256, 128>}, {pipeline_mode = #tpu.pipeline_mode<synchronous>, transform_indices = @transform_8, window_bounds = array<i64: 1, 128>}, {pipeline_mode = #tpu.pipeline_mode<synchronous>, transform_indices = @transform_9, window_bounds = array<i64: 128, 64>}, {pipeline_mode = #tpu.pipeline_mode<synchronous>, transform_indices = @transform_10, window_bounds = array<i64: 1, 64>}, {pipeline_mode = #tpu.pipeline_mode<synchronous>, transform_indices = @transform_11, window_bounds = array<i64: 1024, 512>}, {pipeline_mode = #tpu.pipeline_mode<synchronous>, transform_indices = @transform_12, window_bounds = array<i64: 1, 512>}, {pipeline_mode = #tpu.pipeline_mode<synchronous>, transform_indices = @transform_13, window_bounds = array<i64: 512, 256>}, {pipeline_mode = #tpu.pipeline_mode<synchronous>, transform_indices = @transform_14, window_bounds = array<i64: 1, 256>}, {pipeline_mode = #tpu.pipeline_mode<synchronous>, transform_indices = @transform_15, window_bounds = array<i64: 256, 128>}, {pipeline_mode = #tpu.pipeline_mode<synchronous>, transform_indices = @transform_16, window_bounds = array<i64: 1, 128>}, {pipeline_mode = #tpu.pipeline_mode<synchronous>, transform_indices = @transform_17, window_bounds = array<i64: 128, 64>}, {pipeline_mode = #tpu.pipeline_mode<synchronous>, transform_indices = @transform_18, window_bounds = array<i64: 1, 64>}, {pipeline_mode = #tpu.pipeline_mode<synchronous>, transform_indices = @transform_19, window_bounds = array<i64: 128, 64>}, {pipeline_mode = #tpu.pipeline_mode<synchronous>, transform_indices = @transform_20, window_bounds = array<i64: 1, 64>}, {pipeline_mode = #tpu.pipeline_mode<synchronous>, transform_indices = @transform_21, window_bounds = array<i64: 1, 64>}, {pipeline_mode = #tpu.pipeline_mode<synchronous>, transform_indices = @transform_22, window_bounds = array<i64: 1, 64>}, {pipeline_mode = #tpu.pipeline_mode<synchronous>, transform_indices = @transform_23, window_bounds = array<i64: 1, 64>}, {pipeline_mode = #tpu.pipeline_mode<synchronous>, transform_indices = @transform_24, window_bounds = array<i64: 1, 1>}, {transform_indices = @transform_25, window_bounds = array<i64: 8, 1>}]} {
    %c0 = arith.constant 0 : index
    %c0_0 = arith.constant 0 : index
    %0 = vector.load %arg1[%c0, %c0_0] : memref<8x1024xf32, #tpu.memory_space<vmem>>, vector<8x1024xf32>
    %c0_1 = arith.constant 0 : index
    %c0_2 = arith.constant 0 : index
    %1 = vector.load %arg4[%c0_1, %c0_2] : memref<1024x512xf32, #tpu.memory_space<vmem>>, vector<1024x512xf32>
    %cst = arith.constant dense<0.000000e+00> : vector<8x512xf32>
    %2 = tpu.matmul %0, %1, %cst {dimension_numbers = #tpu.dot_dimension_numbers<[1], [0], [0], [1], [0, 0, 1, 1], [], []>} : vector<8x1024xf32>, vector<1024x512xf32>, vector<8x512xf32> -> vector<8x512xf32>
    %c0_3 = arith.constant 0 : index
    %c0_4 = arith.constant 0 : index
    %3 = vector.load %arg5[%c0_3, %c0_4] : memref<1x512xf32, #tpu.memory_space<vmem>>, vector<1x512xf32>
    %4 = vector.broadcast %3 : vector<1x512xf32> to vector<8x512xf32>
    %5 = arith.addf %2, %4 : vector<8x512xf32>
    %cst_5 = arith.constant 0.000000e+00 : f32
    %6 = vector.broadcast %cst_5 : f32 to vector<8x512xf32>
    %7 = arith.maximumf %5, %6 : vector<8x512xf32>
    %c0_6 = arith.constant 0 : index
    %c0_7 = arith.constant 0 : index
    %8 = vector.load %arg6[%c0_6, %c0_7] : memref<512x256xf32, #tpu.memory_space<vmem>>, vector<512x256xf32>
    %cst_8 = arith.constant dense<0.000000e+00> : vector<8x256xf32>
    %9 = tpu.matmul %7, %8, %cst_8 {dimension_numbers = #tpu.dot_dimension_numbers<[1], [0], [0], [1], [0, 0, 1, 1], [], []>} : vector<8x512xf32>, vector<512x256xf32>, vector<8x256xf32> -> vector<8x256xf32>
    %c0_9 = arith.constant 0 : index
    %c0_10 = arith.constant 0 : index
    %10 = vector.load %arg7[%c0_9, %c0_10] : memref<1x256xf32, #tpu.memory_space<vmem>>, vector<1x256xf32>
    %11 = vector.broadcast %10 : vector<1x256xf32> to vector<8x256xf32>
    %12 = arith.addf %9, %11 : vector<8x256xf32>
    %cst_11 = arith.constant 0.000000e+00 : f32
    %13 = vector.broadcast %cst_11 : f32 to vector<8x256xf32>
    %14 = arith.maximumf %12, %13 : vector<8x256xf32>
    %c0_12 = arith.constant 0 : index
    %c0_13 = arith.constant 0 : index
    %15 = vector.load %arg8[%c0_12, %c0_13] : memref<256x128xf32, #tpu.memory_space<vmem>>, vector<256x128xf32>
    %cst_14 = arith.constant dense<0.000000e+00> : vector<8x128xf32>
    %16 = tpu.matmul %14, %15, %cst_14 {dimension_numbers = #tpu.dot_dimension_numbers<[1], [0], [0], [1], [0, 0, 1, 1], [], []>} : vector<8x256xf32>, vector<256x128xf32>, vector<8x128xf32> -> vector<8x128xf32>
    %c0_15 = arith.constant 0 : index
    %c0_16 = arith.constant 0 : index
    %17 = vector.load %arg9[%c0_15, %c0_16] : memref<1x128xf32, #tpu.memory_space<vmem>>, vector<1x128xf32>
    %18 = vector.broadcast %17 : vector<1x128xf32> to vector<8x128xf32>
    %19 = arith.addf %16, %18 : vector<8x128xf32>
    %cst_17 = arith.constant 0.000000e+00 : f32
    %20 = vector.broadcast %cst_17 : f32 to vector<8x128xf32>
    %21 = arith.maximumf %19, %20 : vector<8x128xf32>
    %c0_18 = arith.constant 0 : index
    %c0_19 = arith.constant 0 : index
    %22 = vector.load %arg10[%c0_18, %c0_19] : memref<128x64xf32, #tpu.memory_space<vmem>>, vector<128x64xf32>
    %cst_20 = arith.constant dense<0.000000e+00> : vector<8x64xf32>
    %23 = tpu.matmul %21, %22, %cst_20 {dimension_numbers = #tpu.dot_dimension_numbers<[1], [0], [0], [1], [0, 0, 1, 1], [], []>} : vector<8x128xf32>, vector<128x64xf32>, vector<8x64xf32> -> vector<8x64xf32>
    %c0_21 = arith.constant 0 : index
    %c0_22 = arith.constant 0 : index
    %24 = vector.load %arg11[%c0_21, %c0_22] : memref<1x64xf32, #tpu.memory_space<vmem>>, vector<1x64xf32>
    %25 = vector.broadcast %24 : vector<1x64xf32> to vector<8x64xf32>
    %26 = arith.addf %23, %25 : vector<8x64xf32>
    %cst_23 = arith.constant 0.000000e+00 : f32
    %27 = vector.broadcast %cst_23 : f32 to vector<8x64xf32>
    %28 = arith.maximumf %26, %27 : vector<8x64xf32>
    %c0_24 = arith.constant 0 : index
    %c0_25 = arith.constant 0 : index
    %29 = vector.load %arg2[%c0_24, %c0_25] : memref<8x1024xf32, #tpu.memory_space<vmem>>, vector<8x1024xf32>
    %c0_26 = arith.constant 0 : index
    %c0_27 = arith.constant 0 : index
    %30 = vector.load %arg12[%c0_26, %c0_27] : memref<1024x512xf32, #tpu.memory_space<vmem>>, vector<1024x512xf32>
    %cst_28 = arith.constant dense<0.000000e+00> : vector<8x512xf32>
    %31 = tpu.matmul %29, %30, %cst_28 {dimension_numbers = #tpu.dot_dimension_numbers<[1], [0], [0], [1], [0, 0, 1, 1], [], []>} : vector<8x1024xf32>, vector<1024x512xf32>, vector<8x512xf32> -> vector<8x512xf32>
    %c0_29 = arith.constant 0 : index
    %c0_30 = arith.constant 0 : index
    %32 = vector.load %arg13[%c0_29, %c0_30] : memref<1x512xf32, #tpu.memory_space<vmem>>, vector<1x512xf32>
    %33 = vector.broadcast %32 : vector<1x512xf32> to vector<8x512xf32>
    %34 = arith.addf %31, %33 : vector<8x512xf32>
    %cst_31 = arith.constant 0.000000e+00 : f32
    %35 = vector.broadcast %cst_31 : f32 to vector<8x512xf32>
    %36 = arith.maximumf %34, %35 : vector<8x512xf32>
    %c0_32 = arith.constant 0 : index
    %c0_33 = arith.constant 0 : index
    %37 = vector.load %arg14[%c0_32, %c0_33] : memref<512x256xf32, #tpu.memory_space<vmem>>, vector<512x256xf32>
    %cst_34 = arith.constant dense<0.000000e+00> : vector<8x256xf32>
    %38 = tpu.matmul %36, %37, %cst_34 {dimension_numbers = #tpu.dot_dimension_numbers<[1], [0], [0], [1], [0, 0, 1, 1], [], []>} : vector<8x512xf32>, vector<512x256xf32>, vector<8x256xf32> -> vector<8x256xf32>
    %c0_35 = arith.constant 0 : index
    %c0_36 = arith.constant 0 : index
    %39 = vector.load %arg15[%c0_35, %c0_36] : memref<1x256xf32, #tpu.memory_space<vmem>>, vector<1x256xf32>
    %40 = vector.broadcast %39 : vector<1x256xf32> to vector<8x256xf32>
    %41 = arith.addf %38, %40 : vector<8x256xf32>
    %cst_37 = arith.constant 0.000000e+00 : f32
    %42 = vector.broadcast %cst_37 : f32 to vector<8x256xf32>
    %43 = arith.maximumf %41, %42 : vector<8x256xf32>
    %c0_38 = arith.constant 0 : index
    %c0_39 = arith.constant 0 : index
    %44 = vector.load %arg16[%c0_38, %c0_39] : memref<256x128xf32, #tpu.memory_space<vmem>>, vector<256x128xf32>
    %cst_40 = arith.constant dense<0.000000e+00> : vector<8x128xf32>
    %45 = tpu.matmul %43, %44, %cst_40 {dimension_numbers = #tpu.dot_dimension_numbers<[1], [0], [0], [1], [0, 0, 1, 1], [], []>} : vector<8x256xf32>, vector<256x128xf32>, vector<8x128xf32> -> vector<8x128xf32>
    %c0_41 = arith.constant 0 : index
    %c0_42 = arith.constant 0 : index
    %46 = vector.load %arg17[%c0_41, %c0_42] : memref<1x128xf32, #tpu.memory_space<vmem>>, vector<1x128xf32>
    %47 = vector.broadcast %46 : vector<1x128xf32> to vector<8x128xf32>
    %48 = arith.addf %45, %47 : vector<8x128xf32>
    %cst_43 = arith.constant 0.000000e+00 : f32
    %49 = vector.broadcast %cst_43 : f32 to vector<8x128xf32>
    %50 = arith.maximumf %48, %49 : vector<8x128xf32>
    %c0_44 = arith.constant 0 : index
    %c0_45 = arith.constant 0 : index
    %51 = vector.load %arg18[%c0_44, %c0_45] : memref<128x64xf32, #tpu.memory_space<vmem>>, vector<128x64xf32>
    %cst_46 = arith.constant dense<0.000000e+00> : vector<8x64xf32>
    %52 = tpu.matmul %50, %51, %cst_46 {dimension_numbers = #tpu.dot_dimension_numbers<[1], [0], [0], [1], [0, 0, 1, 1], [], []>} : vector<8x128xf32>, vector<128x64xf32>, vector<8x64xf32> -> vector<8x64xf32>
    %c0_47 = arith.constant 0 : index
    %c0_48 = arith.constant 0 : index
    %53 = vector.load %arg19[%c0_47, %c0_48] : memref<1x64xf32, #tpu.memory_space<vmem>>, vector<1x64xf32>
    %54 = vector.broadcast %53 : vector<1x64xf32> to vector<8x64xf32>
    %55 = arith.addf %52, %54 : vector<8x64xf32>
    %cst_49 = arith.constant 0.000000e+00 : f32
    %56 = vector.broadcast %cst_49 : f32 to vector<8x64xf32>
    %57 = arith.maximumf %55, %56 : vector<8x64xf32>
    %c0_50 = arith.constant 0 : index
    %c0_51 = arith.constant 0 : index
    %58 = vector.load %arg3[%c0_50, %c0_51] : memref<8x128xf32, #tpu.memory_space<vmem>>, vector<8x128xf32>
    %c0_52 = arith.constant 0 : index
    %c0_53 = arith.constant 0 : index
    %59 = vector.load %arg20[%c0_52, %c0_53] : memref<128x64xf32, #tpu.memory_space<vmem>>, vector<128x64xf32>
    %cst_54 = arith.constant dense<0.000000e+00> : vector<8x64xf32>
    %60 = tpu.matmul %58, %59, %cst_54 {dimension_numbers = #tpu.dot_dimension_numbers<[1], [0], [0], [1], [0, 0, 1, 1], [], []>} : vector<8x128xf32>, vector<128x64xf32>, vector<8x64xf32> -> vector<8x64xf32>
    %c0_55 = arith.constant 0 : index
    %c0_56 = arith.constant 0 : index
    %61 = vector.load %arg21[%c0_55, %c0_56] : memref<1x64xf32, #tpu.memory_space<vmem>>, vector<1x64xf32>
    %62 = vector.broadcast %61 : vector<1x64xf32> to vector<8x64xf32>
    %63 = arith.addf %60, %62 : vector<8x64xf32>
    %cst_57 = arith.constant 0.000000e+00 : f32
    %64 = vector.broadcast %cst_57 : f32 to vector<8x64xf32>
    %65 = arith.maximumf %63, %64 : vector<8x64xf32>
    %c0_58 = arith.constant 0 : index
    %c0_59 = arith.constant 0 : index
    %66 = vector.load %arg22[%c0_58, %c0_59] : memref<1x64xf32, #tpu.memory_space<vmem>>, vector<1x64xf32>
    %67 = vector.broadcast %66 : vector<1x64xf32> to vector<8x64xf32>
    %68 = arith.mulf %28, %67 : vector<8x64xf32>
    %cst_60 = arith.constant dense<0.000000e+00> : vector<8xf32>
    %69 = vector.multi_reduction <add>, %68, %cst_60 [1] : vector<8x64xf32> to vector<8xf32>
    %70 = vector.shape_cast %69 : vector<8xf32> to vector<8x1xf32>
    %c0_61 = arith.constant 0 : index
    %c0_62 = arith.constant 0 : index
    %71 = vector.load %arg23[%c0_61, %c0_62] : memref<1x64xf32, #tpu.memory_space<vmem>>, vector<1x64xf32>
    %72 = vector.broadcast %71 : vector<1x64xf32> to vector<8x64xf32>
    %73 = arith.mulf %57, %72 : vector<8x64xf32>
    %cst_63 = arith.constant dense<0.000000e+00> : vector<8xf32>
    %74 = vector.multi_reduction <add>, %73, %cst_63 [1] : vector<8x64xf32> to vector<8xf32>
    %75 = vector.shape_cast %74 : vector<8xf32> to vector<8x1xf32>
    %76 = arith.addf %70, %75 : vector<8x1xf32>
    %c0_64 = arith.constant 0 : index
    %c0_65 = arith.constant 0 : index
    %77 = vector.load %arg24[%c0_64, %c0_65] : memref<1x64xf32, #tpu.memory_space<vmem>>, vector<1x64xf32>
    %78 = vector.broadcast %77 : vector<1x64xf32> to vector<8x64xf32>
    %79 = arith.mulf %65, %78 : vector<8x64xf32>
    %cst_66 = arith.constant dense<0.000000e+00> : vector<8xf32>
    %80 = vector.multi_reduction <add>, %79, %cst_66 [1] : vector<8x64xf32> to vector<8xf32>
    %81 = vector.shape_cast %80 : vector<8xf32> to vector<8x1xf32>
    %82 = arith.addf %76, %81 : vector<8x1xf32>
    %c0_67 = arith.constant 0 : index
    %c0_68 = arith.constant 0 : index
    %83 = vector.load %arg25[%c0_67, %c0_68] : memref<1x1xf32, #tpu.memory_space<vmem>>, vector<1x1xf32>
    %84 = vector.broadcast %83 : vector<1x1xf32> to vector<8x1xf32>
    %85 = arith.addf %82, %84 : vector<8x1xf32>
    %cst_69 = arith.constant 0.000000e+00 : f32
    %86 = vector.broadcast %cst_69 : f32 to vector<8x1xf32>
    %87 = arith.subf %86, %85 : vector<8x1xf32>
    %88 = math.exp %87 : vector<8x1xf32>
    %cst_70 = arith.constant 1.000000e+00 : f32
    %89 = vector.broadcast %cst_70 : f32 to vector<8x1xf32>
    %90 = arith.addf %89, %88 : vector<8x1xf32>
    %91 = tpu.reciprocal %90 {approx = true} : vector<8x1xf32> -> vector<8x1xf32>
    %92 = arith.mulf %90, %91 : vector<8x1xf32>
    %cst_71 = arith.constant 2.000000e+00 : f32
    %93 = vector.broadcast %cst_71 : f32 to vector<8x1xf32>
    %94 = arith.subf %93, %92 : vector<8x1xf32>
    %95 = arith.mulf %91, %94 : vector<8x1xf32>
    %96 = math.absf %90 : vector<8x1xf32>
    %cst_72 = arith.constant 0x7F800000 : f32
    %97 = vector.broadcast %cst_72 : f32 to vector<8x1xf32>
    %98 = arith.cmpf oeq, %96, %97 : vector<8x1xf32>
    %cst_73 = arith.constant 0.000000e+00 : f32
    %99 = vector.broadcast %cst_73 : f32 to vector<8x1xf32>
    %100 = arith.select %98, %99, %95 : vector<8x1xi1>, vector<8x1xf32>
    %c0_74 = arith.constant 0 : index
    %c0_75 = arith.constant 0 : index
    %101 = vector.load %arg26[%c0_74, %c0_75] : memref<8x1xf32, #tpu.memory_space<vmem>>, vector<8x1xf32>
    tpu.vector_store %arg26[%c0_74, %c0_75], %100 {strides = array<i32>} : memref<8x1xf32, #tpu.memory_space<vmem>>, vector<8x1xf32>,
    return
  }
  func.func @transform_0(%arg0: i32) -> (i32, i32) {
    %c0_i32 = arith.constant 0 : i32
    %c0_i32_0 = arith.constant 0 : i32
    return %arg0, %c0_i32 : i32, i32
  }
  func.func @transform_1(%arg0: i32) -> (i32, i32) {
    %c0_i32 = arith.constant 0 : i32
    %c0_i32_0 = arith.constant 0 : i32
    return %arg0, %c0_i32 : i32, i32
  }
  func.func @transform_2(%arg0: i32) -> (i32, i32) {
    %c0_i32 = arith.constant 0 : i32
    %c0_i32_0 = arith.constant 0 : i32
    return %arg0, %c0_i32 : i32, i32
  }
  func.func @transform_3(%arg0: i32) -> (i32, i32) {
    %c0_i32 = arith.constant 0 : i32
    %c0_i32_0 = arith.constant 0 : i32
    %c0_i32_1 = arith.constant 0 : i32
    return %c0_i32, %c0_i32_0 : i32, i32
  }
  func.func @transform_4(%arg0: i32) -> (i32, i32) {
    %c0_i32 = arith.constant 0 : i32
    %c0_i32_0 = arith.constant 0 : i32
    %c0_i32_1 = arith.constant 0 : i32
    return %c0_i32, %c0_i32_0 : i32, i32
  }
  func.func @transform_5(%arg0: i32) -> (i32, i32) {
    %c0_i32 = arith.constant 0 : i32
    %c0_i32_0 = arith.constant 0 : i32
    %c0_i32_1 = arith.constant 0 : i32
    return %c0_i32, %c0_i32_0 : i32, i32
  }
  func.func @transform_6(%arg0: i32) -> (i32, i32) {
    %c0_i32 = arith.constant 0 : i32
    %c0_i32_0 = arith.constant 0 : i32
    %c0_i32_1 = arith.constant 0 : i32
    return %c0_i32, %c0_i32_0 : i32, i32
  }
  func.func @transform_7(%arg0: i32) -> (i32, i32) {
    %c0_i32 = arith.constant 0 : i32
    %c0_i32_0 = arith.constant 0 : i32
    %c0_i32_1 = arith.constant 0 : i32
    return %c0_i32, %c0_i32_0 : i32, i32
  }
  func.func @transform_8(%arg0: i32) -> (i32, i32) {
    %c0_i32 = arith.constant 0 : i32
    %c0_i32_0 = arith.constant 0 : i32
    %c0_i32_1 = arith.constant 0 : i32
    return %c0_i32, %c0_i32_0 : i32, i32
  }
  func.func @transform_9(%arg0: i32) -> (i32, i32) {
    %c0_i32 = arith.constant 0 : i32
    %c0_i32_0 = arith.constant 0 : i32
    %c0_i32_1 = arith.constant 0 : i32
    return %c0_i32, %c0_i32_0 : i32, i32
  }
  func.func @transform_10(%arg0: i32) -> (i32, i32) {
    %c0_i32 = arith.constant 0 : i32
    %c0_i32_0 = arith.constant 0 : i32
    %c0_i32_1 = arith.constant 0 : i32
    return %c0_i32, %c0_i32_0 : i32, i32
  }
  func.func @transform_11(%arg0: i32) -> (i32, i32) {
    %c0_i32 = arith.constant 0 : i32
    %c0_i32_0 = arith.constant 0 : i32
    %c0_i32_1 = arith.constant 0 : i32
    return %c0_i32, %c0_i32_0 : i32, i32
  }
  func.func @transform_12(%arg0: i32) -> (i32, i32) {
    %c0_i32 = arith.constant 0 : i32
    %c0_i32_0 = arith.constant 0 : i32
    %c0_i32_1 = arith.constant 0 : i32
    return %c0_i32, %c0_i32_0 : i32, i32
  }
  func.func @transform_13(%arg0: i32) -> (i32, i32) {
    %c0_i32 = arith.constant 0 : i32
    %c0_i32_0 = arith.constant 0 : i32
    %c0_i32_1 = arith.constant 0 : i32
    return %c0_i32, %c0_i32_0 : i32, i32
  }
  func.func @transform_14(%arg0: i32) -> (i32, i32) {
    %c0_i32 = arith.constant 0 : i32
    %c0_i32_0 = arith.constant 0 : i32
    %c0_i32_1 = arith.constant 0 : i32
    return %c0_i32, %c0_i32_0 : i32, i32
  }
  func.func @transform_15(%arg0: i32) -> (i32, i32) {
    %c0_i32 = arith.constant 0 : i32
    %c0_i32_0 = arith.constant 0 : i32
    %c0_i32_1 = arith.constant 0 : i32
    return %c0_i32, %c0_i32_0 : i32, i32
  }
  func.func @transform_16(%arg0: i32) -> (i32, i32) {
    %c0_i32 = arith.constant 0 : i32
    %c0_i32_0 = arith.constant 0 : i32
    %c0_i32_1 = arith.constant 0 : i32
    return %c0_i32, %c0_i32_0 : i32, i32
  }
  func.func @transform_17(%arg0: i32) -> (i32, i32) {
    %c0_i32 = arith.constant 0 : i32
    %c0_i32_0 = arith.constant 0 : i32
    %c0_i32_1 = arith.constant 0 : i32
    return %c0_i32, %c0_i32_0 : i32, i32
  }
  func.func @transform_18(%arg0: i32) -> (i32, i32) {
    %c0_i32 = arith.constant 0 : i32
    %c0_i32_0 = arith.constant 0 : i32
    %c0_i32_1 = arith.constant 0 : i32
    return %c0_i32, %c0_i32_0 : i32, i32
  }
  func.func @transform_19(%arg0: i32) -> (i32, i32) {
    %c0_i32 = arith.constant 0 : i32
    %c0_i32_0 = arith.constant 0 : i32
    %c0_i32_1 = arith.constant 0 : i32
    return %c0_i32, %c0_i32_0 : i32, i32
  }
  func.func @transform_20(%arg0: i32) -> (i32, i32) {
    %c0_i32 = arith.constant 0 : i32
    %c0_i32_0 = arith.constant 0 : i32
    %c0_i32_1 = arith.constant 0 : i32
    return %c0_i32, %c0_i32_0 : i32, i32
  }
  func.func @transform_21(%arg0: i32) -> (i32, i32) {
    %c0_i32 = arith.constant 0 : i32
    %c0_i32_0 = arith.constant 0 : i32
    %c0_i32_1 = arith.constant 0 : i32
    return %c0_i32, %c0_i32_0 : i32, i32
  }
  func.func @transform_22(%arg0: i32) -> (i32, i32) {
    %c0_i32 = arith.constant 0 : i32
    %c0_i32_0 = arith.constant 0 : i32
    %c0_i32_1 = arith.constant 0 : i32
    return %c0_i32, %c0_i32_0 : i32, i32
  }
  func.func @transform_23(%arg0: i32) -> (i32, i32) {
    %c0_i32 = arith.constant 0 : i32
    %c0_i32_0 = arith.constant 0 : i32
    %c0_i32_1 = arith.constant 0 : i32
    return %c0_i32, %c0_i32_0 : i32, i32
  }
  func.func @transform_24(%arg0: i32) -> (i32, i32) {
    %c0_i32 = arith.constant 0 : i32
    %c0_i32_0 = arith.constant 0 : i32
    %c0_i32_1 = arith.constant 0 : i32
    return %c0_i32, %c0_i32_0 : i32, i32
  }
  func.func @transform_25(%arg0: i32) -> (i32, i32) {
    %c0_i32 = arith.constant 0 : i32
    %c0_i32_0 = arith.constant 0 : i32
    return %arg0, %c0_i32 : i32, i32
  }
}

</mosaic_0001>

<bundles_post_ra>
// kernel: tpu_custom_call.1
= control target key start
LH: loop header
LB: loop body
LE: loop exit
PB: predicated region body
PF: predicated region fallthrough
CT: control target
= control target key end

     0   :  { %s6614_s0 = inlined_call_operand.hbm [shape: f32[8,1024], index: 0, kind: input, shape index: {}]   ;;  %s6615_s1 = inlined_call_operand.hbm [shape: f32[8,1024], index: 1, kind: input, shape index: {}]   ;;  %s6616_s2 = inlined_call_operand.hbm [shape: f32[8,128], index: 2, kind: input, shape index: {}]   ;;  %s6617_s3 = inlined_call_operand.hbm [shape: f32[1024,512], index: 3, kind: input, shape index: {}]   ;;  %s6618_s4 = inlined_call_operand.hbm [shape: f32[1,512], index: 4, kind: input, shape index: {}]   ;;  %s6619_s5 = inlined_call_operand.hbm [shape: f32[512,256], index: 5, kind: input, shape index: {}]   ;;  %s6620_s6 = inlined_call_operand.hbm [shape: f32[1,256], index: 6, kind: input, shape index: {}]   ;;  %s6621_s7 = inlined_call_operand.hbm [shape: f32[256,128], index: 7, kind: input, shape index: {}]   ;;  %s6622_s8 = inlined_call_operand.hbm [shape: f32[1,128], index: 8, kind: input, shape index: {}]   ;;  %s6623_s9 = inlined_call_operand.vmem [shape: f32[128,64], index: 9, kind: input, shape index: {}]   ;;  %s6624_s10 = inlined_call_operand.hbm [shape: f32[1,64], index: 10, kind: input, shape index: {}]   ;;  %s6625_s11 = inlined_call_operand.hbm [shape: f32[1024,512], index: 11, kind: input, shape index: {}]   ;;  %s6626_s12 = inlined_call_operand.hbm [shape: f32[1,512], index: 12, kind: input, shape index: {}]   ;;  %s6627_s13 = inlined_call_operand.hbm [shape: f32[512,256], index: 13, kind: input, shape index: {}]   ;;  %s6628_s14 = inlined_call_operand.hbm [shape: f32[1,256], index: 14, kind: input, shape index: {}]   ;;  %s6629_s15 = inlined_call_operand.hbm [shape: f32[256,128], index: 15, kind: input, shape index: {}]   ;;  %s6630_s16 = inlined_call_operand.hbm [shape: f32[1,128], index: 16, kind: input, shape index: {}]   ;;  %s6631_s17 = inlined_call_operand.vmem [shape: f32[128,64], index: 17, kind: input, shape index: {}]   ;;  %s6632_s18 = inlined_call_operand.hbm [shape: f32[1,64], index: 18, kind: input, shape index: {}]   ;;  %s6633_s19 = inlined_call_operand.vmem [shape: f32[128,64], index: 19, kind: input, shape index: {}]   ;;  %s6634_s20 = inlined_call_operand.hbm [shape: f32[1,64], index: 20, kind: input, shape index: {}]   ;;  %s6635_s21 = inlined_call_operand.hbm [shape: f32[1,64], index: 21, kind: input, shape index: {}]   ;;  %s6636_s22 = inlined_call_operand.hbm [shape: f32[1,64], index: 22, kind: input, shape index: {}]   ;;  %s6637_s23 = inlined_call_operand.hbm [shape: f32[1,64], index: 23, kind: input, shape index: {}]   ;;  %s6638_s24 = inlined_call_operand.<no memory space> [shape: f32[1,1], index: 24, kind: input, shape index: {}]   ;;  %s6639_s25 = inlined_call_operand.vmem [shape: f32[8,1], index: 25, kind: output, shape index: {}]  }
   0x1   :  { %6654 = sst [smem:[#allocation46_spill]] %s6614_s0  ;;  %v30_v0 = vstv %s6638_s24 }
   0x2   :  { %6655 = sst [smem:[#allocation47_spill]] %s6615_s1  ;;  %31 = vst [vmem:[#allocation2] sm:$0x1] %v30_v0 }
   0x3   :  { %6656 = sst [smem:[#allocation48_spill]] %s6616_s2 }
   0x4   :  { %6657 = sst [smem:[#allocation49_spill]] %s6617_s3 }
   0x5   :  { %6658 = sst [smem:[#allocation50_spill]] %s6618_s4 }
   0x6   :  { %6659 = sst [smem:[#allocation51_spill]] %s6619_s5 }
   0x7   :  { %6660 = sst [smem:[#allocation52_spill]] %s6620_s6 }
   0x8   :  { %6661 = sst [smem:[#allocation53_spill]] %s6621_s7 }
   0x9   :  { %6662 = sst [smem:[#allocation54_spill]] %s6622_s8 }
   0xa   :  { %6663 = sst [smem:[#allocation55_spill]] %s6623_s9 }
   0xb   :  { %6664 = sst [smem:[#allocation56_spill]] %s6639_s25 }
   0xc   :  { %32 = vsyncpa [#allocation4], 0 }
   0xd   :  { %33 = vsyncpa [#allocation6], 0 }
   0xe   :  { %34 = vsyncpa [#allocation9], 0 }
   0xf   :  { %35 = vsyncpa [#allocation12], 0 }
  0x10   :  { %36 = vsyncpa [#allocation15], 0 }
  0x11   :  { %37 = vsyncpa [#allocation18], 0 }
  0x12   :  { %38 = vsyncpa [#allocation21], 0 }
  0x13   :  { %39 = vsyncpa [#allocation24], 0 }
  0x14   :  { %40 = vsyncpa [#allocation27], 0 }
  0x15   :  { %41 = vsyncpa [#allocation30], 0 }
  0x16   :  { %42 = vsyncpa [#allocation33], 0  ;;  %s5921_s6 = smov [#allocation5]   ;;  %s5922_s7 = smov [#allocation8]  }
  0x17   :  { %s59_s30 = sshll.u32 %s5921_s6, 4  ;;  %s78_s3 = sshll.u32 %s5922_s7, 4  ;;  %s60_s30 = int_to_ptr.vmem [resolvable:$true] %s59_s30  ;;  %s6084_s3 = int_to_ptr.vmem [resolvable:$true] %s78_s3 }
  0x18   :  { %s6665_s1 = sld [smem:[#allocation47_spill]] }
  0x1e   :  { %s5437_s8 = scalar_lea.hbm %s6665_s1, 1024 }
  0x1f   :  { %p5438_p0 = scmp.ne.s32.totalorder %s6665_s1, %s5437_s8  ;;  %p5441_p1 = scmp.lt.u32.totalorder %s5437_s8, %s6665_s1 }
  0x21   :  { %p5443_p2 = pnand %p5441_p1, %p5438_p0 }
  0x23   :  { %5446 = shalt.err (!%p5443_p2)
}
  0x24   :  { %s5447_s5 = scalar_lea.vmem %s60_s30, 1024  ;;  %p5452_p4 = scmp.lt.s32.totalorder %s60_s30, %s60_s30 }
  0x25   :  { %p5448_p3 = scmp.ne.s32.totalorder %s60_s30, %s5447_s5  ;;  %p5453_p5 = scmp.lt.s32.totalorder %s5447_s5, %s5447_s5 }
  0x27   :  { %p5454_p6 = por %p5453_p5, %p5452_p4 }
  0x29   :  { %p5455_p7 = pnand %p5454_p6, %p5448_p3 }
  0x2b   :  { %5458 = shalt.err (!%p5455_p7)
}
  0x2c   :  { %62 = dma.hbm_to_vmem [thread:$0]  %s6665_s1, 1024, %s60_s30, [#allocation6]  }
  0x2d   :  { %s6666_s7 = sld [smem:[#allocation49_spill]] }
  0x33   :  { %s5459_s24 = scalar_lea.hbm %s6666_s7, 65536 }
  0x34   :  { %p5460_p8 = scmp.ne.s32.totalorder %s6666_s7, %s5459_s24  ;;  %p5463_p9 = scmp.lt.u32.totalorder %s5459_s24, %s6666_s7 }
  0x36   :  { %p5465_p10 = pnand %p5463_p9, %p5460_p8 }
  0x38   :  { %5468 = shalt.err (!%p5465_p10)
}
  0x39   :  { %s5469_s28 = scalar_lea.vmem %s6084_s3, 65536  ;;  %p5474_p12 = scmp.lt.s32.totalorder %s6084_s3, %s6084_s3 }
  0x3a   :  { %p5470_p11 = scmp.ne.s32.totalorder %s6084_s3, %s5469_s28  ;;  %p5475_p13 = scmp.lt.s32.totalorder %s5469_s28, %s5469_s28 }
  0x3c   :  { %p5476_p0 = por %p5475_p13, %p5474_p12 }
  0x3e   :  { %p5477_p1 = pnand %p5476_p0, %p5470_p11 }
  0x40   :  { %5480 = shalt.err (!%p5477_p1)
}
  0x41   :  { %s6650_s30 = smov 512   ;;  %s6651_s1 = smov 32  }
  0x42   :  { %84 = dma.hbm_to_vmem [thread:$0]  %s6666_s7, 65536, %s6084_s3, [#allocation9], %s6650_s30, %s6650_s30, %s6651_s1  }
  0x43   :  { %s5925_s0 = smov [#allocation11]   ;;  %s6667_s24 = sld [smem:[#allocation51_spill]] }
  0x44   :  { %s100_s29 = sshll.u32 %s5925_s0, 4  ;;  %s101_s29 = int_to_ptr.vmem [resolvable:$true] %s100_s29 }
  0x49   :  { %s5481_s26 = scalar_lea.hbm %s6667_s24, 16384 }
  0x4a   :  { %p5482_p2 = scmp.ne.s32.totalorder %s6667_s24, %s5481_s26  ;;  %p5485_p3 = scmp.lt.u32.totalorder %s5481_s26, %s6667_s24 }
  0x4c   :  { %p5487_p4 = pnand %p5485_p3, %p5482_p2 }
  0x4e   :  { %5490 = shalt.err (!%p5487_p4)
}
  0x4f   :  { %s5491_s25 = scalar_lea.vmem %s101_s29, 16384  ;;  %p5496_p6 = scmp.lt.s32.totalorder %s101_s29, %s101_s29 }
  0x50   :  { %p5492_p5 = scmp.ne.s32.totalorder %s101_s29, %s5491_s25  ;;  %p5497_p7 = scmp.lt.s32.totalorder %s5491_s25, %s5491_s25 }
  0x52   :  { %p5498_p8 = por %p5497_p7, %p5496_p6 }
  0x54   :  { %p5499_p9 = pnand %p5498_p8, %p5492_p5 }
  0x56   :  { %5502 = shalt.err (!%p5499_p9)
}
  0x57   :  { %s6652_s3 = smov 256   ;;  %s6653_s7 = smov 16  }
  0x58   :  { %106 = dma.hbm_to_vmem [thread:$0]  %s6667_s24, 16384, %s101_s29, [#allocation12], %s6652_s3, %s6652_s3, %s6653_s7  }
  0x59   :  { %s5928_s0 = smov [#allocation14]   ;;  %s6668_s27 = sld [smem:[#allocation53_spill]] }
  0x5a   :  { %s122_s2 = sshll.u32 %s5928_s0, 4  ;;  %s123_s2 = int_to_ptr.vmem [resolvable:$true] %s122_s2 }
  0x5f   :  { %s5503_s8 = scalar_lea.hbm %s6668_s27, 4096 }
  0x60   :  { %p5504_p10 = scmp.ne.s32.totalorder %s6668_s27, %s5503_s8  ;;  %p5507_p11 = scmp.lt.u32.totalorder %s5503_s8, %s6668_s27 }
  0x62   :  { %p5509_p12 = pnand %p5507_p11, %p5504_p10 }
  0x64   :  { %5512 = shalt.err (!%p5509_p12)
}
  0x65   :  { %s5513_s1 = scalar_lea.vmem %s123_s2, 4096  ;;  %p5518_p0 = scmp.lt.s32.totalorder %s123_s2, %s123_s2 }
  0x66   :  { %p5514_p13 = scmp.ne.s32.totalorder %s123_s2, %s5513_s1  ;;  %p5519_p1 = scmp.lt.s32.totalorder %s5513_s1, %s5513_s1 }
  0x68   :  { %p5520_p2 = por %p5519_p1, %p5518_p0 }
  0x6a   :  { %p5521_p3 = pnand %p5520_p2, %p5514_p13 }
  0x6c   :  { %5524 = shalt.err (!%p5521_p3)
}
  0x6d   :  { %s5929_s29 = smov 128   ;;  %s5930_s24 = smov 8  }
  0x6e   :  { %128 = dma.hbm_to_vmem [thread:$0]  %s6668_s27, 4096, %s123_s2, [#allocation15], %s5929_s29, %s5929_s29, %s5930_s24  }
  0x6f   :  { %s5931_s30 = smov [#allocation17]   ;;  %s5932_s6 = smov [#allocation20]  }
  0x70   :  { %s147_s0 = sshll.u32 %s5931_s30, 4  ;;  %s169_s26 = sshll.u32 %s5932_s6, 4  ;;  %s148_s0 = int_to_ptr.vmem [resolvable:$true] %s147_s0  ;;  %s170_s26 = int_to_ptr.vmem [resolvable:$true] %s169_s26 }
  0x71   :  { %s5525_s25 = scalar_lea.hbm %s6624_s10, 16 }
  0x72   :  { %p5526_p4 = scmp.ne.s32.totalorder %s6624_s10, %s5525_s25  ;;  %p5529_p5 = scmp.lt.u32.totalorder %s5525_s25, %s6624_s10 }
  0x74   :  { %p5531_p6 = pnand %p5529_p5, %p5526_p4 }
  0x76   :  { %5534 = shalt.err (!%p5531_p6)
}
  0x77   :  { %s5535_s2 = scalar_lea.vmem %s148_s0, 16  ;;  %s5539_s27 = scalar_lea.vmem %s148_s0, 32 }
  0x78   :  { %p5536_p7 = scmp.ne.s32.totalorder %s148_s0, %s5535_s2  ;;  %p5540_p8 = scmp.lt.s32.totalorder %s148_s0, %s148_s0 }
  0x79   :  { %p5541_p9 = scmp.lt.s32.totalorder %s5539_s27, %s5535_s2 }
  0x7b   :  { %p5542_p10 = por %p5541_p9, %p5540_p8 }
  0x7d   :  { %p5543_p11 = pnand %p5542_p10, %p5536_p7 }
  0x7f   :  { %5546 = shalt.err (!%p5543_p11)
}
  0x80   :  { %150 = dma.hbm_to_vmem [thread:$0]  %s6624_s10, 16, %s148_s0, [#allocation18]  }
  0x81   :  { %s5547_s8 = scalar_lea.hbm %s6626_s12, 64 }
  0x82   :  { %p5548_p12 = scmp.ne.s32.totalorder %s6626_s12, %s5547_s8  ;;  %p5551_p13 = scmp.lt.u32.totalorder %s5547_s8, %s6626_s12 }
  0x84   :  { %p5553_p0 = pnand %p5551_p13, %p5548_p12 }
  0x86   :  { %5556 = shalt.err (!%p5553_p0)
}
  0x87   :  { %s5557_s4 = scalar_lea.vmem %s170_s26, 64  ;;  %p5562_p2 = scmp.lt.s32.totalorder %s170_s26, %s170_s26 }
  0x88   :  { %p5558_p1 = scmp.ne.s32.totalorder %s170_s26, %s5557_s4  ;;  %p5563_p3 = scmp.lt.s32.totalorder %s5557_s4, %s5557_s4 }
  0x8a   :  { %p5564_p4 = por %p5563_p3, %p5562_p2 }
  0x8c   :  { %p5565_p5 = pnand %p5564_p4, %p5558_p1 }
  0x8e   :  { %5568 = shalt.err (!%p5565_p5)
}
  0x8f   :  { %172 = dma.hbm_to_vmem [thread:$0]  %s6626_s12, 64, %s170_s26, [#allocation21]  }
  0x90   :  { %s5933_s28 = smov [#allocation23]   ;;  %s5934_s27 = smov [#allocation26]  }
  0x91   :  { %s191_s2 = sshll.u32 %s5933_s28, 4  ;;  %s213_s9 = sshll.u32 %s5934_s27, 4  ;;  %s192_s2 = int_to_ptr.vmem [resolvable:$true] %s191_s2  ;;  %s214_s9 = int_to_ptr.vmem [resolvable:$true] %s213_s9 }
  0x92   :  { %s5569_s6 = scalar_lea.hbm %s6628_s14, 32 }
  0x93   :  { %p5570_p6 = scmp.ne.s32.totalorder %s6628_s14, %s5569_s6  ;;  %p5573_p7 = scmp.lt.u32.totalorder %s5569_s6, %s6628_s14 }
  0x95   :  { %p5575_p8 = pnand %p5573_p7, %p5570_p6 }
  0x97   :  { %5578 = shalt.err (!%p5575_p8)
}
  0x98   :  { %s5579_s12 = scalar_lea.vmem %s192_s2, 32  ;;  %p5584_p10 = scmp.lt.s32.totalorder %s192_s2, %s192_s2 }
  0x99   :  { %p5580_p9 = scmp.ne.s32.totalorder %s192_s2, %s5579_s12  ;;  %p5585_p11 = scmp.lt.s32.totalorder %s5579_s12, %s5579_s12 }
  0x9b   :  { %p5586_p12 = por %p5585_p11, %p5584_p10 }
  0x9d   :  { %p5587_p13 = pnand %p5586_p12, %p5580_p9 }
  0x9f   :  { %5590 = shalt.err (!%p5587_p13)
}
  0xa0   :  { %194 = dma.hbm_to_vmem [thread:$0]  %s6628_s14, 32, %s192_s2, [#allocation24]  }
  0xa1   :  { %s5591_s0 = scalar_lea.hbm %s6630_s16, 16 }
  0xa2   :  { %p5592_p0 = scmp.ne.s32.totalorder %s6630_s16, %s5591_s0  ;;  %p5595_p1 = scmp.lt.u32.totalorder %s5591_s0, %s6630_s16 }
  0xa4   :  { %p5597_p2 = pnand %p5595_p1, %p5592_p0 }
  0xa6   :  { %5600 = shalt.err (!%p5597_p2)
}
  0xa7   :  { %s5601_s6 = scalar_lea.vmem %s214_s9, 16  ;;  %s5605_s8 = scalar_lea.vmem %s214_s9, 32 }
  0xa8   :  { %p5602_p3 = scmp.ne.s32.totalorder %s214_s9, %s5601_s6  ;;  %p5606_p4 = scmp.lt.s32.totalorder %s214_s9, %s214_s9 }
  0xa9   :  { %p5607_p5 = scmp.lt.s32.totalorder %s5605_s8, %s5601_s6 }
  0xab   :  { %p5608_p6 = por %p5607_p5, %p5606_p4 }
  0xad   :  { %p5609_p7 = pnand %p5608_p6, %p5602_p3 }
  0xaf   :  { %5612 = shalt.err (!%p5609_p7)
}
  0xb0   :  { %216 = dma.hbm_to_vmem [thread:$0]  %s6630_s16, 16, %s214_s9, [#allocation27]  }
  0xb1   :  { %s5935_s3 = smov [#allocation29]   ;;  %s5936_s1 = smov [#allocation32]  }
  0xb2   :  { %s237_s7 = sshll.u32 %s5935_s3, 4  ;;  %s257_s12 = sshll.u32 %s5936_s1, 4  ;;  %s238_s7 = int_to_ptr.vmem [resolvable:$true] %s237_s7  ;;  %s258_s12 = int_to_ptr.vmem [resolvable:$true] %s257_s12 }
  0xb3   :  { %s5613_s4 = scalar_lea.hbm %s6634_s20, 16 }
  0xb4   :  { %p5614_p8 = scmp.ne.s32.totalorder %s6634_s20, %s5613_s4  ;;  %p5617_p9 = scmp.lt.u32.totalorder %s5613_s4, %s6634_s20 }
  0xb6   :  { %p5619_p10 = pnand %p5617_p9, %p5614_p8 }
  0xb8   :  { %5622 = shalt.err (!%p5619_p10)
}
  0xb9   :  { %s5623_s16 = scalar_lea.vmem %s238_s7, 16  ;;  %s5627_s9 = scalar_lea.vmem %s238_s7, 32 }
  0xba   :  { %p5624_p11 = scmp.ne.s32.totalorder %s238_s7, %s5623_s16  ;;  %p5628_p12 = scmp.lt.s32.totalorder %s238_s7, %s238_s7 }
  0xbb   :  { %p5629_p13 = scmp.lt.s32.totalorder %s5627_s9, %s5623_s16 }
  0xbd   :  { %p5630_p0 = por %p5629_p13, %p5628_p12 }
  0xbf   :  { %p5631_p1 = pnand %p5630_p0, %p5624_p11 }
  0xc1   :  { %5634 = shalt.err (!%p5631_p1)
}
  0xc2   :  { %240 = dma.hbm_to_vmem [thread:$0]  %s6634_s20, 16, %s238_s7, [#allocation30]  }
  0xc3   :  { %s5635_s14 = scalar_lea.hbm %s6636_s22, 16 }
  0xc4   :  { %p5636_p2 = scmp.ne.s32.totalorder %s6636_s22, %s5635_s14  ;;  %p5639_p3 = scmp.lt.u32.totalorder %s5635_s14, %s6636_s22 }
  0xc6   :  { %p5641_p4 = pnand %p5639_p3, %p5636_p2 }
  0xc8   :  { %5644 = shalt.err (!%p5641_p4)
}
  0xc9   :  { %s5645_s25 = scalar_lea.vmem %s258_s12, 16  ;;  %s5649_s4 = scalar_lea.vmem %s258_s12, 32 }
  0xca   :  { %p5646_p5 = scmp.ne.s32.totalorder %s258_s12, %s5645_s25  ;;  %p5650_p6 = scmp.lt.s32.totalorder %s258_s12, %s258_s12 }
  0xcb   :  { %p5651_p7 = scmp.lt.s32.totalorder %s5649_s4, %s5645_s25 }
  0xcd   :  { %p5652_p8 = por %p5651_p7, %p5650_p6 }
  0xcf   :  { %p5653_p9 = pnand %p5652_p8, %p5646_p5 }
  0xd1   :  { %5656 = shalt.err (!%p5653_p9)
}
  0xd2   :  { %260 = dma.hbm_to_vmem [thread:$0]  %s6636_s22, 16, %s258_s12, [#allocation33]  }
  0xd3   :  { %s5937_s10 = smov [#allocation3]   ;;  %s5938_s28 = smov [#allocation7]  }
  0xd4   :  { %s49_s0 = sshll.u32 %s5937_s10, 4  ;;  %s69_s27 = sshll.u32 %s5938_s28, 4  ;;  %s50_s0 = int_to_ptr.vmem [resolvable:$true] %s49_s0  ;;  %s70_s27 = int_to_ptr.vmem [resolvable:$true] %s69_s27 }
  0xd5   :  { %s6669_s5 = sld [smem:[#allocation46_spill]] }
  0xdb   :  { %s5657_s30 = scalar_lea.hbm %s6669_s5, 1024 }
  0xdc   :  { %p5658_p10 = scmp.ne.s32.totalorder %s6669_s5, %s5657_s30  ;;  %p5661_p11 = scmp.lt.u32.totalorder %s5657_s30, %s6669_s5 }
  0xde   :  { %p5663_p12 = pnand %p5661_p11, %p5658_p10 }
  0xe0   :  { %5666 = shalt.err (!%p5663_p12)
}
  0xe1   :  { %s5667_s22 = scalar_lea.vmem %s50_s0, 1024  ;;  %p5672_p0 = scmp.lt.s32.totalorder %s50_s0, %s50_s0 }
  0xe2   :  { %p5668_p13 = scmp.ne.s32.totalorder %s50_s0, %s5667_s22  ;;  %p5673_p1 = scmp.lt.s32.totalorder %s5667_s22, %s5667_s22 }
  0xe4   :  { %p5674_p2 = por %p5673_p1, %p5672_p0 }
  0xe6   :  { %p5675_p3 = pnand %p5674_p2, %p5668_p13 }
  0xe8   :  { %5678 = shalt.err (!%p5675_p3)
}
  0xe9   :  { %52 = dma.hbm_to_vmem [thread:$0]  %s6669_s5, 1024, %s50_s0, [#allocation4]  }
  0xea   :  { %s6670_s25 = sld [smem:[#allocation48_spill]] }
  0xf0   :  { %s5679_s4 = scalar_lea.hbm %s6670_s25, 128 }
  0xf1   :  { %p5680_p4 = scmp.ne.s32.totalorder %s6670_s25, %s5679_s4  ;;  %p5683_p5 = scmp.lt.u32.totalorder %s5679_s4, %s6670_s25 }
  0xf3   :  { %p5685_p6 = pnand %p5683_p5, %p5680_p4 }
  0xf5   :  { %5688 = shalt.err (!%p5685_p6)
}
  0xf6   :  { %s5689_s16 = scalar_lea.vmem %s70_s27, 128  ;;  %p5694_p8 = scmp.lt.s32.totalorder %s70_s27, %s70_s27 }
  0xf7   :  { %p5690_p7 = scmp.ne.s32.totalorder %s70_s27, %s5689_s16  ;;  %p5695_p9 = scmp.lt.s32.totalorder %s5689_s16, %s5689_s16 }
  0xf9   :  { %p5696_p10 = por %p5695_p9, %p5694_p8 }
  0xfb   :  { %p5697_p11 = pnand %p5696_p10, %p5690_p7 }
  0xfd   :  { %5700 = shalt.err (!%p5697_p11)
}
  0xfe   :  { %72 = dma.hbm_to_vmem [thread:$0]  %s6670_s25, 128, %s70_s27, [#allocation6]  }
  0xff   :  { %s5939_s5 = smov [#allocation10]   ;;  %s5940_s6 = smov [#allocation13]  }
 0x100   :  { %s91_s30 = sshll.u32 %s5939_s5, 4  ;;  %s113_s8 = sshll.u32 %s5940_s6, 4  ;;  %s92_s30 = int_to_ptr.vmem [resolvable:$true] %s91_s30  ;;  %s114_s8 = int_to_ptr.vmem [resolvable:$true] %s113_s8 }
 0x101   :  { %s6671_s22 = sld [smem:[#allocation50_spill]] }
 0x107   :  { %s5701_s12 = scalar_lea.hbm %s6671_s22, 64 }
 0x108   :  { %p5702_p12 = scmp.ne.s32.totalorder %s6671_s22, %s5701_s12  ;;  %p5705_p13 = scmp.lt.u32.totalorder %s5701_s12, %s6671_s22 }
 0x10a   :  { %p5707_p0 = pnand %p5705_p13, %p5702_p12 }
 0x10c   :  { %5710 = shalt.err (!%p5707_p0)
}
 0x10d   :  { %s5711_s27 = scalar_lea.vmem %s92_s30, 64  ;;  %p5716_p2 = scmp.lt.s32.totalorder %s92_s30, %s92_s30 }
 0x10e   :  { %p5712_p1 = scmp.ne.s32.totalorder %s92_s30, %s5711_s27  ;;  %p5717_p3 = scmp.lt.s32.totalorder %s5711_s27, %s5711_s27 }
 0x110   :  { %p5718_p4 = por %p5717_p3, %p5716_p2 }
 0x112   :  { %p5719_p5 = pnand %p5718_p4, %p5712_p1 }
 0x114   :  { %5722 = shalt.err (!%p5719_p5)
}
 0x115   :  { %94 = dma.hbm_to_vmem [thread:$0]  %s6671_s22, 64, %s92_s30, [#allocation9]  }
 0x116   :  { %s6672_s28 = sld [smem:[#allocation52_spill]] }
 0x11c   :  { %s5723_s16 = scalar_lea.hbm %s6672_s28, 32 }
 0x11d   :  { %p5724_p6 = scmp.ne.s32.totalorder %s6672_s28, %s5723_s16  ;;  %p5727_p7 = scmp.lt.u32.totalorder %s5723_s16, %s6672_s28 }
 0x11f   :  { %p5729_p8 = pnand %p5727_p7, %p5724_p6 }
 0x121   :  { %5732 = shalt.err (!%p5729_p8)
}
 0x122   :  { %s5733_s14 = scalar_lea.vmem %s114_s8, 32  ;;  %p5738_p10 = scmp.lt.s32.totalorder %s114_s8, %s114_s8 }
 0x123   :  { %p5734_p9 = scmp.ne.s32.totalorder %s114_s8, %s5733_s14  ;;  %p5739_p11 = scmp.lt.s32.totalorder %s5733_s14, %s5733_s14 }
 0x125   :  { %p5740_p12 = por %p5739_p11, %p5738_p10 }
 0x127   :  { %p5741_p13 = pnand %p5740_p12, %p5734_p9 }
 0x129   :  { %5744 = shalt.err (!%p5741_p13)
}
 0x12a   :  { %116 = dma.hbm_to_vmem [thread:$0]  %s6672_s28, 32, %s114_s8, [#allocation12]  }
 0x12b   :  { %s5941_s22 = smov [#allocation16]   ;;  %s5942_s3 = smov [#allocation19]  }
 0x12c   :  { %s135_s12 = sshll.u32 %s5941_s22, 4  ;;  %s156_s1 = sshll.u32 %s5942_s3, 4  ;;  %s136_s12 = int_to_ptr.vmem [resolvable:$true] %s135_s12  ;;  %s6268_s1 = int_to_ptr.vmem [resolvable:$true] %s156_s1 }
 0x12d   :  { %s6673_s27 = sld [smem:[#allocation54_spill]] }
 0x133   :  { %s5745_s25 = scalar_lea.hbm %s6673_s27, 16 }
 0x134   :  { %p5746_p0 = scmp.ne.s32.totalorder %s6673_s27, %s5745_s25  ;;  %p5749_p1 = scmp.lt.u32.totalorder %s5745_s25, %s6673_s27 }
 0x136   :  { %p5751_p2 = pnand %p5749_p1, %p5746_p0 }
 0x138   :  { %5754 = shalt.err (!%p5751_p2)
}
 0x139   :  { %s5755_s8 = scalar_lea.vmem %s136_s12, 16  ;;  %s5759_s28 = scalar_lea.vmem %s136_s12, 32 }
 0x13a   :  { %p5756_p3 = scmp.ne.s32.totalorder %s136_s12, %s5755_s8  ;;  %p5760_p4 = scmp.lt.s32.totalorder %s136_s12, %s136_s12 }
 0x13b   :  { %p5761_p5 = scmp.lt.s32.totalorder %s5759_s28, %s5755_s8 }
 0x13d   :  { %p5762_p6 = por %p5761_p5, %p5760_p4 }
 0x13f   :  { %p5763_p7 = pnand %p5762_p6, %p5756_p3 }
 0x141   :  { %5766 = shalt.err (!%p5763_p7)
}
 0x142   :  { %138 = dma.hbm_to_vmem [thread:$0]  %s6673_s27, 16, %s136_s12, [#allocation15]  }
 0x143   :  { %s5767_s14 = scalar_lea.hbm %s6625_s11, 65536 }
 0x144   :  { %p5768_p8 = scmp.ne.s32.totalorder %s6625_s11, %s5767_s14  ;;  %p5771_p9 = scmp.lt.u32.totalorder %s5767_s14, %s6625_s11 }
 0x146   :  { %p5773_p10 = pnand %p5771_p9, %p5768_p8 }
 0x148   :  { %5776 = shalt.err (!%p5773_p10)
}
 0x149   :  { %s5777_s26 = scalar_lea.vmem %s6268_s1, 65536  ;;  %p5782_p12 = scmp.lt.s32.totalorder %s6268_s1, %s6268_s1 }
 0x14a   :  { %p5778_p11 = scmp.ne.s32.totalorder %s6268_s1, %s5777_s26  ;;  %p5783_p13 = scmp.lt.s32.totalorder %s5777_s26, %s5777_s26 }
 0x14c   :  { %p5784_p0 = por %p5783_p13, %p5782_p12 }
 0x14e   :  { %p5785_p1 = pnand %p5784_p0, %p5778_p11 }
 0x150   :  { %5788 = shalt.err (!%p5785_p1)
}
 0x151   :  { %s6674_s12 = smov 32   ;;  %s6675_s4 = smov 512  }
 0x152   :  { %162 = dma.hbm_to_vmem [thread:$0]  %s6625_s11, 65536, %s6268_s1, [#allocation18], %s6675_s4, %s6675_s4, %s6674_s12  }
 0x153   :  { %s5943_s20 = smov [#allocation22]   ;;  %s5944_s10 = smov [#allocation25]  }
 0x154   :  { %s178_s7 = sshll.u32 %s5943_s20, 4  ;;  %s200_s16 = sshll.u32 %s5944_s10, 4  ;;  %s179_s7 = int_to_ptr.vmem [resolvable:$true] %s178_s7  ;;  %s6302_s16 = int_to_ptr.vmem [resolvable:$true] %s200_s16 }
 0x155   :  { %s5789_s0 = scalar_lea.hbm %s6627_s13, 16384 }
 0x156   :  { %p5790_p2 = scmp.ne.s32.totalorder %s6627_s13, %s5789_s0  ;;  %p5793_p3 = scmp.lt.u32.totalorder %s5789_s0, %s6627_s13 }
 0x158   :  { %p5795_p4 = pnand %p5793_p3, %p5790_p2 }
 0x15a   :  { %5798 = shalt.err (!%p5795_p4)
}
 0x15b   :  { %s5799_s11 = scalar_lea.vmem %s179_s7, 16384  ;;  %p5804_p6 = scmp.lt.s32.totalorder %s179_s7, %s179_s7 }
 0x15c   :  { %p5800_p5 = scmp.ne.s32.totalorder %s179_s7, %s5799_s11  ;;  %p5805_p7 = scmp.lt.s32.totalorder %s5799_s11, %s5799_s11 }
 0x15e   :  { %p5806_p8 = por %p5805_p7, %p5804_p6 }
 0x160   :  { %p5807_p9 = pnand %p5806_p8, %p5800_p5 }
 0x162   :  { %5810 = shalt.err (!%p5807_p9)
}
 0x163   :  { %s6676_s1 = smov 16   ;;  %s6677_s30 = smov 256  }
 0x164   :  { %184 = dma.hbm_to_vmem [thread:$0]  %s6627_s13, 16384, %s179_s7, [#allocation21], %s6677_s30, %s6677_s30, %s6676_s1  }
 0x165   :  { %s5811_s12 = scalar_lea.hbm %s6629_s15, 4096 }
 0x166   :  { %p5812_p10 = scmp.ne.s32.totalorder %s6629_s15, %s5811_s12  ;;  %p5815_p11 = scmp.lt.u32.totalorder %s5811_s12, %s6629_s15 }
 0x168   :  { %p5817_p12 = pnand %p5815_p11, %p5812_p10 }
 0x16a   :  { %5820 = shalt.err (!%p5817_p12)
}
 0x16b   :  { %s5821_s10 = scalar_lea.vmem %s6302_s16, 4096  ;;  %p5826_p0 = scmp.lt.s32.totalorder %s6302_s16, %s6302_s16 }
 0x16c   :  { %p5822_p13 = scmp.ne.s32.totalorder %s6302_s16, %s5821_s10  ;;  %p5827_p1 = scmp.lt.s32.totalorder %s5821_s10, %s5821_s10 }
 0x16e   :  { %p5828_p2 = por %p5827_p1, %p5826_p0 }
 0x170   :  { %p5829_p3 = pnand %p5828_p2, %p5822_p13 }
 0x172   :  { %5832 = shalt.err (!%p5829_p3)
}
 0x173   :  { %206 = dma.hbm_to_vmem [thread:$0]  %s6629_s15, 4096, %s6302_s16, [#allocation24], %s5929_s29, %s5929_s29, %s5930_s24  }
 0x174   :  { %s5945_s8 = smov [#allocation28]   ;;  %s5946_s0 = smov [#allocation31]  }
 0x175   :  { %s225_s28 = sshll.u32 %s5945_s8, 4  ;;  %s247_s9 = sshll.u32 %s5946_s0, 4  ;;  %s226_s28 = int_to_ptr.vmem [resolvable:$true] %s225_s28  ;;  %s248_s9 = int_to_ptr.vmem [resolvable:$true] %s247_s9 }
 0x176   :  { %s5833_s14 = scalar_lea.hbm %s6632_s18, 16 }
 0x177   :  { %p5834_p4 = scmp.ne.s32.totalorder %s6632_s18, %s5833_s14  ;;  %p5837_p5 = scmp.lt.u32.totalorder %s5833_s14, %s6632_s18 }
 0x179   :  { %p5839_p6 = pnand %p5837_p5, %p5834_p4 }
 0x17b   :  { %5842 = shalt.err (!%p5839_p6)
}
 0x17c   :  { %s5843_s15 = scalar_lea.vmem %s226_s28, 16  ;;  %s5847_s29 = scalar_lea.vmem %s226_s28, 32 }
 0x17d   :  { %p5844_p7 = scmp.ne.s32.totalorder %s226_s28, %s5843_s15  ;;  %p5848_p8 = scmp.lt.s32.totalorder %s226_s28, %s226_s28 }
 0x17e   :  { %p5849_p9 = scmp.lt.s32.totalorder %s5847_s29, %s5843_s15 }
 0x180   :  { %p5850_p10 = por %p5849_p9, %p5848_p8 }
 0x182   :  { %p5851_p11 = pnand %p5850_p10, %p5844_p7 }
 0x184   :  { %5854 = shalt.err (!%p5851_p11)
}
 0x185   :  { %228 = dma.hbm_to_vmem [thread:$0]  %s6632_s18, 16, %s226_s28, [#allocation27]  }
 0x186   :  { %s5855_s26 = scalar_lea.hbm %s6635_s21, 16 }
 0x187   :  { %p5856_p12 = scmp.ne.s32.totalorder %s6635_s21, %s5855_s26  ;;  %p5859_p13 = scmp.lt.u32.totalorder %s5855_s26, %s6635_s21 }
 0x189   :  { %p5861_p0 = pnand %p5859_p13, %p5856_p12 }
 0x18b   :  { %5864 = shalt.err (!%p5861_p0)
}
 0x18c   :  { %s5865_s20 = scalar_lea.vmem %s248_s9, 16  ;;  %s5869_s10 = scalar_lea.vmem %s248_s9, 32 }
 0x18d   :  { %p5866_p1 = scmp.ne.s32.totalorder %s248_s9, %s5865_s20  ;;  %p5870_p2 = scmp.lt.s32.totalorder %s248_s9, %s248_s9 }
 0x18e   :  { %p5871_p3 = scmp.lt.s32.totalorder %s5869_s10, %s5865_s20 }
 0x190   :  { %p5872_p4 = por %p5871_p3, %p5870_p2 }
 0x192   :  { %p5873_p5 = pnand %p5872_p4, %p5866_p1 }
 0x194   :  { %5876 = shalt.err (!%p5873_p5)
}
 0x195   :  { %250 = dma.hbm_to_vmem [thread:$0]  %s6635_s21, 16, %s248_s9, [#allocation30]  }
 0x196   :  { %s5947_s7 = smov [#allocation34]   ;;  %s5877_s5 = scalar_lea.hbm %s6637_s23, 16 }
 0x197   :  { %s267_s8 = sshll.u32 %s5947_s7, 4  ;;  %p5878_p6 = scmp.ne.s32.totalorder %s6637_s23, %s5877_s5  ;;  %s268_s8 = int_to_ptr.vmem [resolvable:$true] %s267_s8 }
 0x198   :  { %p5881_p7 = scmp.lt.u32.totalorder %s5877_s5, %s6637_s23 }
 0x19a   :  { %p5883_p8 = pnand %p5881_p7, %p5878_p6 }
 0x19c   :  { %5886 = shalt.err (!%p5883_p8)
}
 0x19d   :  { %s5887_s30 = scalar_lea.vmem %s268_s8, 16  ;;  %s5891_s21 = scalar_lea.vmem %s268_s8, 32 }
 0x19e   :  { %p5888_p9 = scmp.ne.s32.totalorder %s268_s8, %s5887_s30  ;;  %p5892_p10 = scmp.lt.s32.totalorder %s268_s8, %s268_s8 }
 0x19f   :  { %p5893_p11 = scmp.lt.s32.totalorder %s5891_s21, %s5887_s30 }
 0x1a1   :  { %p5894_p12 = por %p5893_p11, %p5892_p10 }
 0x1a3   :  { %p5895_p13 = pnand %p5894_p12, %p5888_p9 }
 0x1a5   :  { %5898 = shalt.err (!%p5895_p13)
}
 0x1a6   :  { %270 = dma.hbm_to_vmem [thread:$0]  %s6637_s23, 16, %s268_s8, [#allocation33]  }
 0x1a7   :  { %5899 = dma.done.wait [#allocation4], 1024  }
 0x1a8   :  { %5900 = vsyncadd [#allocation4], 4294966272 }
 0x1a9   :  { %5901 = dma.done.wait [#allocation6], 1152  }
 0x1aa   :  { %5902 = vsyncadd [#allocation6], 4294966144 }
 0x1ab   :  { %5903 = dma.done.wait [#allocation9], 65600  }
 0x1ac   :  { %5904 = vsyncadd [#allocation9], 4294901696 }
 0x1ad   :  { %5905 = dma.done.wait [#allocation12], 16416  }
 0x1ae   :  { %5906 = vsyncadd [#allocation12], 4294950880 }
 0x1af   :  { %5907 = dma.done.wait [#allocation15], 4112  }
 0x1b0   :  { %5908 = vsyncadd [#allocation15], 4294963184 }
 0x1b1   :  { %5909 = dma.done.wait [#allocation18], 65552  }
 0x1b2   :  { %5910 = vsyncadd [#allocation18], 4294901744 }
 0x1b3   :  { %5911 = dma.done.wait [#allocation21], 16448  }
 0x1b4   :  { %5912 = vsyncadd [#allocation21], 4294950848 }
 0x1b5   :  { %5913 = dma.done.wait [#allocation24], 4128  }
 0x1b6   :  { %5914 = vsyncadd [#allocation24], 4294963168 }
 0x1b7   :  { %5915 = dma.done.wait [#allocation27], 32  }
 0x1b8   :  { %5916 = vsyncadd [#allocation27], 4294967264 }
 0x1b9   :  { %5917 = dma.done.wait [#allocation30], 32  }
 0x1ba   :  { %5918 = vsyncadd [#allocation30], 4294967264 }
 0x1bb   :  { %5919 = dma.done.wait [#allocation33], 32  }
 0x1bc   :  { %5920 = vsyncadd [#allocation33], 4294967264  ;;  %v345_v1 = vld [vmem:[#allocation8 + $0x8] sm:$0xff]  ;;  %v347_v3 = vld [vmem:[#allocation8 + $0x18] sm:$0xff]  ;;  %s6678_s29 = sld [smem:[#allocation55_spill]]  ;;  %vm5949_vm0 = vmmov 0  }
 0x1bd   :  { %v349_v2 = vld [vmem:[#allocation8 + $0x28] sm:$0xff]  ;;  %v351_v5 = vld [vmem:[#allocation8 + $0x38] sm:$0xff]  ;;  %v344_v6 = vld [vmem:[#allocation8] sm:$0xff]  ;;  %vm3643_vm1 = vcmask 523264   ;;  %vm3690_vm2 = vcmask 7168   ;;  %s6679_s27 = sld [smem:[#allocation56_spill]] }
 0x1be   :  { %v3942_v4 = vpack.c.bf16 %v349_v2, %v345_v1  ;;  %v348_v7 = vld [vmem:[#allocation8 + $0x20] sm:$0xff]  ;;  %v4198_v8 = vpack.c.bf16 %v351_v5, %v347_v3  ;;  %v346_v10 = vld [vmem:[#allocation8 + $0x10] sm:$0xff]  ;;  %v353_v12 = vld [vmem:[#allocation8 + $0x48] sm:$0xff] }
 0x1bf   :  { %v3944_v9 = vpack.c.bf16 %v348_v7, %v344_v6  ;;  %v350_v11 = vld [vmem:[#allocation8 + $0x30] sm:$0xff]  ;;  %v357_v14 = vld [vmem:[#allocation8 + $0x68] sm:$0xff]  ;;  %v355_v15 = vld [vmem:[#allocation8 + $0x58] sm:$0xff] }
 0x1c0   :  { %3943 = vmatprep.subr.bf16.mxu0 %v3942_v4  ;;  %v4200_v13 = vpack.c.bf16 %v350_v11, %v346_v10  ;;  %v359_v16 = vld [vmem:[#allocation8 + $0x78] sm:$0xff]  ;;  %4199 = vmatprep.subr.bf16.mxu1 %v4198_v8  ;;  %v3946_v17 = vpack.c.bf16 %v357_v14, %v353_v12  ;;  %v352_v19 = vld [vmem:[#allocation8 + $0x40] sm:$0xff]  ;;  %v354_v21 = vld [vmem:[#allocation8 + $0x50] sm:$0xff] }
 0x1c1   :  { %3945 = vmatpush1.bf16.msra.mxu0 %v3944_v9  ;;  %v4202_v18 = vpack.c.bf16 %v359_v16, %v355_v15  ;;  %v356_v20 = vld [vmem:[#allocation8 + $0x60] sm:$0xff]  ;;  %v358_v23 = vld [vmem:[#allocation8 + $0x70] sm:$0xff]  ;;  %v361_v24 = vld [vmem:[#allocation8 + $0x88] sm:$0xff] }
 0x1c2   :  { %4201 = vmatpush1.bf16.msra.mxu1 %v4200_v13  ;;  %v3948_v22 = vpack.c.bf16 %v356_v20, %v352_v19  ;;  %v365_v25 = vld [vmem:[#allocation8 + $0xa8] sm:$0xff]  ;;  %3947 = vmatprep.subr.bf16.mxu0 %v3946_v17  ;;  %v4204_v26 = vpack.c.bf16 %v358_v23, %v354_v21  ;;  %v363_v28 = vld [vmem:[#allocation8 + $0x98] sm:$0xff]  ;;  %v360_v30 = vld [vmem:[#allocation8 + $0x80] sm:$0xff] }
 0x1c3   :  { %4203 = vmatprep.subr.bf16.mxu1 %v4202_v18  ;;  %v3950_v27 = vpack.c.bf16 %v365_v25, %v361_v24  ;;  %v367_v29 = vld [vmem:[#allocation8 + $0xb8] sm:$0xff]  ;;  %v364_v32 = vld [vmem:[#allocation8 + $0xa0] sm:$0xff]  ;;  %v362_v33 = vld [vmem:[#allocation8 + $0x90] sm:$0xff] }
 0x1c4   :  { %v4206_v31 = vpack.c.bf16 %v367_v29, %v363_v28  ;;  %v366_v34 = vld [vmem:[#allocation8 + $0xb0] sm:$0xff]  ;;  %v3952_v35 = vpack.c.bf16 %v364_v32, %v360_v30  ;;  %v369_v36 = vld [vmem:[#allocation8 + $0xc8] sm:$0xff]  ;;  %v371_v38 = vld [vmem:[#allocation8 + $0xd8] sm:$0xff] }
 0x1c5   :  { %3949 = vmatpush1.bf16.msra.mxu0 %v3948_v22  ;;  %v373_v37 = vld [vmem:[#allocation8 + $0xe8] sm:$0xff]  ;;  %v4208_v39 = vpack.c.bf16 %v366_v34, %v362_v33  ;;  %v375_v41 = vld [vmem:[#allocation8 + $0xf8] sm:$0xff]  ;;  %v368_v42 = vld [vmem:[#allocation8 + $0xc0] sm:$0xff] }
 0x1c6   :  { %4205 = vmatpush1.bf16.msra.mxu1 %v4204_v26  ;;  %3951 = vmatprep.subr.bf16.mxu0 %v3950_v27  ;;  %v3954_v40 = vpack.c.bf16 %v373_v37, %v369_v36  ;;  %v372_v43 = vld [vmem:[#allocation8 + $0xe0] sm:$0xff]  ;;  %v4210_v44 = vpack.c.bf16 %v375_v41, %v371_v38  ;;  %v370_v45 = vld [vmem:[#allocation8 + $0xd0] sm:$0xff]  ;;  %v377_v47 = vld [vmem:[#allocation8 + $0x108] sm:$0xff] }
 0x1c7   :  { %4207 = vmatprep.subr.bf16.mxu1 %v4206_v31  ;;  %v374_v46 = vld [vmem:[#allocation8 + $0xf0] sm:$0xff]  ;;  %v381_v48 = vld [vmem:[#allocation8 + $0x128] sm:$0xff]  ;;  %v379_v49 = vld [vmem:[#allocation8 + $0x118] sm:$0xff]  ;;  %v3956_v51 = vpack.c.bf16 %v372_v43, %v368_v42 }
 0x1c8   :  { %v383_v50 = vld [vmem:[#allocation8 + $0x138] sm:$0xff]  ;;  %v4212_v52 = vpack.c.bf16 %v374_v46, %v370_v45  ;;  %v3958_v53 = vpack.c.bf16 %v381_v48, %v377_v47  ;;  %v376_v54 = vld [vmem:[#allocation8 + $0x100] sm:$0xff]  ;;  %v378_v56 = vld [vmem:[#allocation8 + $0x110] sm:$0xff] }
 0x1c9   :  { %3953 = vmatpush1.bf16.msra.mxu0 %v3952_v35  ;;  %v380_v55 = vld [vmem:[#allocation8 + $0x120] sm:$0xff]  ;;  %v4214_v57 = vpack.c.bf16 %v383_v50, %v379_v49  ;;  %v382_v58 = vld [vmem:[#allocation8 + $0x130] sm:$0xff]  ;;  %v385_v59 = vld [vmem:[#allocation8 + $0x148] sm:$0xff] }
 0x1ca   :  { %4209 = vmatpush1.bf16.msra.mxu1 %v4208_v39  ;;  %3955 = vmatprep.subr.bf16.mxu0 %v3954_v40  ;;  %v389_v60 = vld [vmem:[#allocation8 + $0x168] sm:$0xff]  ;;  %v387_v61 = vld [vmem:[#allocation8 + $0x158] sm:$0xff]  ;;  %v3960_v63 = vpack.c.bf16 %v380_v55, %v376_v54  ;;  %v4216_v0 = vpack.c.bf16 %v382_v58, %v378_v56  ;;  %v384_v2 = vld [vmem:[#allocation8 + $0x140] sm:$0xff] }
 0x1cb   :  { %4211 = vmatprep.subr.bf16.mxu1 %v4210_v44  ;;  %v391_v62 = vld [vmem:[#allocation8 + $0x178] sm:$0xff]  ;;  %v3962_v1 = vpack.c.bf16 %v389_v60, %v385_v59  ;;  %v388_v3 = vld [vmem:[#allocation8 + $0x160] sm:$0xff]  ;;  %v386_v4 = vld [vmem:[#allocation8 + $0x150] sm:$0xff] }
 0x1cc   :  { %v4218_v5 = vpack.c.bf16 %v391_v62, %v387_v61  ;;  %v390_v6 = vld [vmem:[#allocation8 + $0x170] sm:$0xff]  ;;  %v393_v7 = vld [vmem:[#allocation8 + $0x188] sm:$0xff]  ;;  %v395_v9 = vld [vmem:[#allocation8 + $0x198] sm:$0xff]  ;;  %v3964_v11 = vpack.c.bf16 %v388_v3, %v384_v2 }
 0x1cd   :  { %3957 = vmatpush1.bf16.msra.mxu0 %v3956_v51  ;;  %v397_v8 = vld [vmem:[#allocation8 + $0x1a8] sm:$0xff]  ;;  %v399_v10 = vld [vmem:[#allocation8 + $0x1b8] sm:$0xff]  ;;  %v4220_v12 = vpack.c.bf16 %v390_v6, %v386_v4  ;;  %v392_v14 = vld [vmem:[#allocation8 + $0x180] sm:$0xff] }
 0x1ce   :  { %4213 = vmatpush1.bf16.msra.mxu1 %v4212_v52  ;;  %3959 = vmatprep.subr.bf16.mxu0 %v3958_v53  ;;  %v3966_v13 = vpack.c.bf16 %v397_v8, %v393_v7  ;;  %v396_v15 = vld [vmem:[#allocation8 + $0x1a0] sm:$0xff]  ;;  %v394_v16 = vld [vmem:[#allocation8 + $0x190] sm:$0xff]  ;;  %v4222_v17 = vpack.c.bf16 %v399_v10, %v395_v9  ;;  %v401_v19 = vld [vmem:[#allocation8 + $0x1c8] sm:$0xff] }
 0x1cf   :  { %4215 = vmatprep.subr.bf16.mxu1 %v4214_v57  ;;  %v398_v18 = vld [vmem:[#allocation8 + $0x1b0] sm:$0xff]  ;;  %v405_v20 = vld [vmem:[#allocation8 + $0x1e8] sm:$0xff]  ;;  %v403_v21 = vld [vmem:[#allocation8 + $0x1d8] sm:$0xff]  ;;  %v3968_v23 = vpack.c.bf16 %v396_v15, %v392_v14 }
 0x1d0   :  { %v407_v22 = vld [vmem:[#allocation8 + $0x1f8] sm:$0xff]  ;;  %v4224_v24 = vpack.c.bf16 %v398_v18, %v394_v16  ;;  %v3970_v25 = vpack.c.bf16 %v405_v20, %v401_v19  ;;  %v400_v26 = vld [vmem:[#allocation8 + $0x1c0] sm:$0xff]  ;;  %v402_v28 = vld [vmem:[#allocation8 + $0x1d0] sm:$0xff] }
 0x1d1   :  { %3961 = vmatpush1.bf16.msra.mxu0 %v3960_v63  ;;  %v404_v27 = vld [vmem:[#allocation8 + $0x1e0] sm:$0xff]  ;;  %v4226_v29 = vpack.c.bf16 %v407_v22, %v403_v21  ;;  %v406_v30 = vld [vmem:[#allocation8 + $0x1f0] sm:$0xff]  ;;  %v409_v31 = vld [vmem:[#allocation8 + $0x208] sm:$0xff] }
 0x1d2   :  { %4217 = vmatpush1.bf16.msra.mxu1 %v4216_v0  ;;  %3963 = vmatprep.subr.bf16.mxu0 %v3962_v1  ;;  %v413_v32 = vld [vmem:[#allocation8 + $0x228] sm:$0xff]  ;;  %v411_v33 = vld [vmem:[#allocation8 + $0x218] sm:$0xff]  ;;  %v3972_v35 = vpack.c.bf16 %v404_v27, %v400_v26  ;;  %v4228_v36 = vpack.c.bf16 %v406_v30, %v402_v28  ;;  %v408_v38 = vld [vmem:[#allocation8 + $0x200] sm:$0xff] }
 0x1d3   :  { %4219 = vmatprep.subr.bf16.mxu1 %v4218_v5  ;;  %v415_v34 = vld [vmem:[#allocation8 + $0x238] sm:$0xff]  ;;  %v3974_v37 = vpack.c.bf16 %v413_v32, %v409_v31  ;;  %v412_v39 = vld [vmem:[#allocation8 + $0x220] sm:$0xff]  ;;  %v410_v40 = vld [vmem:[#allocation8 + $0x210] sm:$0xff] }
 0x1d4   :  { %v4230_v41 = vpack.c.bf16 %v415_v34, %v411_v33  ;;  %v414_v42 = vld [vmem:[#allocation8 + $0x230] sm:$0xff]  ;;  %v417_v43 = vld [vmem:[#allocation8 + $0x248] sm:$0xff]  ;;  %v419_v45 = vld [vmem:[#allocation8 + $0x258] sm:$0xff]  ;;  %v3976_v47 = vpack.c.bf16 %v412_v39, %v408_v38 }
 0x1d5   :  { %3965 = vmatpush1.bf16.msra.mxu0 %v3964_v11  ;;  %v421_v44 = vld [vmem:[#allocation8 + $0x268] sm:$0xff]  ;;  %v423_v46 = vld [vmem:[#allocation8 + $0x278] sm:$0xff]  ;;  %v4232_v48 = vpack.c.bf16 %v414_v42, %v410_v40  ;;  %v416_v50 = vld [vmem:[#allocation8 + $0x240] sm:$0xff] }
 0x1d6   :  { %4221 = vmatpush1.bf16.msra.mxu1 %v4220_v12  ;;  %3967 = vmatprep.subr.bf16.mxu0 %v3966_v13  ;;  %v3978_v49 = vpack.c.bf16 %v421_v44, %v417_v43  ;;  %v420_v51 = vld [vmem:[#allocation8 + $0x260] sm:$0xff]  ;;  %v418_v52 = vld [vmem:[#allocation8 + $0x250] sm:$0xff]  ;;  %v4234_v53 = vpack.c.bf16 %v423_v46, %v419_v45  ;;  %v425_v55 = vld [vmem:[#allocation8 + $0x288] sm:$0xff] }
 0x1d7   :  { %4223 = vmatprep.subr.bf16.mxu1 %v4222_v17  ;;  %v422_v54 = vld [vmem:[#allocation8 + $0x270] sm:$0xff]  ;;  %v429_v56 = vld [vmem:[#allocation8 + $0x2a8] sm:$0xff]  ;;  %v427_v57 = vld [vmem:[#allocation8 + $0x298] sm:$0xff]  ;;  %v3980_v59 = vpack.c.bf16 %v420_v51, %v416_v50 }
 0x1d8   :  { %v431_v58 = vld [vmem:[#allocation8 + $0x2b8] sm:$0xff]  ;;  %v4236_v60 = vpack.c.bf16 %v422_v54, %v418_v52  ;;  %v3982_v61 = vpack.c.bf16 %v429_v56, %v425_v55  ;;  %v424_v62 = vld [vmem:[#allocation8 + $0x280] sm:$0xff]  ;;  %v426_v0 = vld [vmem:[#allocation8 + $0x290] sm:$0xff] }
 0x1d9   :  { %3969 = vmatpush1.bf16.msra.mxu0 %v3968_v23  ;;  %v428_v63 = vld [vmem:[#allocation8 + $0x2a0] sm:$0xff]  ;;  %v4238_v1 = vpack.c.bf16 %v431_v58, %v427_v57  ;;  %v430_v2 = vld [vmem:[#allocation8 + $0x2b0] sm:$0xff]  ;;  %v433_v3 = vld [vmem:[#allocation8 + $0x2c8] sm:$0xff] }
 0x1da   :  { %4225 = vmatpush1.bf16.msra.mxu1 %v4224_v24  ;;  %3971 = vmatprep.subr.bf16.mxu0 %v3970_v25  ;;  %v437_v4 = vld [vmem:[#allocation8 + $0x2e8] sm:$0xff]  ;;  %v435_v5 = vld [vmem:[#allocation8 + $0x2d8] sm:$0xff]  ;;  %v3984_v7 = vpack.c.bf16 %v428_v63, %v424_v62  ;;  %v432_v8 = vld [vmem:[#allocation8 + $0x2c0] sm:$0xff]  ;;  %v4240_v9 = vpack.c.bf16 %v430_v2, %v426_v0 }
 0x1db   :  { %4227 = vmatprep.subr.bf16.mxu1 %v4226_v29  ;;  %v439_v6 = vld [vmem:[#allocation8 + $0x2f8] sm:$0xff]  ;;  %v3986_v10 = vpack.c.bf16 %v437_v4, %v433_v3  ;;  %v436_v11 = vld [vmem:[#allocation8 + $0x2e0] sm:$0xff]  ;;  %v434_v12 = vld [vmem:[#allocation8 + $0x2d0] sm:$0xff] }
 0x1dc   :  { %v438_v13 = vld [vmem:[#allocation8 + $0x2f0] sm:$0xff]  ;;  %v4242_v14 = vpack.c.bf16 %v439_v6, %v435_v5  ;;  %v441_v15 = vld [vmem:[#allocation8 + $0x308] sm:$0xff]  ;;  %v337_v17 = vld [vmem:[#allocation3 + $0x8] sm:$0xff]  ;;  %v3988_v20 = vpack.c.bf16 %v436_v11, %v432_v8 }
 0x1dd   :  { %3973 = vmatpush1.bf16.msra.mxu0 %v3972_v35  ;;  %v445_v16 = vld [vmem:[#allocation8 + $0x328] sm:$0xff]  ;;  %v443_v18 = vld [vmem:[#allocation8 + $0x318] sm:$0xff]  ;;  %942 = vmatprep.mubr.f32.mxu0 %v337_v17  ;;  %v4244_v21 = vpack.c.bf16 %v438_v13, %v434_v12  ;;  %v440_v23 = vld [vmem:[#allocation8 + $0x300] sm:$0xff] }
 0x1de   :  { %4229 = vmatpush1.bf16.msra.mxu1 %v4228_v36  ;;  %3975 = vmatprep.subr.bf16.mxu0 %v3974_v37  ;;  %v447_v19 = vld [vmem:[#allocation8 + $0x338] sm:$0xff]  ;;  %v3990_v22 = vpack.c.bf16 %v445_v16, %v441_v15  ;;  %v444_v24 = vld [vmem:[#allocation8 + $0x320] sm:$0xff]  ;;  %v442_v25 = vld [vmem:[#allocation8 + $0x310] sm:$0xff] }
 0x1df   :  { %4231 = vmatprep.subr.bf16.mxu1 %v4230_v41  ;;  %1226 = vmatprep.mubr.f32.mxu1 %v337_v17  ;;  %v4246_v26 = vpack.c.bf16 %v447_v19, %v443_v18  ;;  %v446_v27 = vld [vmem:[#allocation8 + $0x330] sm:$0xff]  ;;  %v449_v28 = vld [vmem:[#allocation8 + $0x348] sm:$0xff]  ;;  %v451_v30 = vld [vmem:[#allocation8 + $0x358] sm:$0xff]  ;;  %v3992_v32 = vpack.c.bf16 %v444_v24, %v440_v23 }
 0x1e0   :  { %v453_v29 = vld [vmem:[#allocation8 + $0x368] sm:$0xff]  ;;  %v455_v31 = vld [vmem:[#allocation8 + $0x378] sm:$0xff]  ;;  %v4248_v33 = vpack.c.bf16 %v446_v27, %v442_v25  ;;  %v448_v35 = vld [vmem:[#allocation8 + $0x340] sm:$0xff] }
 0x1e1   :  { %3977 = vmatpush1.bf16.msra.mxu0 %v3976_v47  ;;  %v3994_v34 = vpack.c.bf16 %v453_v29, %v449_v28  ;;  %v452_v36 = vld [vmem:[#allocation8 + $0x360] sm:$0xff]  ;;  %v450_v37 = vld [vmem:[#allocation8 + $0x350] sm:$0xff]  ;;  %v4250_v38 = vpack.c.bf16 %v455_v31, %v451_v30  ;;  %v457_v40 = vld [vmem:[#allocation8 + $0x388] sm:$0xff] }
 0x1e2   :  { %4233 = vmatpush1.bf16.msra.mxu1 %v4232_v48  ;;  %3979 = vmatprep.subr.bf16.mxu0 %v3978_v49  ;;  %v454_v39 = vld [vmem:[#allocation8 + $0x370] sm:$0xff]  ;;  %v461_v41 = vld [vmem:[#allocation8 + $0x3a8] sm:$0xff]  ;;  %v459_v42 = vld [vmem:[#allocation8 + $0x398] sm:$0xff]  ;;  %v3996_v44 = vpack.c.bf16 %v452_v36, %v448_v35 }
 0x1e3   :  { %4235 = vmatprep.subr.bf16.mxu1 %v4234_v53  ;;  %v463_v43 = vld [vmem:[#allocation8 + $0x3b8] sm:$0xff]  ;;  %v4252_v45 = vpack.c.bf16 %v454_v39, %v450_v37  ;;  %v3998_v46 = vpack.c.bf16 %v461_v41, %v457_v40  ;;  %v456_v47 = vld [vmem:[#allocation8 + $0x380] sm:$0xff]  ;;  %v458_v49 = vld [vmem:[#allocation8 + $0x390] sm:$0xff] }
 0x1e4   :  { %v460_v48 = vld [vmem:[#allocation8 + $0x3a0] sm:$0xff]  ;;  %v4254_v50 = vpack.c.bf16 %v463_v43, %v459_v42  ;;  %v462_v51 = vld [vmem:[#allocation8 + $0x3b0] sm:$0xff]  ;;  %v465_v52 = vld [vmem:[#allocation8 + $0x3c8] sm:$0xff] }
 0x1e5   :  { %3981 = vmatpush1.bf16.msra.mxu0 %v3980_v59  ;;  %v469_v53 = vld [vmem:[#allocation8 + $0x3e8] sm:$0xff]  ;;  %v467_v54 = vld [vmem:[#allocation8 + $0x3d8] sm:$0xff]  ;;  %v4000_v56 = vpack.c.bf16 %v460_v48, %v456_v47  ;;  %v4256_v57 = vpack.c.bf16 %v462_v51, %v458_v49  ;;  %v464_v59 = vld [vmem:[#allocation8 + $0x3c0] sm:$0xff] }
 0x1e6   :  { %4237 = vmatpush1.bf16.msra.mxu1 %v4236_v60  ;;  %3983 = vmatprep.subr.bf16.mxu0 %v3982_v61  ;;  %v471_v55 = vld [vmem:[#allocation8 + $0x3f8] sm:$0xff]  ;;  %v4002_v58 = vpack.c.bf16 %v469_v53, %v465_v52  ;;  %v468_v60 = vld [vmem:[#allocation8 + $0x3e0] sm:$0xff]  ;;  %v466_v61 = vld [vmem:[#allocation8 + $0x3d0] sm:$0xff] }
 0x1e7   :  { %4239 = vmatprep.subr.bf16.mxu1 %v4238_v1  ;;  %v4258_v62 = vpack.c.bf16 %v471_v55, %v467_v54  ;;  %v470_v63 = vld [vmem:[#allocation8 + $0x3f0] sm:$0xff]  ;;  %v473_v0 = vld [vmem:[#allocation8 + $0x408] sm:$0xff]  ;;  %v475_v2 = vld [vmem:[#allocation8 + $0x418] sm:$0xff]  ;;  %v4004_v4 = vpack.c.bf16 %v468_v60, %v464_v59 }
 0x1e8   :  { %v477_v1 = vld [vmem:[#allocation8 + $0x428] sm:$0xff]  ;;  %v479_v3 = vld [vmem:[#allocation8 + $0x438] sm:$0xff]  ;;  %v4260_v5 = vpack.c.bf16 %v470_v63, %v466_v61  ;;  %v476_v8 = vld [vmem:[#allocation8 + $0x420] sm:$0xff] }
 0x1e9   :  { %3985 = vmatpush1.bf16.msra.mxu0 %v3984_v7  ;;  %v4006_v6 = vpack.c.bf16 %v477_v1, %v473_v0  ;;  %v472_v7 = vld [vmem:[#allocation8 + $0x400] sm:$0xff]  ;;  %v478_v11 = vld [vmem:[#allocation8 + $0x430] sm:$0xff]  ;;  %v481_v12 = vld [vmem:[#allocation8 + $0x448] sm:$0xff] }
 0x1ea   :  { %4241 = vmatpush1.bf16.msra.mxu1 %v4240_v9  ;;  %3987 = vmatprep.subr.bf16.mxu0 %v3986_v10  ;;  %v474_v9 = vld [vmem:[#allocation8 + $0x410] sm:$0xff]  ;;  %v4262_v10 = vpack.c.bf16 %v479_v3, %v475_v2  ;;  %v485_v13 = vld [vmem:[#allocation8 + $0x468] sm:$0xff]  ;;  %v487_v15 = vld [vmem:[#allocation8 + $0x478] sm:$0xff]  ;;  %v4008_v17 = vpack.c.bf16 %v476_v8, %v472_v7 }
 0x1eb   :  { %4243 = vmatprep.subr.bf16.mxu1 %v4242_v14  ;;  %v483_v14 = vld [vmem:[#allocation8 + $0x458] sm:$0xff]  ;;  %v4264_v18 = vpack.c.bf16 %v478_v11, %v474_v9  ;;  %v4010_v19 = vpack.c.bf16 %v485_v13, %v481_v12  ;;  %v486_v24 = vld [vmem:[#allocation8 + $0x470] sm:$0xff]  ;;  %v489_v25 = vld [vmem:[#allocation8 + $0x488] sm:$0xff] }
 0x1ec   :  { %v336_v16 = vld [vmem:[#allocation3] sm:$0xff]  ;;  %v4266_v23 = vpack.c.bf16 %v487_v15, %v483_v14  ;;  %v494_v36 = vld [vmem:[#allocation8 + $0x4b0] sm:$0xff]  ;;  %v497_v37 = vld [vmem:[#allocation8 + $0x4c8] sm:$0xff] }
 0x1ed   :  { %3989 = vmatpush1.bf16.msra.mxu0 %v3988_v20  ;;  %v480_v20 = vld [vmem:[#allocation8 + $0x440] sm:$0xff]  ;;  %v491_v27 = vld [vmem:[#allocation8 + $0x498] sm:$0xff]  ;;  %v502_v48 = vld [vmem:[#allocation8 + $0x4f0] sm:$0xff] }
 0x1ee   :  { %4245 = vmatpush1.bf16.msra.mxu1 %v4244_v21  ;;  %3991 = vmatprep.subr.bf16.mxu0 %v3990_v22  ;;  %v484_v21 = vld [vmem:[#allocation8 + $0x460] sm:$0xff]  ;;  %v482_v22 = vld [vmem:[#allocation8 + $0x450] sm:$0xff]  ;;  %v495_v28 = vld [vmem:[#allocation8 + $0x4b8] sm:$0xff] }
 0x1ef   :  { %4247 = vmatprep.subr.bf16.mxu1 %v4246_v26  ;;  %v493_v26 = vld [vmem:[#allocation8 + $0x4a8] sm:$0xff]  ;;  %v4012_v29 = vpack.c.bf16 %v484_v21, %v480_v20  ;;  %v4268_v30 = vpack.c.bf16 %v486_v24, %v482_v22  ;;  %v4270_v35 = vpack.c.bf16 %v495_v28, %v491_v27  ;;  %v499_v39 = vld [vmem:[#allocation8 + $0x4d8] sm:$0xff]  ;;  %v510_v60 = vld [vmem:[#allocation8 + $0x530] sm:$0xff] }
 0x1f0   :  { %v4014_v31 = vpack.c.bf16 %v493_v26, %v489_v25  ;;  %v503_v40 = vld [vmem:[#allocation8 + $0x4f8] sm:$0xff]  ;;  %v505_v49 = vld [vmem:[#allocation8 + $0x508] sm:$0xff]  ;;  %v518_v8 = vld [vmem:[#allocation8 + $0x570] sm:$0xff] }
 0x1f1   :  { %3993 = vmatpush1.bf16.msra.mxu0 %v3992_v32  ;;  %v488_v32 = vld [vmem:[#allocation8 + $0x480] sm:$0xff]  ;;  %v4274_v47 = vpack.c.bf16 %v503_v40, %v499_v39  ;;  %v507_v51 = vld [vmem:[#allocation8 + $0x518] sm:$0xff]  ;;  %v513_v61 = vld [vmem:[#allocation8 + $0x548] sm:$0xff] }
 0x1f2   :  { %4249 = vmatpush1.bf16.msra.mxu1 %v4248_v33  ;;  %3995 = vmatprep.subr.bf16.mxu0 %v3994_v34  ;;  %v492_v33 = vld [vmem:[#allocation8 + $0x4a0] sm:$0xff]  ;;  %v490_v34 = vld [vmem:[#allocation8 + $0x490] sm:$0xff]  ;;  %v511_v52 = vld [vmem:[#allocation8 + $0x538] sm:$0xff] }
 0x1f3   :  { %4251 = vmatprep.subr.bf16.mxu1 %v4250_v38  ;;  %v501_v38 = vld [vmem:[#allocation8 + $0x4e8] sm:$0xff]  ;;  %v4016_v41 = vpack.c.bf16 %v492_v33, %v488_v32  ;;  %v4272_v42 = vpack.c.bf16 %v494_v36, %v490_v34  ;;  %v4278_v59 = vpack.c.bf16 %v511_v52, %v507_v51  ;;  %v515_v63 = vld [vmem:[#allocation8 + $0x558] sm:$0xff]  ;;  %v520_v14 = vld [vmem:[#allocation8 + $0x580] sm:$0xff] }
 0x1f4   :  { %v4018_v43 = vpack.c.bf16 %v501_v38, %v497_v37  ;;  %v519_v0 = vld [vmem:[#allocation8 + $0x578] sm:$0xff]  ;;  %v521_v9 = vld [vmem:[#allocation8 + $0x588] sm:$0xff]  ;;  %v534_v33 = vld [vmem:[#allocation8 + $0x5f0] sm:$0xff] }
 0x1f5   :  { %3997 = vmatpush1.bf16.msra.mxu0 %v3996_v44  ;;  %v496_v44 = vld [vmem:[#allocation8 + $0x4c0] sm:$0xff]  ;;  %v4282_v7 = vpack.c.bf16 %v519_v0, %v515_v63  ;;  %v523_v11 = vld [vmem:[#allocation8 + $0x598] sm:$0xff]  ;;  %v529_v21 = vld [vmem:[#allocation8 + $0x5c8] sm:$0xff] }
 0x1f6   :  { %4253 = vmatpush1.bf16.msra.mxu1 %v4252_v45  ;;  %3999 = vmatprep.subr.bf16.mxu0 %v3998_v46  ;;  %v500_v45 = vld [vmem:[#allocation8 + $0x4e0] sm:$0xff]  ;;  %v498_v46 = vld [vmem:[#allocation8 + $0x4d0] sm:$0xff]  ;;  %v527_v12 = vld [vmem:[#allocation8 + $0x5b8] sm:$0xff] }
 0x1f7   :  { %4255 = vmatprep.subr.bf16.mxu1 %v4254_v50  ;;  %v509_v50 = vld [vmem:[#allocation8 + $0x528] sm:$0xff]  ;;  %v4020_v53 = vpack.c.bf16 %v500_v45, %v496_v44  ;;  %v4276_v54 = vpack.c.bf16 %v502_v48, %v498_v46  ;;  %v4286_v20 = vpack.c.bf16 %v527_v12, %v523_v11  ;;  %v531_v24 = vld [vmem:[#allocation8 + $0x5d8] sm:$0xff]  ;;  %v542_v45 = vld [vmem:[#allocation8 + $0x630] sm:$0xff] }
 0x1f8   :  { %v4022_v55 = vpack.c.bf16 %v509_v50, %v505_v49  ;;  %v533_v22 = vld [vmem:[#allocation8 + $0x5e8] sm:$0xff]  ;;  %v535_v25 = vld [vmem:[#allocation8 + $0x5f8] sm:$0xff] }
 0x1f9   :  { %4001 = vmatpush1.bf16.msra.mxu0 %v4000_v56  ;;  %v504_v56 = vld [vmem:[#allocation8 + $0x500] sm:$0xff]  ;;  %v4034_v28 = vpack.c.bf16 %v533_v22, %v529_v21  ;;  %v4290_v32 = vpack.c.bf16 %v535_v25, %v531_v24  ;;  %v537_v34 = vld [vmem:[#allocation8 + $0x608] sm:$0xff]  ;;  %v539_v36 = vld [vmem:[#allocation8 + $0x618] sm:$0xff] }
 0x1fa   :  { %4257 = vmatpush1.bf16.msra.mxu1 %v4256_v57  ;;  %4003 = vmatprep.subr.bf16.mxu0 %v4002_v58  ;;  %v508_v57 = vld [vmem:[#allocation8 + $0x520] sm:$0xff]  ;;  %v506_v58 = vld [vmem:[#allocation8 + $0x510] sm:$0xff]  ;;  %v543_v37 = vld [vmem:[#allocation8 + $0x638] sm:$0xff] }
 0x1fb   :  { %4259 = vmatprep.subr.bf16.mxu1 %v4258_v62  ;;  %v517_v62 = vld [vmem:[#allocation8 + $0x568] sm:$0xff]  ;;  %v4024_v1 = vpack.c.bf16 %v508_v57, %v504_v56  ;;  %v4280_v2 = vpack.c.bf16 %v510_v60, %v506_v58  ;;  %v4294_v44 = vpack.c.bf16 %v543_v37, %v539_v36  ;;  %v547_v48 = vld [vmem:[#allocation8 + $0x658] sm:$0xff]  ;;  %v550_v57 = vld [vmem:[#allocation8 + $0x670] sm:$0xff] }
 0x1fc   :  { %v4026_v3 = vpack.c.bf16 %v517_v62, %v513_v61  ;;  %v545_v46 = vld [vmem:[#allocation8 + $0x648] sm:$0xff]  ;;  %v551_v49 = vld [vmem:[#allocation8 + $0x678] sm:$0xff]  ;;  %v568_v25 = vld [vmem:[#allocation8 + $0x700] sm:$0xff] }
 0x1fd   :  { %4005 = vmatpush1.bf16.msra.mxu0 %v4004_v4  ;;  %v512_v4 = vld [vmem:[#allocation8 + $0x540] sm:$0xff]  ;;  %v4298_v56 = vpack.c.bf16 %v551_v49, %v547_v48  ;;  %v553_v58 = vld [vmem:[#allocation8 + $0x688] sm:$0xff]  ;;  %v555_v60 = vld [vmem:[#allocation8 + $0x698] sm:$0xff] }
 0x1fe   :  { %4261 = vmatpush1.bf16.msra.mxu1 %v4260_v5  ;;  %4007 = vmatprep.subr.bf16.mxu0 %v4006_v6  ;;  %v516_v5 = vld [vmem:[#allocation8 + $0x560] sm:$0xff]  ;;  %v514_v6 = vld [vmem:[#allocation8 + $0x550] sm:$0xff]  ;;  %v559_v61 = vld [vmem:[#allocation8 + $0x6b8] sm:$0xff] }
 0x1ff   :  { %4263 = vmatprep.subr.bf16.mxu1 %v4262_v10  ;;  %v525_v10 = vld [vmem:[#allocation8 + $0x5a8] sm:$0xff]  ;;  %v4028_v13 = vpack.c.bf16 %v516_v5, %v512_v4  ;;  %v4284_v15 = vpack.c.bf16 %v518_v8, %v514_v6  ;;  %v4302_v4 = vpack.c.bf16 %v559_v61, %v555_v60  ;;  %v558_v5 = vld [vmem:[#allocation8 + $0x6b0] sm:$0xff]  ;;  %v563_v8 = vld [vmem:[#allocation8 + $0x6d8] sm:$0xff] }
 0x200   :  { %943 = vmatmul.mubr.f32.vlgmr.msra.gmra.mrb[0].mxu0 %v336_v16  ;;  %v561_v6 = vld [vmem:[#allocation8 + $0x6c8] sm:$0xff]  ;;  %v575_v21 = vld [vmem:[#allocation8 + $0x738] sm:$0xff]  ;;  %v576_v37 = vld [vmem:[#allocation8 + $0x740] sm:$0xff] }
 0x201   :  { %4009 = vmatpush1.bf16.msra.mxu0 %v4008_v17  ;;  %1227 = vmatmul.mubr.f32.vlgmr.msra.gmra.mrb[0].mxu1 %v336_v16  ;;  %v4030_v16 = vpack.c.bf16 %v525_v10, %v521_v9  ;;  %v524_v17 = vld [vmem:[#allocation8 + $0x5a0] sm:$0xff]  ;;  %v567_v9 = vld [vmem:[#allocation8 + $0x6f8] sm:$0xff] }
 0x202   :  { %4265 = vmatpush1.bf16.msra.mxu1 %v4264_v18  ;;  %4011 = vmatprep.subr.bf16.mxu0 %v4010_v19  ;;  %v522_v18 = vld [vmem:[#allocation8 + $0x590] sm:$0xff]  ;;  %v4032_v26 = vpack.c.bf16 %v524_v17, %v520_v14  ;;  %v564_v14 = vld [vmem:[#allocation8 + $0x6e0] sm:$0xff] }
 0x203   :  { %4267 = vmatprep.subr.bf16.mxu1 %v4266_v23  ;;  %v526_v19 = vld [vmem:[#allocation8 + $0x5b0] sm:$0xff]  ;;  %v584_v49 = vld [vmem:[#allocation8 + $0x780] sm:$0xff] }
 0x204   :  { %v339_v23 = vld [vmem:[#allocation3 + $0x18] sm:$0xff]  ;;  %v4288_v27 = vpack.c.bf16 %v526_v19, %v522_v18  ;;  %v569_v18 = vld [vmem:[#allocation8 + $0x708] sm:$0xff]  ;;  %v592_v61 = vld [vmem:[#allocation8 + $0x7c0] sm:$0xff] }
 0x205   :  { %4013 = vmatpush1.bf16.msra.mxu0 %v4012_v29  ;;  %1013 = vmatprep.mubr.f32.mxu0 %v339_v23  ;;  %v528_v29 = vld [vmem:[#allocation8 + $0x5c0] sm:$0xff]  ;;  %v566_v17 = vld [vmem:[#allocation8 + $0x6f0] sm:$0xff]  ;;  %v573_v19 = vld [vmem:[#allocation8 + $0x728] sm:$0xff] }
 0x206   :  { %4269 = vmatpush1.bf16.msra.mxu1 %v4268_v30  ;;  %4015 = vmatprep.subr.bf16.mxu0 %v4014_v31  ;;  %v532_v30 = vld [vmem:[#allocation8 + $0x5e0] sm:$0xff]  ;;  %v530_v31 = vld [vmem:[#allocation8 + $0x5d0] sm:$0xff]  ;;  %v4054_v24 = vpack.c.bf16 %v573_v19, %v569_v18  ;;  %v338_v18 = vld [vmem:[#allocation3 + $0x10] sm:$0xff] }
 0x207   :  { %4271 = vmatprep.subr.bf16.mxu1 %v4270_v35  ;;  %1297 = vmatprep.mubr.f32.mxu1 %v339_v23  ;;  %v541_v35 = vld [vmem:[#allocation8 + $0x628] sm:$0xff]  ;;  %v4036_v38 = vpack.c.bf16 %v532_v30, %v528_v29  ;;  %v4292_v39 = vpack.c.bf16 %v534_v33, %v530_v31  ;;  %v574_v29 = vld [vmem:[#allocation8 + $0x730] sm:$0xff]  ;;  %v583_v33 = vld [vmem:[#allocation8 + $0x778] sm:$0xff] }
 0x208   :  { %v4038_v40 = vpack.c.bf16 %v541_v35, %v537_v34  ;;  %v577_v30 = vld [vmem:[#allocation8 + $0x748] sm:$0xff] }
 0x209   :  { %4017 = vmatpush1.bf16.msra.mxu0 %v4016_v41  ;;  %v536_v41 = vld [vmem:[#allocation8 + $0x600] sm:$0xff]  ;;  %v581_v31 = vld [vmem:[#allocation8 + $0x768] sm:$0xff] }
 0x20a   :  { %4273 = vmatpush1.bf16.msra.mxu1 %v4272_v42  ;;  %4019 = vmatprep.subr.bf16.mxu0 %v4018_v43  ;;  %v540_v42 = vld [vmem:[#allocation8 + $0x620] sm:$0xff]  ;;  %v538_v43 = vld [vmem:[#allocation8 + $0x610] sm:$0xff]  ;;  %v4058_v36 = vpack.c.bf16 %v581_v31, %v577_v30  ;;  %v623_v30 = vld [vmem:[#allocation8 + $0x8b8] sm:$0xff] }
 0x20b   :  { %4275 = vmatprep.subr.bf16.mxu1 %v4274_v47  ;;  %v549_v47 = vld [vmem:[#allocation8 + $0x668] sm:$0xff]  ;;  %v4040_v50 = vpack.c.bf16 %v540_v42, %v536_v41  ;;  %v4296_v51 = vpack.c.bf16 %v542_v45, %v538_v43  ;;  %v582_v41 = vld [vmem:[#allocation8 + $0x770] sm:$0xff]  ;;  %v591_v45 = vld [vmem:[#allocation8 + $0x7b8] sm:$0xff] }
 0x20c   :  { %v4042_v52 = vpack.c.bf16 %v549_v47, %v545_v46  ;;  %v585_v42 = vld [vmem:[#allocation8 + $0x788] sm:$0xff]  ;;  %v341_v31 = vld [vmem:[#allocation3 + $0x28] sm:$0xff] }
 0x20d   :  { %4021 = vmatpush1.bf16.msra.mxu0 %v4020_v53  ;;  %v544_v53 = vld [vmem:[#allocation8 + $0x640] sm:$0xff]  ;;  %v589_v43 = vld [vmem:[#allocation8 + $0x7a8] sm:$0xff] }
 0x20e   :  { %4277 = vmatpush1.bf16.msra.mxu1 %v4276_v54  ;;  %4023 = vmatprep.subr.bf16.mxu0 %v4022_v55  ;;  %v548_v54 = vld [vmem:[#allocation8 + $0x660] sm:$0xff]  ;;  %v546_v55 = vld [vmem:[#allocation8 + $0x650] sm:$0xff]  ;;  %v4062_v48 = vpack.c.bf16 %v589_v43, %v585_v42  ;;  %v627_v42 = vld [vmem:[#allocation8 + $0x8d8] sm:$0xff] }
 0x20f   :  { %4279 = vmatprep.subr.bf16.mxu1 %v4278_v59  ;;  %v557_v59 = vld [vmem:[#allocation8 + $0x6a8] sm:$0xff]  ;;  %v4044_v62 = vpack.c.bf16 %v548_v54, %v544_v53  ;;  %v4300_v63 = vpack.c.bf16 %v550_v57, %v546_v55  ;;  %v590_v53 = vld [vmem:[#allocation8 + $0x7b0] sm:$0xff]  ;;  %v599_v57 = vld [vmem:[#allocation8 + $0x7f8] sm:$0xff] }
 0x210   :  { %v4046_v0 = vpack.c.bf16 %v557_v59, %v553_v58  ;;  %v593_v54 = vld [vmem:[#allocation8 + $0x7c8] sm:$0xff]  ;;  %v631_v43 = vld [vmem:[#allocation8 + $0x8f8] sm:$0xff] }
 0x211   :  { %4025 = vmatpush1.bf16.msra.mxu0 %v4024_v1  ;;  %v552_v1 = vld [vmem:[#allocation8 + $0x680] sm:$0xff]  ;;  %v597_v55 = vld [vmem:[#allocation8 + $0x7e8] sm:$0xff] }
 0x212   :  { %4281 = vmatpush1.bf16.msra.mxu1 %v4280_v2  ;;  %4027 = vmatprep.subr.bf16.mxu0 %v4026_v3  ;;  %v556_v2 = vld [vmem:[#allocation8 + $0x6a0] sm:$0xff]  ;;  %v554_v3 = vld [vmem:[#allocation8 + $0x690] sm:$0xff]  ;;  %v4066_v60 = vpack.c.bf16 %v597_v55, %v593_v54  ;;  %v635_v54 = vld [vmem:[#allocation8 + $0x918] sm:$0xff] }
 0x213   :  { %4283 = vmatprep.subr.bf16.mxu1 %v4282_v7  ;;  %v565_v7 = vld [vmem:[#allocation8 + $0x6e8] sm:$0xff]  ;;  %v4048_v10 = vpack.c.bf16 %v556_v2, %v552_v1  ;;  %v4304_v11 = vpack.c.bf16 %v558_v5, %v554_v3  ;;  %v598_v1 = vld [vmem:[#allocation8 + $0x7f0] sm:$0xff]  ;;  %v607_v5 = vld [vmem:[#allocation8 + $0x838] sm:$0xff] }
 0x214   :  { %v4050_v12 = vpack.c.bf16 %v565_v7, %v561_v6  ;;  %v601_v2 = vld [vmem:[#allocation8 + $0x808] sm:$0xff]  ;;  %v639_v55 = vld [vmem:[#allocation8 + $0x938] sm:$0xff] }
 0x215   :  { %4029 = vmatpush1.bf16.msra.mxu0 %v4028_v13  ;;  %v560_v13 = vld [vmem:[#allocation8 + $0x6c0] sm:$0xff]  ;;  %v605_v3 = vld [vmem:[#allocation8 + $0x828] sm:$0xff] }
 0x216   :  { %4285 = vmatpush1.bf16.msra.mxu1 %v4284_v15  ;;  %4031 = vmatprep.subr.bf16.mxu0 %v4030_v16  ;;  %v562_v15 = vld [vmem:[#allocation8 + $0x6d0] sm:$0xff]  ;;  %v4306_v16 = vpack.c.bf16 %v567_v9, %v563_v8  ;;  %v4052_v22 = vpack.c.bf16 %v564_v14, %v560_v13  ;;  %v4070_v8 = vpack.c.bf16 %v605_v3, %v601_v2  ;;  %v600_v9 = vld [vmem:[#allocation8 + $0x800] sm:$0xff]  ;;  %v609_v14 = vld [vmem:[#allocation8 + $0x848] sm:$0xff] }
 0x217   :  { %4287 = vmatprep.subr.bf16.mxu1 %v4286_v20  ;;  %v571_v20 = vld [vmem:[#allocation8 + $0x718] sm:$0xff]  ;;  %v4308_v23 = vpack.c.bf16 %v566_v17, %v562_v15  ;;  %v606_v13 = vld [vmem:[#allocation8 + $0x830] sm:$0xff]  ;;  %v613_v15 = vld [vmem:[#allocation8 + $0x868] sm:$0xff] }
 0x218   :  { %v615_v17 = vld [vmem:[#allocation8 + $0x878] sm:$0xff] }
 0x219   :  { %4033 = vmatpush1.bf16.msra.mxu0 %v4032_v26  ;;  %v572_v26 = vld [vmem:[#allocation8 + $0x720] sm:$0xff]  ;;  %v643_v2 = vld [vmem:[#allocation8 + $0x958] sm:$0xff] }
 0x21a   :  { %4289 = vmatpush1.bf16.msra.mxu1 %v4288_v27  ;;  %4035 = vmatprep.subr.bf16.mxu0 %v4034_v28  ;;  %v570_v27 = vld [vmem:[#allocation8 + $0x710] sm:$0xff]  ;;  %v4310_v28 = vpack.c.bf16 %v575_v21, %v571_v20  ;;  %v4056_v34 = vpack.c.bf16 %v572_v26, %v568_v25  ;;  %v4074_v21 = vpack.c.bf16 %v613_v15, %v609_v14  ;;  %v647_v3 = vld [vmem:[#allocation8 + $0x978] sm:$0xff] }
 0x21b   :  { %4291 = vmatprep.subr.bf16.mxu1 %v4290_v32  ;;  %v579_v32 = vld [vmem:[#allocation8 + $0x758] sm:$0xff]  ;;  %v4312_v35 = vpack.c.bf16 %v574_v29, %v570_v27  ;;  %v614_v26 = vld [vmem:[#allocation8 + $0x870] sm:$0xff]  ;;  %v617_v27 = vld [vmem:[#allocation8 + $0x888] sm:$0xff] }
 0x21c   :  { %v619_v29 = vld [vmem:[#allocation8 + $0x898] sm:$0xff] }
 0x21d   :  { %4037 = vmatpush1.bf16.msra.mxu0 %v4036_v38  ;;  %v580_v38 = vld [vmem:[#allocation8 + $0x760] sm:$0xff]  ;;  %v651_v14 = vld [vmem:[#allocation8 + $0x998] sm:$0xff] }
 0x21e   :  { %4293 = vmatpush1.bf16.msra.mxu1 %v4292_v39  ;;  %4039 = vmatprep.subr.bf16.mxu0 %v4038_v40  ;;  %v578_v39 = vld [vmem:[#allocation8 + $0x750] sm:$0xff]  ;;  %v4314_v40 = vpack.c.bf16 %v583_v33, %v579_v32  ;;  %v4060_v46 = vpack.c.bf16 %v580_v38, %v576_v37  ;;  %v4334_v38 = vpack.c.bf16 %v623_v30, %v619_v29  ;;  %v655_v15 = vld [vmem:[#allocation8 + $0x9b8] sm:$0xff] }
 0x21f   :  { %4295 = vmatprep.subr.bf16.mxu1 %v4294_v44  ;;  %v587_v44 = vld [vmem:[#allocation8 + $0x798] sm:$0xff]  ;;  %v4316_v47 = vpack.c.bf16 %v582_v41, %v578_v39  ;;  %v618_v37 = vld [vmem:[#allocation8 + $0x890] sm:$0xff]  ;;  %v629_v41 = vld [vmem:[#allocation8 + $0x8e8] sm:$0xff] }
 0x220   :  { %v622_v39 = vld [vmem:[#allocation8 + $0x8b0] sm:$0xff] }
 0x221   :  { %4041 = vmatpush1.bf16.msra.mxu0 %v4040_v50  ;;  %v588_v50 = vld [vmem:[#allocation8 + $0x7a0] sm:$0xff] }
 0x222   :  { %4297 = vmatpush1.bf16.msra.mxu1 %v4296_v51  ;;  %4043 = vmatprep.subr.bf16.mxu0 %v4042_v52  ;;  %v586_v51 = vld [vmem:[#allocation8 + $0x790] sm:$0xff]  ;;  %v4318_v52 = vpack.c.bf16 %v591_v45, %v587_v44  ;;  %v4064_v58 = vpack.c.bf16 %v588_v50, %v584_v49  ;;  %v4336_v45 = vpack.c.bf16 %v622_v39, %v618_v37  ;;  %v669_v37 = vld [vmem:[#allocation8 + $0xa28] sm:$0xff]  ;;  %v671_v39 = vld [vmem:[#allocation8 + $0xa38] sm:$0xff] }
 0x223   :  { %4299 = vmatprep.subr.bf16.mxu1 %v4298_v56  ;;  %v595_v56 = vld [vmem:[#allocation8 + $0x7d8] sm:$0xff]  ;;  %v4320_v59 = vpack.c.bf16 %v590_v53, %v586_v51  ;;  %v626_v49 = vld [vmem:[#allocation8 + $0x8d0] sm:$0xff]  ;;  %v4338_v50 = vpack.c.bf16 %v631_v43, %v627_v42  ;;  %v637_v53 = vld [vmem:[#allocation8 + $0x928] sm:$0xff] }
 0x224   :  { %v630_v51 = vld [vmem:[#allocation8 + $0x8f0] sm:$0xff]  ;;  %v664_v43 = vld [vmem:[#allocation8 + $0xa00] sm:$0xff] }
 0x225   :  { %4045 = vmatpush1.bf16.msra.mxu0 %v4044_v62  ;;  %v596_v62 = vld [vmem:[#allocation8 + $0x7e0] sm:$0xff] }
 0x226   :  { %4301 = vmatpush1.bf16.msra.mxu1 %v4300_v63  ;;  %4047 = vmatprep.subr.bf16.mxu0 %v4046_v0  ;;  %v594_v63 = vld [vmem:[#allocation8 + $0x7d0] sm:$0xff]  ;;  %v4322_v0 = vpack.c.bf16 %v599_v57, %v595_v56  ;;  %v4068_v6 = vpack.c.bf16 %v596_v62, %v592_v61  ;;  %v4340_v57 = vpack.c.bf16 %v630_v51, %v626_v49  ;;  %v677_v49 = vld [vmem:[#allocation8 + $0xa68] sm:$0xff]  ;;  %v679_v51 = vld [vmem:[#allocation8 + $0xa78] sm:$0xff] }
 0x227   :  { %4303 = vmatprep.subr.bf16.mxu1 %v4302_v4  ;;  %v603_v4 = vld [vmem:[#allocation8 + $0x818] sm:$0xff]  ;;  %v4324_v7 = vpack.c.bf16 %v598_v1, %v594_v63  ;;  %v634_v61 = vld [vmem:[#allocation8 + $0x910] sm:$0xff]  ;;  %v4342_v62 = vpack.c.bf16 %v639_v55, %v635_v54  ;;  %v645_v1 = vld [vmem:[#allocation8 + $0x968] sm:$0xff] }
 0x228   :  { %v638_v63 = vld [vmem:[#allocation8 + $0x930] sm:$0xff]  ;;  %v672_v55 = vld [vmem:[#allocation8 + $0xa40] sm:$0xff] }
 0x229   :  { %4049 = vmatpush1.bf16.msra.mxu0 %v4048_v10  ;;  %v604_v10 = vld [vmem:[#allocation8 + $0x820] sm:$0xff] }
 0x22a   :  { %4305 = vmatpush1.bf16.msra.mxu1 %v4304_v11  ;;  %4051 = vmatprep.subr.bf16.mxu0 %v4050_v12  ;;  %v602_v11 = vld [vmem:[#allocation8 + $0x810] sm:$0xff]  ;;  %v4326_v12 = vpack.c.bf16 %v607_v5, %v603_v4  ;;  %v4072_v19 = vpack.c.bf16 %v604_v10, %v600_v9  ;;  %v4344_v5 = vpack.c.bf16 %v638_v63, %v634_v61  ;;  %v685_v61 = vld [vmem:[#allocation8 + $0xaa8] sm:$0xff]  ;;  %v687_v63 = vld [vmem:[#allocation8 + $0xab8] sm:$0xff] }
 0x22b   :  { %4307 = vmatprep.subr.bf16.mxu1 %v4306_v16  ;;  %v611_v16 = vld [vmem:[#allocation8 + $0x858] sm:$0xff]  ;;  %v4328_v20 = vpack.c.bf16 %v606_v13, %v602_v11  ;;  %v642_v9 = vld [vmem:[#allocation8 + $0x950] sm:$0xff]  ;;  %v4346_v10 = vpack.c.bf16 %v647_v3, %v643_v2  ;;  %v653_v13 = vld [vmem:[#allocation8 + $0x9a8] sm:$0xff] }
 0x22c   :  { %v4330_v25 = vpack.c.bf16 %v615_v17, %v611_v16  ;;  %v646_v11 = vld [vmem:[#allocation8 + $0x970] sm:$0xff]  ;;  %v680_v3 = vld [vmem:[#allocation8 + $0xa80] sm:$0xff] }
 0x22d   :  { %4053 = vmatpush1.bf16.msra.mxu0 %v4052_v22  ;;  %v608_v22 = vld [vmem:[#allocation8 + $0x840] sm:$0xff]  ;;  %v4348_v17 = vpack.c.bf16 %v646_v11, %v642_v9  ;;  %v693_v9 = vld [vmem:[#allocation8 + $0xae8] sm:$0xff]  ;;  %v695_v11 = vld [vmem:[#allocation8 + $0xaf8] sm:$0xff] }
 0x22e   :  { %4309 = vmatpush1.bf16.msra.mxu1 %v4308_v23  ;;  %4055 = vmatprep.subr.bf16.mxu0 %v4054_v24  ;;  %v612_v23 = vld [vmem:[#allocation8 + $0x860] sm:$0xff]  ;;  %v610_v24 = vld [vmem:[#allocation8 + $0x850] sm:$0xff] }
 0x22f   :  { %4311 = vmatprep.subr.bf16.mxu1 %v4310_v28  ;;  %v621_v28 = vld [vmem:[#allocation8 + $0x8a8] sm:$0xff]  ;;  %v4076_v32 = vpack.c.bf16 %v612_v23, %v608_v22  ;;  %v4332_v33 = vpack.c.bf16 %v614_v26, %v610_v24  ;;  %v4350_v22 = vpack.c.bf16 %v655_v15, %v651_v14  ;;  %v654_v23 = vld [vmem:[#allocation8 + $0x9b0] sm:$0xff]  ;;  %v659_v26 = vld [vmem:[#allocation8 + $0x9d8] sm:$0xff] }
 0x230   :  { %v657_v24 = vld [vmem:[#allocation8 + $0x9c8] sm:$0xff]  ;;  %v688_v15 = vld [vmem:[#allocation8 + $0xac0] sm:$0xff] }
 0x231   :  { %4057 = vmatpush1.bf16.msra.mxu0 %v4056_v34  ;;  %v4078_v34 = vpack.c.bf16 %v621_v28, %v617_v27  ;;  %v663_v27 = vld [vmem:[#allocation8 + $0x9f8] sm:$0xff] }
 0x232   :  { %4313 = vmatpush1.bf16.msra.mxu1 %v4312_v35  ;;  %4059 = vmatprep.subr.bf16.mxu0 %v4058_v36  ;;  %v616_v35 = vld [vmem:[#allocation8 + $0x880] sm:$0xff] }
 0x233   :  { %4315 = vmatprep.subr.bf16.mxu1 %v4314_v40  ;;  %v620_v36 = vld [vmem:[#allocation8 + $0x8a0] sm:$0xff]  ;;  %v625_v40 = vld [vmem:[#allocation8 + $0x8c8] sm:$0xff] }
 0x234   :  { %v4080_v44 = vpack.c.bf16 %v620_v36, %v616_v35  ;;  %v662_v35 = vld [vmem:[#allocation8 + $0x9f0] sm:$0xff]  ;;  %v665_v36 = vld [vmem:[#allocation8 + $0xa08] sm:$0xff] }
 0x235   :  { %4061 = vmatpush1.bf16.msra.mxu0 %v4060_v46  ;;  %v4082_v46 = vpack.c.bf16 %v629_v41, %v625_v40  ;;  %v4102_v42 = vpack.c.bf16 %v669_v37, %v665_v36 }
 0x236   :  { %4317 = vmatpush1.bf16.msra.mxu1 %v4316_v47  ;;  %4063 = vmatprep.subr.bf16.mxu0 %v4062_v48  ;;  %v624_v47 = vld [vmem:[#allocation8 + $0x8c0] sm:$0xff] }
 0x237   :  { %4319 = vmatprep.subr.bf16.mxu1 %v4318_v52  ;;  %v628_v48 = vld [vmem:[#allocation8 + $0x8e0] sm:$0xff]  ;;  %v633_v52 = vld [vmem:[#allocation8 + $0x908] sm:$0xff] }
 0x238   :  { %v4084_v56 = vpack.c.bf16 %v628_v48, %v624_v47  ;;  %v670_v47 = vld [vmem:[#allocation8 + $0xa30] sm:$0xff]  ;;  %v673_v48 = vld [vmem:[#allocation8 + $0xa48] sm:$0xff] }
 0x239   :  { %4065 = vmatpush1.bf16.msra.mxu0 %v4064_v58  ;;  %v4086_v58 = vpack.c.bf16 %v637_v53, %v633_v52  ;;  %v4106_v54 = vpack.c.bf16 %v677_v49, %v673_v48 }
 0x23a   :  { %4321 = vmatpush1.bf16.msra.mxu1 %v4320_v59  ;;  %4067 = vmatprep.subr.bf16.mxu0 %v4066_v60  ;;  %v632_v59 = vld [vmem:[#allocation8 + $0x900] sm:$0xff] }
 0x23b   :  { %4323 = vmatprep.subr.bf16.mxu1 %v4322_v0  ;;  %v636_v60 = vld [vmem:[#allocation8 + $0x920] sm:$0xff]  ;;  %v641_v0 = vld [vmem:[#allocation8 + $0x948] sm:$0xff] }
 0x23c   :  { %v4088_v4 = vpack.c.bf16 %v636_v60, %v632_v59  ;;  %v678_v59 = vld [vmem:[#allocation8 + $0xa70] sm:$0xff]  ;;  %v681_v60 = vld [vmem:[#allocation8 + $0xa88] sm:$0xff] }
 0x23d   :  { %4069 = vmatpush1.bf16.msra.mxu0 %v4068_v6  ;;  %v4090_v6 = vpack.c.bf16 %v645_v1, %v641_v0  ;;  %v4110_v2 = vpack.c.bf16 %v685_v61, %v681_v60 }
 0x23e   :  { %4325 = vmatpush1.bf16.msra.mxu1 %v4324_v7  ;;  %4071 = vmatprep.subr.bf16.mxu0 %v4070_v8  ;;  %v640_v7 = vld [vmem:[#allocation8 + $0x940] sm:$0xff] }
 0x23f   :  { %4327 = vmatprep.subr.bf16.mxu1 %v4326_v12  ;;  %v644_v8 = vld [vmem:[#allocation8 + $0x960] sm:$0xff]  ;;  %v649_v12 = vld [vmem:[#allocation8 + $0x988] sm:$0xff] }
 0x240   :  { %1014 = vmatmul.mubr.f32.vlgmr.msra.gmra.mrb[0].mxu0 %v338_v18  ;;  %v4092_v16 = vpack.c.bf16 %v644_v8, %v640_v7  ;;  %v686_v7 = vld [vmem:[#allocation8 + $0xab0] sm:$0xff]  ;;  %v689_v8 = vld [vmem:[#allocation8 + $0xac8] sm:$0xff] }
 0x241   :  { %4073 = vmatpush1.bf16.msra.mxu0 %v4072_v19  ;;  %1298 = vmatmul.mubr.f32.vlgmr.msra.gmra.mrb[0].mxu1 %v338_v18  ;;  %v4094_v18 = vpack.c.bf16 %v653_v13, %v649_v12  ;;  %v648_v19 = vld [vmem:[#allocation8 + $0x980] sm:$0xff]  ;;  %v4114_v14 = vpack.c.bf16 %v693_v9, %v689_v8 }
 0x242   :  { %4329 = vmatpush1.bf16.msra.mxu1 %v4328_v20  ;;  %4075 = vmatprep.subr.bf16.mxu0 %v4074_v21  ;;  %v652_v20 = vld [vmem:[#allocation8 + $0x9a0] sm:$0xff]  ;;  %v650_v21 = vld [vmem:[#allocation8 + $0x990] sm:$0xff] }
 0x243   :  { %4331 = vmatprep.subr.bf16.mxu1 %v4330_v25  ;;  %1084 = vmatprep.mubr.f32.mxu0 %v341_v31  ;;  %v661_v25 = vld [vmem:[#allocation8 + $0x9e8] sm:$0xff]  ;;  %v4096_v28 = vpack.c.bf16 %v652_v20, %v648_v19  ;;  %v4352_v29 = vpack.c.bf16 %v654_v23, %v650_v21  ;;  %v694_v19 = vld [vmem:[#allocation8 + $0xaf0] sm:$0xff]  ;;  %v703_v23 = vld [vmem:[#allocation8 + $0xb38] sm:$0xff] }
 0x244   :  { %1368 = vmatprep.mubr.f32.mxu1 %v341_v31  ;;  %v4098_v30 = vpack.c.bf16 %v661_v25, %v657_v24  ;;  %v656_v31 = vld [vmem:[#allocation8 + $0x9c0] sm:$0xff]  ;;  %v697_v20 = vld [vmem:[#allocation8 + $0xb08] sm:$0xff] }
 0x245   :  { %4077 = vmatpush1.bf16.msra.mxu0 %v4076_v32  ;;  %v660_v32 = vld [vmem:[#allocation8 + $0x9e0] sm:$0xff]  ;;  %v701_v21 = vld [vmem:[#allocation8 + $0xb28] sm:$0xff] }
 0x246   :  { %4333 = vmatpush1.bf16.msra.mxu1 %v4332_v33  ;;  %4079 = vmatprep.subr.bf16.mxu0 %v4078_v34  ;;  %v658_v33 = vld [vmem:[#allocation8 + $0x9d0] sm:$0xff]  ;;  %v4354_v34 = vpack.c.bf16 %v663_v27, %v659_v26  ;;  %v4100_v40 = vpack.c.bf16 %v660_v32, %v656_v31  ;;  %v4118_v26 = vpack.c.bf16 %v701_v21, %v697_v20  ;;  %v696_v27 = vld [vmem:[#allocation8 + $0xb00] sm:$0xff]  ;;  %v705_v32 = vld [vmem:[#allocation8 + $0xb48] sm:$0xff] }
 0x247   :  { %4335 = vmatprep.subr.bf16.mxu1 %v4334_v38  ;;  %v667_v38 = vld [vmem:[#allocation8 + $0xa18] sm:$0xff]  ;;  %v4356_v41 = vpack.c.bf16 %v662_v35, %v658_v33  ;;  %v702_v31 = vld [vmem:[#allocation8 + $0xb30] sm:$0xff]  ;;  %v709_v33 = vld [vmem:[#allocation8 + $0xb68] sm:$0xff] }
 0x248   :  { %v711_v35 = vld [vmem:[#allocation8 + $0xb78] sm:$0xff] }
 0x249   :  { %4081 = vmatpush1.bf16.msra.mxu0 %v4080_v44  ;;  %v668_v44 = vld [vmem:[#allocation8 + $0xa20] sm:$0xff]  ;;  %v340_v20 = vld [vmem:[#allocation3 + $0x20] sm:$0xff] }
 0x24a   :  { %4337 = vmatpush1.bf16.msra.mxu1 %v4336_v45  ;;  %4083 = vmatprep.subr.bf16.mxu0 %v4082_v46  ;;  %v666_v45 = vld [vmem:[#allocation8 + $0xa10] sm:$0xff]  ;;  %v4358_v46 = vpack.c.bf16 %v671_v39, %v667_v38  ;;  %v4104_v52 = vpack.c.bf16 %v668_v44, %v664_v43  ;;  %v4122_v38 = vpack.c.bf16 %v709_v33, %v705_v32  ;;  %v704_v39 = vld [vmem:[#allocation8 + $0xb40] sm:$0xff]  ;;  %v713_v44 = vld [vmem:[#allocation8 + $0xb88] sm:$0xff] }
 0x24b   :  { %4339 = vmatprep.subr.bf16.mxu1 %v4338_v50  ;;  %v675_v50 = vld [vmem:[#allocation8 + $0xa58] sm:$0xff]  ;;  %v4360_v53 = vpack.c.bf16 %v670_v47, %v666_v45  ;;  %v710_v43 = vld [vmem:[#allocation8 + $0xb70] sm:$0xff]  ;;  %v717_v45 = vld [vmem:[#allocation8 + $0xba8] sm:$0xff] }
 0x24c   :  { %v719_v47 = vld [vmem:[#allocation8 + $0xbb8] sm:$0xff]  ;;  %v343_v33 = vld [vmem:[#allocation3 + $0x38] sm:$0xff] }
 0x24d   :  { %4085 = vmatpush1.bf16.msra.mxu0 %v4084_v56  ;;  %v676_v56 = vld [vmem:[#allocation8 + $0xa60] sm:$0xff]  ;;  %v751_v32 = vld [vmem:[#allocation8 + $0xcb8] sm:$0xff] }
 0x24e   :  { %4341 = vmatpush1.bf16.msra.mxu1 %v4340_v57  ;;  %4087 = vmatprep.subr.bf16.mxu0 %v4086_v58  ;;  %v674_v57 = vld [vmem:[#allocation8 + $0xa50] sm:$0xff]  ;;  %v4362_v58 = vpack.c.bf16 %v679_v51, %v675_v50  ;;  %v4108_v0 = vpack.c.bf16 %v676_v56, %v672_v55  ;;  %v4126_v50 = vpack.c.bf16 %v717_v45, %v713_v44  ;;  %v712_v51 = vld [vmem:[#allocation8 + $0xb80] sm:$0xff]  ;;  %v721_v56 = vld [vmem:[#allocation8 + $0xbc8] sm:$0xff] }
 0x24f   :  { %4343 = vmatprep.subr.bf16.mxu1 %v4342_v62  ;;  %v683_v62 = vld [vmem:[#allocation8 + $0xa98] sm:$0xff]  ;;  %v4364_v1 = vpack.c.bf16 %v678_v59, %v674_v57  ;;  %v718_v55 = vld [vmem:[#allocation8 + $0xbb0] sm:$0xff]  ;;  %v725_v57 = vld [vmem:[#allocation8 + $0xbe8] sm:$0xff] }
 0x250   :  { %v727_v59 = vld [vmem:[#allocation8 + $0xbf8] sm:$0xff] }
 0x251   :  { %4089 = vmatpush1.bf16.msra.mxu0 %v4088_v4  ;;  %v684_v4 = vld [vmem:[#allocation8 + $0xaa0] sm:$0xff]  ;;  %v755_v44 = vld [vmem:[#allocation8 + $0xcd8] sm:$0xff] }
 0x252   :  { %4345 = vmatpush1.bf16.msra.mxu1 %v4344_v5  ;;  %4091 = vmatprep.subr.bf16.mxu0 %v4090_v6  ;;  %v682_v5 = vld [vmem:[#allocation8 + $0xa90] sm:$0xff]  ;;  %v4366_v6 = vpack.c.bf16 %v687_v63, %v683_v62  ;;  %v4112_v12 = vpack.c.bf16 %v684_v4, %v680_v3  ;;  %v4130_v62 = vpack.c.bf16 %v725_v57, %v721_v56  ;;  %v720_v63 = vld [vmem:[#allocation8 + $0xbc0] sm:$0xff]  ;;  %v729_v4 = vld [vmem:[#allocation8 + $0xc08] sm:$0xff] }
 0x253   :  { %4347 = vmatprep.subr.bf16.mxu1 %v4346_v10  ;;  %v691_v10 = vld [vmem:[#allocation8 + $0xad8] sm:$0xff]  ;;  %v4368_v13 = vpack.c.bf16 %v686_v7, %v682_v5  ;;  %v726_v3 = vld [vmem:[#allocation8 + $0xbf0] sm:$0xff]  ;;  %v733_v5 = vld [vmem:[#allocation8 + $0xc28] sm:$0xff] }
 0x254   :  { %v735_v7 = vld [vmem:[#allocation8 + $0xc38] sm:$0xff] }
 0x255   :  { %4093 = vmatpush1.bf16.msra.mxu0 %v4092_v16  ;;  %v692_v16 = vld [vmem:[#allocation8 + $0xae0] sm:$0xff]  ;;  %v759_v45 = vld [vmem:[#allocation8 + $0xcf8] sm:$0xff] }
 0x256   :  { %4349 = vmatpush1.bf16.msra.mxu1 %v4348_v17  ;;  %4095 = vmatprep.subr.bf16.mxu0 %v4094_v18  ;;  %v690_v17 = vld [vmem:[#allocation8 + $0xad0] sm:$0xff]  ;;  %v4370_v18 = vpack.c.bf16 %v695_v11, %v691_v10  ;;  %v4116_v24 = vpack.c.bf16 %v692_v16, %v688_v15  ;;  %v4134_v10 = vpack.c.bf16 %v733_v5, %v729_v4  ;;  %v728_v11 = vld [vmem:[#allocation8 + $0xc00] sm:$0xff]  ;;  %v737_v16 = vld [vmem:[#allocation8 + $0xc48] sm:$0xff] }
 0x257   :  { %4351 = vmatprep.subr.bf16.mxu1 %v4350_v22  ;;  %v699_v22 = vld [vmem:[#allocation8 + $0xb18] sm:$0xff]  ;;  %v4372_v25 = vpack.c.bf16 %v694_v19, %v690_v17  ;;  %v734_v15 = vld [vmem:[#allocation8 + $0xc30] sm:$0xff]  ;;  %v741_v17 = vld [vmem:[#allocation8 + $0xc68] sm:$0xff] }
 0x258   :  { %v743_v19 = vld [vmem:[#allocation8 + $0xc78] sm:$0xff] }
 0x259   :  { %4097 = vmatpush1.bf16.msra.mxu0 %v4096_v28  ;;  %v700_v28 = vld [vmem:[#allocation8 + $0xb20] sm:$0xff]  ;;  %v763_v56 = vld [vmem:[#allocation8 + $0xd18] sm:$0xff] }
 0x25a   :  { %4353 = vmatpush1.bf16.msra.mxu1 %v4352_v29  ;;  %4099 = vmatprep.subr.bf16.mxu0 %v4098_v30  ;;  %v698_v29 = vld [vmem:[#allocation8 + $0xb10] sm:$0xff]  ;;  %v4374_v30 = vpack.c.bf16 %v703_v23, %v699_v22  ;;  %v4120_v36 = vpack.c.bf16 %v700_v28, %v696_v27  ;;  %v4138_v23 = vpack.c.bf16 %v741_v17, %v737_v16  ;;  %v767_v57 = vld [vmem:[#allocation8 + $0xd38] sm:$0xff] }
 0x25b   :  { %4355 = vmatprep.subr.bf16.mxu1 %v4354_v34  ;;  %v707_v34 = vld [vmem:[#allocation8 + $0xb58] sm:$0xff]  ;;  %v4376_v37 = vpack.c.bf16 %v702_v31, %v698_v29  ;;  %v742_v28 = vld [vmem:[#allocation8 + $0xc70] sm:$0xff]  ;;  %v745_v29 = vld [vmem:[#allocation8 + $0xc88] sm:$0xff] }
 0x25c   :  { %v747_v31 = vld [vmem:[#allocation8 + $0xc98] sm:$0xff] }
 0x25d   :  { %4101 = vmatpush1.bf16.msra.mxu0 %v4100_v40  ;;  %v708_v40 = vld [vmem:[#allocation8 + $0xb60] sm:$0xff]  ;;  %v771_v4 = vld [vmem:[#allocation8 + $0xd58] sm:$0xff] }
 0x25e   :  { %4357 = vmatpush1.bf16.msra.mxu1 %v4356_v41  ;;  %4103 = vmatprep.subr.bf16.mxu0 %v4102_v42  ;;  %v706_v41 = vld [vmem:[#allocation8 + $0xb50] sm:$0xff]  ;;  %v4378_v42 = vpack.c.bf16 %v711_v35, %v707_v34  ;;  %v4124_v48 = vpack.c.bf16 %v708_v40, %v704_v39  ;;  %v4398_v40 = vpack.c.bf16 %v751_v32, %v747_v31  ;;  %v775_v5 = vld [vmem:[#allocation8 + $0xd78] sm:$0xff] }
 0x25f   :  { %4359 = vmatprep.subr.bf16.mxu1 %v4358_v46  ;;  %v715_v46 = vld [vmem:[#allocation8 + $0xb98] sm:$0xff]  ;;  %v4380_v49 = vpack.c.bf16 %v710_v43, %v706_v41  ;;  %v746_v39 = vld [vmem:[#allocation8 + $0xc90] sm:$0xff]  ;;  %v757_v43 = vld [vmem:[#allocation8 + $0xce8] sm:$0xff] }
 0x260   :  { %v750_v41 = vld [vmem:[#allocation8 + $0xcb0] sm:$0xff]  ;;  %v779_v16 = vld [vmem:[#allocation8 + $0xd98] sm:$0xff] }
 0x261   :  { %4105 = vmatpush1.bf16.msra.mxu0 %v4104_v52  ;;  %v716_v52 = vld [vmem:[#allocation8 + $0xba0] sm:$0xff]  ;;  %v783_v17 = vld [vmem:[#allocation8 + $0xdb8] sm:$0xff] }
 0x262   :  { %4361 = vmatpush1.bf16.msra.mxu1 %v4360_v53  ;;  %4107 = vmatprep.subr.bf16.mxu0 %v4106_v54  ;;  %v714_v53 = vld [vmem:[#allocation8 + $0xb90] sm:$0xff]  ;;  %v4382_v54 = vpack.c.bf16 %v719_v47, %v715_v46  ;;  %v4128_v60 = vpack.c.bf16 %v716_v52, %v712_v51  ;;  %v4400_v47 = vpack.c.bf16 %v750_v41, %v746_v39  ;;  %v797_v39 = vld [vmem:[#allocation8 + $0xe28] sm:$0xff]  ;;  %v799_v41 = vld [vmem:[#allocation8 + $0xe38] sm:$0xff] }
 0x263   :  { %4363 = vmatprep.subr.bf16.mxu1 %v4362_v58  ;;  %v723_v58 = vld [vmem:[#allocation8 + $0xbd8] sm:$0xff]  ;;  %v4384_v61 = vpack.c.bf16 %v718_v55, %v714_v53  ;;  %v754_v51 = vld [vmem:[#allocation8 + $0xcd0] sm:$0xff]  ;;  %v4402_v52 = vpack.c.bf16 %v759_v45, %v755_v44  ;;  %v765_v55 = vld [vmem:[#allocation8 + $0xd28] sm:$0xff] }
 0x264   :  { %v758_v53 = vld [vmem:[#allocation8 + $0xcf0] sm:$0xff]  ;;  %v792_v45 = vld [vmem:[#allocation8 + $0xe00] sm:$0xff] }
 0x265   :  { %4109 = vmatpush1.bf16.msra.mxu0 %v4108_v0  ;;  %v724_v0 = vld [vmem:[#allocation8 + $0xbe0] sm:$0xff] }
 0x266   :  { %4365 = vmatpush1.bf16.msra.mxu1 %v4364_v1  ;;  %4111 = vmatprep.subr.bf16.mxu0 %v4110_v2  ;;  %v722_v1 = vld [vmem:[#allocation8 + $0xbd0] sm:$0xff]  ;;  %v4386_v2 = vpack.c.bf16 %v727_v59, %v723_v58  ;;  %v4132_v8 = vpack.c.bf16 %v724_v0, %v720_v63  ;;  %v4404_v59 = vpack.c.bf16 %v758_v53, %v754_v51  ;;  %v805_v51 = vld [vmem:[#allocation8 + $0xe68] sm:$0xff]  ;;  %v807_v53 = vld [vmem:[#allocation8 + $0xe78] sm:$0xff] }
 0x267   :  { %4367 = vmatprep.subr.bf16.mxu1 %v4366_v6  ;;  %v731_v6 = vld [vmem:[#allocation8 + $0xc18] sm:$0xff]  ;;  %v4388_v9 = vpack.c.bf16 %v726_v3, %v722_v1  ;;  %v762_v63 = vld [vmem:[#allocation8 + $0xd10] sm:$0xff]  ;;  %v4406_v0 = vpack.c.bf16 %v767_v57, %v763_v56  ;;  %v773_v3 = vld [vmem:[#allocation8 + $0xd68] sm:$0xff] }
 0x268   :  { %v766_v1 = vld [vmem:[#allocation8 + $0xd30] sm:$0xff]  ;;  %v800_v57 = vld [vmem:[#allocation8 + $0xe40] sm:$0xff] }
 0x269   :  { %4113 = vmatpush1.bf16.msra.mxu0 %v4112_v12  ;;  %v732_v12 = vld [vmem:[#allocation8 + $0xc20] sm:$0xff] }
 0x26a   :  { %4369 = vmatpush1.bf16.msra.mxu1 %v4368_v13  ;;  %4115 = vmatprep.subr.bf16.mxu0 %v4114_v14  ;;  %v730_v13 = vld [vmem:[#allocation8 + $0xc10] sm:$0xff]  ;;  %v4390_v14 = vpack.c.bf16 %v735_v7, %v731_v6  ;;  %v4136_v21 = vpack.c.bf16 %v732_v12, %v728_v11  ;;  %v4408_v7 = vpack.c.bf16 %v766_v1, %v762_v63  ;;  %v813_v63 = vld [vmem:[#allocation8 + $0xea8] sm:$0xff]  ;;  %v815_v1 = vld [vmem:[#allocation8 + $0xeb8] sm:$0xff] }
 0x26b   :  { %4371 = vmatprep.subr.bf16.mxu1 %v4370_v18  ;;  %v739_v18 = vld [vmem:[#allocation8 + $0xc58] sm:$0xff]  ;;  %v4392_v22 = vpack.c.bf16 %v734_v15, %v730_v13  ;;  %v770_v11 = vld [vmem:[#allocation8 + $0xd50] sm:$0xff]  ;;  %v4410_v12 = vpack.c.bf16 %v775_v5, %v771_v4  ;;  %v781_v15 = vld [vmem:[#allocation8 + $0xda8] sm:$0xff] }
 0x26c   :  { %v4394_v27 = vpack.c.bf16 %v743_v19, %v739_v18  ;;  %v774_v13 = vld [vmem:[#allocation8 + $0xd70] sm:$0xff]  ;;  %v808_v5 = vld [vmem:[#allocation8 + $0xe80] sm:$0xff] }
 0x26d   :  { %4117 = vmatpush1.bf16.msra.mxu0 %v4116_v24  ;;  %v736_v24 = vld [vmem:[#allocation8 + $0xc40] sm:$0xff]  ;;  %v4412_v19 = vpack.c.bf16 %v774_v13, %v770_v11  ;;  %v821_v11 = vld [vmem:[#allocation8 + $0xee8] sm:$0xff]  ;;  %v823_v13 = vld [vmem:[#allocation8 + $0xef8] sm:$0xff] }
 0x26e   :  { %4373 = vmatpush1.bf16.msra.mxu1 %v4372_v25  ;;  %4119 = vmatprep.subr.bf16.mxu0 %v4118_v26  ;;  %v740_v25 = vld [vmem:[#allocation8 + $0xc60] sm:$0xff]  ;;  %v738_v26 = vld [vmem:[#allocation8 + $0xc50] sm:$0xff] }
 0x26f   :  { %4375 = vmatprep.subr.bf16.mxu1 %v4374_v30  ;;  %v749_v30 = vld [vmem:[#allocation8 + $0xca8] sm:$0xff]  ;;  %v4140_v34 = vpack.c.bf16 %v740_v25, %v736_v24  ;;  %v4396_v35 = vpack.c.bf16 %v742_v28, %v738_v26  ;;  %v4414_v24 = vpack.c.bf16 %v783_v17, %v779_v16  ;;  %v782_v25 = vld [vmem:[#allocation8 + $0xdb0] sm:$0xff]  ;;  %v787_v28 = vld [vmem:[#allocation8 + $0xdd8] sm:$0xff] }
 0x270   :  { %v785_v26 = vld [vmem:[#allocation8 + $0xdc8] sm:$0xff]  ;;  %v816_v17 = vld [vmem:[#allocation8 + $0xec0] sm:$0xff] }
 0x271   :  { %4121 = vmatpush1.bf16.msra.mxu0 %v4120_v36  ;;  %v4142_v36 = vpack.c.bf16 %v749_v30, %v745_v29  ;;  %v791_v29 = vld [vmem:[#allocation8 + $0xdf8] sm:$0xff] }
 0x272   :  { %4377 = vmatpush1.bf16.msra.mxu1 %v4376_v37  ;;  %4123 = vmatprep.subr.bf16.mxu0 %v4122_v38  ;;  %v744_v37 = vld [vmem:[#allocation8 + $0xc80] sm:$0xff] }
 0x273   :  { %4379 = vmatprep.subr.bf16.mxu1 %v4378_v42  ;;  %v748_v38 = vld [vmem:[#allocation8 + $0xca0] sm:$0xff]  ;;  %v753_v42 = vld [vmem:[#allocation8 + $0xcc8] sm:$0xff] }
 0x274   :  { %v4144_v46 = vpack.c.bf16 %v748_v38, %v744_v37  ;;  %v790_v37 = vld [vmem:[#allocation8 + $0xdf0] sm:$0xff]  ;;  %v793_v38 = vld [vmem:[#allocation8 + $0xe08] sm:$0xff] }
 0x275   :  { %4125 = vmatpush1.bf16.msra.mxu0 %v4124_v48  ;;  %v4146_v48 = vpack.c.bf16 %v757_v43, %v753_v42  ;;  %v4166_v44 = vpack.c.bf16 %v797_v39, %v793_v38 }
 0x276   :  { %4381 = vmatpush1.bf16.msra.mxu1 %v4380_v49  ;;  %4127 = vmatprep.subr.bf16.mxu0 %v4126_v50  ;;  %v752_v49 = vld [vmem:[#allocation8 + $0xcc0] sm:$0xff] }
 0x277   :  { %4383 = vmatprep.subr.bf16.mxu1 %v4382_v54  ;;  %v756_v50 = vld [vmem:[#allocation8 + $0xce0] sm:$0xff]  ;;  %v761_v54 = vld [vmem:[#allocation8 + $0xd08] sm:$0xff] }
 0x278   :  { %v4148_v58 = vpack.c.bf16 %v756_v50, %v752_v49  ;;  %v798_v49 = vld [vmem:[#allocation8 + $0xe30] sm:$0xff]  ;;  %v801_v50 = vld [vmem:[#allocation8 + $0xe48] sm:$0xff] }
 0x279   :  { %4129 = vmatpush1.bf16.msra.mxu0 %v4128_v60  ;;  %v4150_v60 = vpack.c.bf16 %v765_v55, %v761_v54  ;;  %v4170_v56 = vpack.c.bf16 %v805_v51, %v801_v50 }
 0x27a   :  { %4385 = vmatpush1.bf16.msra.mxu1 %v4384_v61  ;;  %4131 = vmatprep.subr.bf16.mxu0 %v4130_v62  ;;  %v760_v61 = vld [vmem:[#allocation8 + $0xd00] sm:$0xff] }
 0x27b   :  { %4387 = vmatprep.subr.bf16.mxu1 %v4386_v2  ;;  %v764_v62 = vld [vmem:[#allocation8 + $0xd20] sm:$0xff]  ;;  %v769_v2 = vld [vmem:[#allocation8 + $0xd48] sm:$0xff] }
 0x27c   :  { %v4152_v6 = vpack.c.bf16 %v764_v62, %v760_v61  ;;  %v806_v61 = vld [vmem:[#allocation8 + $0xe70] sm:$0xff]  ;;  %v809_v62 = vld [vmem:[#allocation8 + $0xe88] sm:$0xff] }
 0x27d   :  { %4133 = vmatpush1.bf16.msra.mxu0 %v4132_v8  ;;  %v4154_v8 = vpack.c.bf16 %v773_v3, %v769_v2  ;;  %v4174_v4 = vpack.c.bf16 %v813_v63, %v809_v62 }
 0x27e   :  { %4389 = vmatpush1.bf16.msra.mxu1 %v4388_v9  ;;  %4135 = vmatprep.subr.bf16.mxu0 %v4134_v10  ;;  %v768_v9 = vld [vmem:[#allocation8 + $0xd40] sm:$0xff] }
 0x27f   :  { %4391 = vmatprep.subr.bf16.mxu1 %v4390_v14  ;;  %v772_v10 = vld [vmem:[#allocation8 + $0xd60] sm:$0xff]  ;;  %v777_v14 = vld [vmem:[#allocation8 + $0xd88] sm:$0xff] }
 0x280   :  { %1085 = vmatmul.mubr.f32.vlgmr.msra.gmra.mrb[0].mxu0 %v340_v20  ;;  %v4156_v18 = vpack.c.bf16 %v772_v10, %v768_v9  ;;  %v814_v9 = vld [vmem:[#allocation8 + $0xeb0] sm:$0xff]  ;;  %v817_v10 = vld [vmem:[#allocation8 + $0xec8] sm:$0xff] }
 0x281   :  { %4137 = vmatpush1.bf16.msra.mxu0 %v4136_v21  ;;  %1369 = vmatmul.mubr.f32.vlgmr.msra.gmra.mrb[0].mxu1 %v340_v20  ;;  %v4158_v20 = vpack.c.bf16 %v781_v15, %v777_v14  ;;  %v776_v21 = vld [vmem:[#allocation8 + $0xd80] sm:$0xff]  ;;  %v4178_v16 = vpack.c.bf16 %v821_v11, %v817_v10 }
 0x282   :  { %4393 = vmatpush1.bf16.msra.mxu1 %v4392_v22  ;;  %4139 = vmatprep.subr.bf16.mxu0 %v4138_v23  ;;  %v780_v22 = vld [vmem:[#allocation8 + $0xda0] sm:$0xff]  ;;  %v778_v23 = vld [vmem:[#allocation8 + $0xd90] sm:$0xff] }
 0x283   :  { %4395 = vmatprep.subr.bf16.mxu1 %v4394_v27  ;;  %1155 = vmatprep.mubr.f32.mxu0 %v343_v33  ;;  %v789_v27 = vld [vmem:[#allocation8 + $0xde8] sm:$0xff]  ;;  %v4160_v30 = vpack.c.bf16 %v780_v22, %v776_v21  ;;  %v4416_v31 = vpack.c.bf16 %v782_v25, %v778_v23  ;;  %v822_v21 = vld [vmem:[#allocation8 + $0xef0] sm:$0xff]  ;;  %v831_v25 = vld [vmem:[#allocation8 + $0xf38] sm:$0xff] }
 0x284   :  { %1439 = vmatprep.mubr.f32.mxu1 %v343_v33  ;;  %v4162_v32 = vpack.c.bf16 %v789_v27, %v785_v26  ;;  %v784_v33 = vld [vmem:[#allocation8 + $0xdc0] sm:$0xff]  ;;  %v825_v22 = vld [vmem:[#allocation8 + $0xf08] sm:$0xff] }
 0x285   :  { %4141 = vmatpush1.bf16.msra.mxu0 %v4140_v34  ;;  %v788_v34 = vld [vmem:[#allocation8 + $0xde0] sm:$0xff]  ;;  %v829_v23 = vld [vmem:[#allocation8 + $0xf28] sm:$0xff] }
 0x286   :  { %4397 = vmatpush1.bf16.msra.mxu1 %v4396_v35  ;;  %4143 = vmatprep.subr.bf16.mxu0 %v4142_v36  ;;  %v786_v35 = vld [vmem:[#allocation8 + $0xdd0] sm:$0xff]  ;;  %v4418_v36 = vpack.c.bf16 %v791_v29, %v787_v28  ;;  %v4164_v42 = vpack.c.bf16 %v788_v34, %v784_v33  ;;  %v4182_v28 = vpack.c.bf16 %v829_v23, %v825_v22  ;;  %v824_v29 = vld [vmem:[#allocation8 + $0xf00] sm:$0xff]  ;;  %v833_v34 = vld [vmem:[#allocation8 + $0xf48] sm:$0xff] }
 0x287   :  { %4399 = vmatprep.subr.bf16.mxu1 %v4398_v40  ;;  %v795_v40 = vld [vmem:[#allocation8 + $0xe18] sm:$0xff]  ;;  %v4420_v43 = vpack.c.bf16 %v790_v37, %v786_v35  ;;  %v830_v33 = vld [vmem:[#allocation8 + $0xf30] sm:$0xff]  ;;  %v837_v35 = vld [vmem:[#allocation8 + $0xf68] sm:$0xff] }
 0x288   :  { %v839_v37 = vld [vmem:[#allocation8 + $0xf78] sm:$0xff]  ;;  %v1450_v11 = vld [vmem:[#allocation11] sm:$0xff] }
 0x289   :  { %4145 = vmatpush1.bf16.msra.mxu0 %v4144_v46  ;;  %v796_v46 = vld [vmem:[#allocation8 + $0xe20] sm:$0xff] }
 0x28a   :  { %4401 = vmatpush1.bf16.msra.mxu1 %v4400_v47  ;;  %4147 = vmatprep.subr.bf16.mxu0 %v4146_v48  ;;  %v794_v47 = vld [vmem:[#allocation8 + $0xe10] sm:$0xff]  ;;  %v4422_v48 = vpack.c.bf16 %v799_v41, %v795_v40  ;;  %v4168_v54 = vpack.c.bf16 %v796_v46, %v792_v45  ;;  %v4186_v40 = vpack.c.bf16 %v837_v35, %v833_v34  ;;  %v832_v41 = vld [vmem:[#allocation8 + $0xf40] sm:$0xff]  ;;  %v841_v46 = vld [vmem:[#allocation8 + $0xf88] sm:$0xff] }
 0x28b   :  { %4403 = vmatprep.subr.bf16.mxu1 %v4402_v52  ;;  %v803_v52 = vld [vmem:[#allocation8 + $0xe58] sm:$0xff]  ;;  %v4424_v55 = vpack.c.bf16 %v798_v49, %v794_v47  ;;  %v838_v45 = vld [vmem:[#allocation8 + $0xf70] sm:$0xff]  ;;  %v845_v47 = vld [vmem:[#allocation8 + $0xfa8] sm:$0xff] }
 0x28c   :  { %v847_v49 = vld [vmem:[#allocation8 + $0xfb8] sm:$0xff] }
 0x28d   :  { %4149 = vmatpush1.bf16.msra.mxu0 %v4148_v58  ;;  %v804_v58 = vld [vmem:[#allocation8 + $0xe60] sm:$0xff] }
 0x28e   :  { %4405 = vmatpush1.bf16.msra.mxu1 %v4404_v59  ;;  %4151 = vmatprep.subr.bf16.mxu0 %v4150_v60  ;;  %v802_v59 = vld [vmem:[#allocation8 + $0xe50] sm:$0xff]  ;;  %v4426_v60 = vpack.c.bf16 %v807_v53, %v803_v52  ;;  %v4172_v2 = vpack.c.bf16 %v804_v58, %v800_v57  ;;  %v4190_v52 = vpack.c.bf16 %v845_v47, %v841_v46  ;;  %v840_v53 = vld [vmem:[#allocation8 + $0xf80] sm:$0xff]  ;;  %v849_v58 = vld [vmem:[#allocation8 + $0xfc8] sm:$0xff] }
 0x28f   :  { %4407 = vmatprep.subr.bf16.mxu1 %v4406_v0  ;;  %v811_v0 = vld [vmem:[#allocation8 + $0xe98] sm:$0xff]  ;;  %v4428_v3 = vpack.c.bf16 %v806_v61, %v802_v59  ;;  %v846_v57 = vld [vmem:[#allocation8 + $0xfb0] sm:$0xff]  ;;  %v853_v59 = vld [vmem:[#allocation8 + $0xfe8] sm:$0xff] }
 0x290   :  { %v855_v61 = vld [vmem:[#allocation8 + $0xff8] sm:$0xff] }
 0x291   :  { %4153 = vmatpush1.bf16.msra.mxu0 %v4152_v6  ;;  %v812_v6 = vld [vmem:[#allocation8 + $0xea0] sm:$0xff] }
 0x292   :  { %4409 = vmatpush1.bf16.msra.mxu1 %v4408_v7  ;;  %4155 = vmatprep.subr.bf16.mxu0 %v4154_v8  ;;  %v810_v7 = vld [vmem:[#allocation8 + $0xe90] sm:$0xff]  ;;  %v4430_v8 = vpack.c.bf16 %v815_v1, %v811_v0  ;;  %v4176_v14 = vpack.c.bf16 %v812_v6, %v808_v5  ;;  %v4194_v0 = vpack.c.bf16 %v853_v59, %v849_v58  ;;  %v848_v1 = vld [vmem:[#allocation8 + $0xfc0] sm:$0xff] }
 0x293   :  { %4411 = vmatprep.subr.bf16.mxu1 %v4410_v12  ;;  %v819_v12 = vld [vmem:[#allocation8 + $0xed8] sm:$0xff]  ;;  %v4432_v15 = vpack.c.bf16 %v814_v9, %v810_v7  ;;  %v854_v5 = vld [vmem:[#allocation8 + $0xff0] sm:$0xff] }
 0x294   :  { %v1451_v6 = vld [vmem:[#allocation11 + $0x8] sm:$0xff]  ;;  %v1453_v7 = vld [vmem:[#allocation11 + $0x18] sm:$0xff] }
 0x295   :  { %4157 = vmatpush1.bf16.msra.mxu0 %v4156_v18  ;;  %v820_v18 = vld [vmem:[#allocation8 + $0xee0] sm:$0xff]  ;;  %v4454_v10 = vpack.c.bf16 %v1453_v7, %v1451_v6 }
 0x296   :  { %4413 = vmatpush1.bf16.msra.mxu1 %v4412_v19  ;;  %4159 = vmatprep.subr.bf16.mxu0 %v4158_v20  ;;  %v818_v19 = vld [vmem:[#allocation8 + $0xed0] sm:$0xff]  ;;  %v4434_v20 = vpack.c.bf16 %v823_v13, %v819_v12  ;;  %v4180_v26 = vpack.c.bf16 %v820_v18, %v816_v17  ;;  %v1454_v18 = vld [vmem:[#allocation11 + $0x20] sm:$0xff] }
 0x297   :  { %4415 = vmatprep.subr.bf16.mxu1 %v4414_v24  ;;  %v827_v24 = vld [vmem:[#allocation8 + $0xf18] sm:$0xff]  ;;  %v4436_v27 = vpack.c.bf16 %v822_v21, %v818_v19  ;;  %v1455_v13 = vld [vmem:[#allocation11 + $0x28] sm:$0xff] }
 0x298   :  { %v1452_v12 = vld [vmem:[#allocation11 + $0x10] sm:$0xff]  ;;  %v1461_v21 = vld [vmem:[#allocation11 + $0x58] sm:$0xff] }
 0x299   :  { %4161 = vmatpush1.bf16.msra.mxu0 %v4160_v30  ;;  %v828_v30 = vld [vmem:[#allocation8 + $0xf20] sm:$0xff]  ;;  %v1456_v19 = vld [vmem:[#allocation11 + $0x30] sm:$0xff] }
 0x29a   :  { %4417 = vmatpush1.bf16.msra.mxu1 %v4416_v31  ;;  %4163 = vmatprep.subr.bf16.mxu0 %v4162_v32  ;;  %v826_v31 = vld [vmem:[#allocation8 + $0xf10] sm:$0xff]  ;;  %v4438_v32 = vpack.c.bf16 %v831_v25, %v827_v24  ;;  %v4184_v38 = vpack.c.bf16 %v828_v30, %v824_v29  ;;  %v4460_v22 = vpack.c.bf16 %v1456_v19, %v1454_v18  ;;  %v1458_v24 = vld [vmem:[#allocation11 + $0x40] sm:$0xff] }
 0x29b   :  { %4419 = vmatprep.subr.bf16.mxu1 %v4418_v36  ;;  %v835_v36 = vld [vmem:[#allocation8 + $0xf58] sm:$0xff]  ;;  %v4440_v39 = vpack.c.bf16 %v830_v33, %v826_v31  ;;  %v1462_v30 = vld [vmem:[#allocation11 + $0x60] sm:$0xff] }
 0x29c   :  { %v1460_v25 = vld [vmem:[#allocation11 + $0x50] sm:$0xff]  ;;  %v1469_v33 = vld [vmem:[#allocation11 + $0x98] sm:$0xff] }
 0x29d   :  { %4165 = vmatpush1.bf16.msra.mxu0 %v4164_v42  ;;  %v836_v42 = vld [vmem:[#allocation8 + $0xf60] sm:$0xff]  ;;  %v1464_v31 = vld [vmem:[#allocation11 + $0x70] sm:$0xff] }
 0x29e   :  { %4421 = vmatpush1.bf16.msra.mxu1 %v4420_v43  ;;  %4167 = vmatprep.subr.bf16.mxu0 %v4166_v44  ;;  %v834_v43 = vld [vmem:[#allocation8 + $0xf50] sm:$0xff]  ;;  %v4442_v44 = vpack.c.bf16 %v839_v37, %v835_v36  ;;  %v4188_v50 = vpack.c.bf16 %v836_v42, %v832_v41  ;;  %v4468_v34 = vpack.c.bf16 %v1464_v31, %v1462_v30  ;;  %v1466_v36 = vld [vmem:[#allocation11 + $0x80] sm:$0xff] }
 0x29f   :  { %4423 = vmatprep.subr.bf16.mxu1 %v4422_v48  ;;  %v843_v48 = vld [vmem:[#allocation8 + $0xf98] sm:$0xff]  ;;  %v4444_v51 = vpack.c.bf16 %v838_v45, %v834_v43  ;;  %v1470_v42 = vld [vmem:[#allocation11 + $0xa0] sm:$0xff] }
 0x2a0   :  { %v1468_v37 = vld [vmem:[#allocation11 + $0x90] sm:$0xff]  ;;  %v1477_v45 = vld [vmem:[#allocation11 + $0xd8] sm:$0xff] }
 0x2a1   :  { %4169 = vmatpush1.bf16.msra.mxu0 %v4168_v54  ;;  %v844_v54 = vld [vmem:[#allocation8 + $0xfa0] sm:$0xff]  ;;  %v1472_v43 = vld [vmem:[#allocation11 + $0xb0] sm:$0xff] }
 0x2a2   :  { %4425 = vmatpush1.bf16.msra.mxu1 %v4424_v55  ;;  %4171 = vmatprep.subr.bf16.mxu0 %v4170_v56  ;;  %v842_v55 = vld [vmem:[#allocation8 + $0xf90] sm:$0xff]  ;;  %v4446_v56 = vpack.c.bf16 %v847_v49, %v843_v48  ;;  %v4192_v62 = vpack.c.bf16 %v844_v54, %v840_v53  ;;  %v4476_v46 = vpack.c.bf16 %v1472_v43, %v1470_v42  ;;  %v1474_v48 = vld [vmem:[#allocation11 + $0xc0] sm:$0xff]  ;;  %v1517_v42 = vld [vmem:[#allocation11 + $0x218] sm:$0xff] }
 0x2a3   :  { %4427 = vmatprep.subr.bf16.mxu1 %v4426_v60  ;;  %v851_v60 = vld [vmem:[#allocation8 + $0xfd8] sm:$0xff]  ;;  %v4448_v63 = vpack.c.bf16 %v846_v57, %v842_v55  ;;  %v1478_v54 = vld [vmem:[#allocation11 + $0xe0] sm:$0xff] }
 0x2a4   :  { %v1476_v49 = vld [vmem:[#allocation11 + $0xd0] sm:$0xff]  ;;  %v1485_v57 = vld [vmem:[#allocation11 + $0x118] sm:$0xff] }
 0x2a5   :  { %4173 = vmatpush1.bf16.msra.mxu0 %v4172_v2  ;;  %v852_v2 = vld [vmem:[#allocation8 + $0xfe0] sm:$0xff]  ;;  %v1480_v55 = vld [vmem:[#allocation11 + $0xf0] sm:$0xff] }
 0x2a6   :  { %4429 = vmatpush1.bf16.msra.mxu1 %v4428_v3  ;;  %4175 = vmatprep.subr.bf16.mxu0 %v4174_v4  ;;  %v850_v3 = vld [vmem:[#allocation8 + $0xfd0] sm:$0xff]  ;;  %v4450_v4 = vpack.c.bf16 %v855_v61, %v851_v60  ;;  %v4484_v58 = vpack.c.bf16 %v1480_v55, %v1478_v54  ;;  %v1482_v60 = vld [vmem:[#allocation11 + $0x100] sm:$0xff] }
 0x2a7   :  { %4431 = vmatprep.subr.bf16.mxu1 %v4430_v8  ;;  %v4196_v8 = vpack.c.bf16 %v852_v2, %v848_v1  ;;  %v4452_v9 = vpack.c.bf16 %v854_v5, %v850_v3  ;;  %v1484_v61 = vld [vmem:[#allocation11 + $0x110] sm:$0xff]  ;;  %v1486_v2 = vld [vmem:[#allocation11 + $0x120] sm:$0xff]  ;;  %v1493_v5 = vld [vmem:[#allocation11 + $0x158] sm:$0xff] }
 0x2a8   :  { %v1488_v3 = vld [vmem:[#allocation11 + $0x130] sm:$0xff]  ;;  %v1737_v54 = vld [vmem:[#allocation14 + $0x18] sm:$0xff]  ;;  %v1754_v55 = vld [vmem:[#allocation14 + $0xa0] sm:$0xff] }
 0x2a9   :  { %4177 = vmatpush1.bf16.msra.mxu0 %v4176_v14  ;;  %v1457_v14 = vld [vmem:[#allocation11 + $0x38] sm:$0xff]  ;;  %v4492_v6 = vpack.c.bf16 %v1488_v3, %v1486_v2  ;;  %v1758_v3 = vld [vmem:[#allocation14 + $0xc0] sm:$0xff] }
 0x2aa   :  { %4433 = vmatpush1.bf16.msra.mxu1 %v4432_v15  ;;  %4179 = vmatprep.subr.bf16.mxu0 %v4178_v16  ;;  %v342_v15 = vld [vmem:[#allocation3 + $0x30] sm:$0xff]  ;;  %v4456_v16 = vpack.c.bf16 %v1452_v12, %v1450_v11  ;;  %v4458_v17 = vpack.c.bf16 %v1457_v14, %v1455_v13  ;;  %v1497_v11 = vld [vmem:[#allocation11 + $0x178] sm:$0xff] }
 0x2ab   :  { %4435 = vmatprep.subr.bf16.mxu1 %v4434_v20  ;;  %v1459_v20 = vld [vmem:[#allocation11 + $0x48] sm:$0xff]  ;;  %v1494_v14 = vld [vmem:[#allocation11 + $0x160] sm:$0xff] }
 0x2ac   :  { %v4462_v23 = vpack.c.bf16 %v1461_v21, %v1459_v20  ;;  %v1498_v20 = vld [vmem:[#allocation11 + $0x180] sm:$0xff]  ;;  %v1500_v21 = vld [vmem:[#allocation11 + $0x190] sm:$0xff] }
 0x2ad   :  { %4181 = vmatpush1.bf16.msra.mxu0 %v4180_v26  ;;  %v1463_v26 = vld [vmem:[#allocation11 + $0x68] sm:$0xff]  ;;  %v1741_v2 = vld [vmem:[#allocation14 + $0x38] sm:$0xff] }
 0x2ae   :  { %4437 = vmatpush1.bf16.msra.mxu1 %v4436_v27  ;;  %4183 = vmatprep.subr.bf16.mxu0 %v4182_v28  ;;  %v1465_v27 = vld [vmem:[#allocation11 + $0x78] sm:$0xff]  ;;  %v4464_v28 = vpack.c.bf16 %v1460_v25, %v1458_v24  ;;  %v4504_v24 = vpack.c.bf16 %v1500_v21, %v1498_v20 }
 0x2af   :  { %4439 = vmatprep.subr.bf16.mxu1 %v4438_v32  ;;  %v4466_v29 = vpack.c.bf16 %v1465_v27, %v1463_v26  ;;  %v1467_v32 = vld [vmem:[#allocation11 + $0x88] sm:$0xff]  ;;  %v1502_v26 = vld [vmem:[#allocation11 + $0x1a0] sm:$0xff]  ;;  %v1504_v27 = vld [vmem:[#allocation11 + $0x1b0] sm:$0xff] }
 0x2b0   :  { %v4470_v35 = vpack.c.bf16 %v1469_v33, %v1467_v32  ;;  %v4508_v30 = vpack.c.bf16 %v1504_v27, %v1502_v26  ;;  %v1506_v32 = vld [vmem:[#allocation11 + $0x1c0] sm:$0xff]  ;;  %v1508_v33 = vld [vmem:[#allocation11 + $0x1d0] sm:$0xff] }
 0x2b1   :  { %4185 = vmatpush1.bf16.msra.mxu0 %v4184_v38  ;;  %v1471_v38 = vld [vmem:[#allocation11 + $0xa8] sm:$0xff] }
 0x2b2   :  { %4441 = vmatpush1.bf16.msra.mxu1 %v4440_v39  ;;  %4187 = vmatprep.subr.bf16.mxu0 %v4186_v40  ;;  %v1473_v39 = vld [vmem:[#allocation11 + $0xb8] sm:$0xff]  ;;  %v4472_v40 = vpack.c.bf16 %v1468_v37, %v1466_v36 }
 0x2b3   :  { %4443 = vmatprep.subr.bf16.mxu1 %v4442_v44  ;;  %v4474_v41 = vpack.c.bf16 %v1473_v39, %v1471_v38  ;;  %v1475_v44 = vld [vmem:[#allocation11 + $0xc8] sm:$0xff]  ;;  %v1513_v36 = vld [vmem:[#allocation11 + $0x1f8] sm:$0xff]  ;;  %v1510_v38 = vld [vmem:[#allocation11 + $0x1e0] sm:$0xff] }
 0x2b4   :  { %v4478_v47 = vpack.c.bf16 %v1477_v45, %v1475_v44  ;;  %v1512_v39 = vld [vmem:[#allocation11 + $0x1f0] sm:$0xff]  ;;  %v1750_v44 = vld [vmem:[#allocation14 + $0x80] sm:$0xff] }
 0x2b5   :  { %4189 = vmatpush1.bf16.msra.mxu0 %v4188_v50  ;;  %v1479_v50 = vld [vmem:[#allocation11 + $0xe8] sm:$0xff] }
 0x2b6   :  { %4445 = vmatpush1.bf16.msra.mxu1 %v4444_v51  ;;  %4191 = vmatprep.subr.bf16.mxu0 %v4190_v52  ;;  %v1481_v51 = vld [vmem:[#allocation11 + $0xf8] sm:$0xff]  ;;  %v4480_v52 = vpack.c.bf16 %v1476_v49, %v1474_v48  ;;  %v1751_v45 = vld [vmem:[#allocation14 + $0x88] sm:$0xff] }
 0x2b7   :  { %4447 = vmatprep.subr.bf16.mxu1 %v4446_v56  ;;  %v4482_v53 = vpack.c.bf16 %v1481_v51, %v1479_v50  ;;  %v1483_v56 = vld [vmem:[#allocation11 + $0x108] sm:$0xff]  ;;  %v1752_v49 = vld [vmem:[#allocation14 + $0x90] sm:$0xff]  ;;  %v1753_v50 = vld [vmem:[#allocation14 + $0x98] sm:$0xff] }
 0x2b8   :  { %v4486_v59 = vpack.c.bf16 %v1485_v57, %v1483_v56  ;;  %v1735_v48 = vld [vmem:[#allocation14 + $0x8] sm:$0xff] }
 0x2b9   :  { %4193 = vmatpush1.bf16.msra.mxu0 %v4192_v62  ;;  %v1487_v62 = vld [vmem:[#allocation11 + $0x128] sm:$0xff] }
 0x2ba   :  { %4449 = vmatpush1.bf16.msra.mxu1 %v4448_v63  ;;  %4195 = vmatprep.subr.bf16.mxu0 %v4194_v0  ;;  %v1489_v63 = vld [vmem:[#allocation11 + $0x138] sm:$0xff]  ;;  %v4488_v0 = vpack.c.bf16 %v1484_v61, %v1482_v60  ;;  %v1755_v56 = vld [vmem:[#allocation14 + $0xa8] sm:$0xff] }
 0x2bb   :  { %4451 = vmatprep.subr.bf16.mxu1 %v4450_v4  ;;  %v4490_v1 = vpack.c.bf16 %v1489_v63, %v1487_v62  ;;  %v1491_v4 = vld [vmem:[#allocation11 + $0x148] sm:$0xff]  ;;  %v1756_v61 = vld [vmem:[#allocation14 + $0xb0] sm:$0xff]  ;;  %v1757_v62 = vld [vmem:[#allocation14 + $0xb8] sm:$0xff] }
 0x2bc   :  { %v4494_v7 = vpack.c.bf16 %v1493_v5, %v1491_v4  ;;  %v1739_v60 = vld [vmem:[#allocation14 + $0x28] sm:$0xff] }
 0x2bd   :  { %4197 = vmatpush1.bf16.msra.mxu0 %v4196_v8  ;;  %v1490_v8 = vld [vmem:[#allocation11 + $0x140] sm:$0xff]  ;;  %v1759_v4 = vld [vmem:[#allocation14 + $0xc8] sm:$0xff] }
 0x2be   :  { %4453 = vmatpush1.bf16.msra.mxu1 %v4452_v9  ;;  %4455 = vmatprep.subr.bf16.mxu0 %v4454_v10  ;;  %v1492_v9 = vld [vmem:[#allocation11 + $0x150] sm:$0xff]  ;;  %v1495_v10 = vld [vmem:[#allocation11 + $0x168] sm:$0xff] }
 0x2bf   :  { %v4496_v12 = vpack.c.bf16 %v1492_v9, %v1490_v8  ;;  %v4498_v13 = vpack.c.bf16 %v1497_v11, %v1495_v10  ;;  %v1743_v8 = vld [vmem:[#allocation14 + $0x48] sm:$0xff]  ;;  %v1760_v9 = vld [vmem:[#allocation14 + $0xd0] sm:$0xff]  ;;  %v1761_v10 = vld [vmem:[#allocation14 + $0xd8] sm:$0xff] }
 0x2c0   :  { %1156 = vmatmul.mubr.f32.vlgmr.msra.gmra.mrb[0].mxu0 %v342_v15 }
 0x2c1   :  { %1440 = vmatmul.mubr.f32.vlgmr.msra.gmra.mrb[0].mxu1 %v342_v15  ;;  %4457 = vmatpush1.bf16.msra.mxu0 %v4456_v16  ;;  %v1496_v15 = vld [vmem:[#allocation11 + $0x170] sm:$0xff]  ;;  %v1499_v16 = vld [vmem:[#allocation11 + $0x188] sm:$0xff] }
 0x2c2   :  { %4459 = vmatprep.subr.bf16.mxu0 %v4458_v17  ;;  %v1501_v17 = vld [vmem:[#allocation11 + $0x198] sm:$0xff]  ;;  %v4500_v18 = vpack.c.bf16 %v1496_v15, %v1494_v14  ;;  %v1762_v15 = vld [vmem:[#allocation14 + $0xe0] sm:$0xff] }
 0x2c3   :  { %v4502_v19 = vpack.c.bf16 %v1501_v17, %v1499_v16  ;;  %v1745_v14 = vld [vmem:[#allocation14 + $0x58] sm:$0xff]  ;;  %v1763_v16 = vld [vmem:[#allocation14 + $0xe8] sm:$0xff] }
 0x2c5   :  { %4461 = vmatpush1.bf16.msra.mxu0 %v4460_v22  ;;  %v1503_v22 = vld [vmem:[#allocation11 + $0x1a8] sm:$0xff] }
 0x2c6   :  { %4463 = vmatprep.subr.bf16.mxu0 %v4462_v23  ;;  %v1505_v23 = vld [vmem:[#allocation11 + $0x1b8] sm:$0xff] }
 0x2c7   :  { %v4506_v25 = vpack.c.bf16 %v1505_v23, %v1503_v22  ;;  %v6380_v22 = vld [vmem:[#allocation10] sm:$0xf] }
 0x2c9   :  { %4465 = vmatpush1.bf16.msra.mxu0 %v4464_v28  ;;  %v1507_v28 = vld [vmem:[#allocation11 + $0x1c8] sm:$0xff] }
 0x2ca   :  { %4467 = vmatprep.subr.bf16.mxu0 %v4466_v29  ;;  %v1509_v29 = vld [vmem:[#allocation11 + $0x1d8] sm:$0xff] }
 0x2cb   :  { %v4510_v31 = vpack.c.bf16 %v1509_v29, %v1507_v28 }
 0x2cd   :  { %4469 = vmatpush1.bf16.msra.mxu0 %v4468_v34  ;;  %v4512_v34 = vpack.c.bf16 %v1508_v33, %v1506_v32  ;;  %v1514_v32 = vld [vmem:[#allocation11 + $0x200] sm:$0xff]  ;;  %v1516_v33 = vld [vmem:[#allocation11 + $0x210] sm:$0xff] }
 0x2ce   :  { %4471 = vmatprep.subr.bf16.mxu0 %v4470_v35  ;;  %v1511_v35 = vld [vmem:[#allocation11 + $0x1e8] sm:$0xff] }
 0x2cf   :  { %v4514_v37 = vpack.c.bf16 %v1513_v36, %v1511_v35  ;;  %v1519_v36 = vld [vmem:[#allocation11 + $0x228] sm:$0xff] }
 0x2d1   :  { %4473 = vmatpush1.bf16.msra.mxu0 %v4472_v40  ;;  %v4516_v40 = vpack.c.bf16 %v1512_v39, %v1510_v38 }
 0x2d2   :  { %4475 = vmatprep.subr.bf16.mxu0 %v4474_v41  ;;  %v1515_v41 = vld [vmem:[#allocation11 + $0x208] sm:$0xff] }
 0x2d3   :  { %v4518_v43 = vpack.c.bf16 %v1517_v42, %v1515_v41 }
 0x2d5   :  { %4477 = vmatpush1.bf16.msra.mxu0 %v4476_v46  ;;  %v1734_v46 = vld [vmem:[#allocation14] sm:$0xff] }
 0x2d6   :  { %4479 = vmatprep.subr.bf16.mxu0 %v4478_v47  ;;  %v4582_v47 = vpack.c.bf16 %v1751_v45, %v1750_v44  ;;  %v4584_v51 = vpack.c.bf16 %v1735_v48, %v1734_v46  ;;  %v1520_v44 = vld [vmem:[#allocation11 + $0x230] sm:$0xff]  ;;  %v1523_v46 = vld [vmem:[#allocation11 + $0x248] sm:$0xff] }
 0x2d8   :  { %4583 = vmatprep.subr.bf16.mxu1 %v4582_v47  ;;  %v1525_v47 = vld [vmem:[#allocation11 + $0x258] sm:$0xff] }
 0x2d9   :  { %4481 = vmatpush1.bf16.msra.mxu0 %v4480_v52  ;;  %v4586_v52 = vpack.c.bf16 %v1753_v50, %v1752_v49  ;;  %4585 = vmatpush3.bf16.msra.mxu1 %v4584_v51  ;;  %v4526_v49 = vpack.c.bf16 %v1525_v47, %v1523_v46  ;;  %v1522_v50 = vld [vmem:[#allocation11 + $0x240] sm:$0xff]  ;;  %v1524_v51 = vld [vmem:[#allocation11 + $0x250] sm:$0xff] }
 0x2da   :  { %4483 = vmatprep.subr.bf16.mxu0 %v4482_v53  ;;  %v1736_v53 = vld [vmem:[#allocation14 + $0x10] sm:$0xff]  ;;  %v1558_v46 = vld [vmem:[#allocation11 + $0x360] sm:$0xff] }
 0x2db   :  { %v4588_v57 = vpack.c.bf16 %v1737_v54, %v1736_v53  ;;  %4587 = vmatprep.subr.bf16.mxu1 %v4586_v52  ;;  %v1527_v52 = vld [vmem:[#allocation11 + $0x268] sm:$0xff]  ;;  %v1529_v53 = vld [vmem:[#allocation11 + $0x278] sm:$0xff]  ;;  %v4528_v54 = vpack.c.bf16 %v1524_v51, %v1522_v50  ;;  %v1560_v47 = vld [vmem:[#allocation11 + $0x370] sm:$0xff] }
 0x2dc   :  { %v4564_v50 = vpack.c.bf16 %v1560_v47, %v1558_v46 }
 0x2dd   :  { %4485 = vmatpush1.bf16.msra.mxu0 %v4484_v58  ;;  %v4590_v58 = vpack.c.bf16 %v1755_v56, %v1754_v55  ;;  %4589 = vmatpush3.bf16.msra.mxu1 %v4588_v57  ;;  %v4530_v55 = vpack.c.bf16 %v1529_v53, %v1527_v52  ;;  %v1526_v56 = vld [vmem:[#allocation11 + $0x260] sm:$0xff]  ;;  %v1528_v57 = vld [vmem:[#allocation11 + $0x270] sm:$0xff] }
 0x2de   :  { %4487 = vmatprep.subr.bf16.mxu0 %v4486_v59  ;;  %v1738_v59 = vld [vmem:[#allocation14 + $0x20] sm:$0xff]  ;;  %v1564_v53 = vld [vmem:[#allocation11 + $0x390] sm:$0xff] }
 0x2df   :  { %v4592_v63 = vpack.c.bf16 %v1739_v60, %v1738_v59  ;;  %4591 = vmatprep.subr.bf16.mxu1 %v4590_v58  ;;  %v1531_v58 = vld [vmem:[#allocation11 + $0x288] sm:$0xff]  ;;  %v1533_v59 = vld [vmem:[#allocation11 + $0x298] sm:$0xff]  ;;  %v4532_v60 = vpack.c.bf16 %v1528_v57, %v1526_v56  ;;  %v1562_v52 = vld [vmem:[#allocation11 + $0x380] sm:$0xff] }
 0x2e0   :  { %v4568_v56 = vpack.c.bf16 %v1564_v53, %v1562_v52 }
 0x2e1   :  { %4489 = vmatpush1.bf16.msra.mxu0 %v4488_v0  ;;  %v4594_v0 = vpack.c.bf16 %v1757_v62, %v1756_v61  ;;  %4593 = vmatpush3.bf16.msra.mxu1 %v4592_v63  ;;  %v4534_v61 = vpack.c.bf16 %v1533_v59, %v1531_v58  ;;  %v1530_v62 = vld [vmem:[#allocation11 + $0x280] sm:$0xff]  ;;  %v1532_v63 = vld [vmem:[#allocation11 + $0x290] sm:$0xff] }
 0x2e2   :  { %4491 = vmatprep.subr.bf16.mxu0 %v4490_v1  ;;  %v1740_v1 = vld [vmem:[#allocation14 + $0x30] sm:$0xff]  ;;  %v1566_v58 = vld [vmem:[#allocation11 + $0x3a0] sm:$0xff] }
 0x2e3   :  { %v4596_v5 = vpack.c.bf16 %v1741_v2, %v1740_v1  ;;  %4595 = vmatprep.subr.bf16.mxu1 %v4594_v0  ;;  %v1535_v0 = vld [vmem:[#allocation11 + $0x2a8] sm:$0xff]  ;;  %v1537_v1 = vld [vmem:[#allocation11 + $0x2b8] sm:$0xff]  ;;  %v4536_v2 = vpack.c.bf16 %v1532_v63, %v1530_v62  ;;  %v1568_v59 = vld [vmem:[#allocation11 + $0x3b0] sm:$0xff] }
 0x2e4   :  { %v4572_v62 = vpack.c.bf16 %v1568_v59, %v1566_v58 }
 0x2e5   :  { %4493 = vmatpush1.bf16.msra.mxu0 %v4492_v6  ;;  %v4598_v6 = vpack.c.bf16 %v1759_v4, %v1758_v3  ;;  %4597 = vmatpush3.bf16.msra.mxu1 %v4596_v5  ;;  %v4538_v3 = vpack.c.bf16 %v1537_v1, %v1535_v0  ;;  %v1534_v4 = vld [vmem:[#allocation11 + $0x2a0] sm:$0xff]  ;;  %v1536_v5 = vld [vmem:[#allocation11 + $0x2b0] sm:$0xff] }
 0x2e6   :  { %4495 = vmatprep.subr.bf16.mxu0 %v4494_v7  ;;  %v1742_v7 = vld [vmem:[#allocation14 + $0x40] sm:$0xff] }
 0x2e7   :  { %v4600_v11 = vpack.c.bf16 %v1743_v8, %v1742_v7  ;;  %4599 = vmatprep.subr.bf16.mxu1 %v4598_v6  ;;  %v1539_v6 = vld [vmem:[#allocation11 + $0x2c8] sm:$0xff]  ;;  %v1541_v7 = vld [vmem:[#allocation11 + $0x2d8] sm:$0xff]  ;;  %v4540_v8 = vpack.c.bf16 %v1536_v5, %v1534_v4  ;;  %v1570_v1 = vld [vmem:[#allocation11 + $0x3c0] sm:$0xff] }
 0x2e8   :  { %v1577_v4 = vld [vmem:[#allocation11 + $0x3f8] sm:$0xff] }
 0x2e9   :  { %4497 = vmatpush1.bf16.msra.mxu0 %v4496_v12  ;;  %v4602_v12 = vpack.c.bf16 %v1761_v10, %v1760_v9  ;;  %4601 = vmatpush3.bf16.msra.mxu1 %v4600_v11  ;;  %v4542_v9 = vpack.c.bf16 %v1541_v7, %v1539_v6  ;;  %v1538_v10 = vld [vmem:[#allocation11 + $0x2c0] sm:$0xff]  ;;  %v1540_v11 = vld [vmem:[#allocation11 + $0x2d0] sm:$0xff] }
 0x2ea   :  { %4499 = vmatprep.subr.bf16.mxu0 %v4498_v13  ;;  %v1744_v13 = vld [vmem:[#allocation14 + $0x50] sm:$0xff] }
 0x2eb   :  { %v4604_v17 = vpack.c.bf16 %v1745_v14, %v1744_v13  ;;  %4603 = vmatprep.subr.bf16.mxu1 %v4602_v12  ;;  %v1543_v12 = vld [vmem:[#allocation11 + $0x2e8] sm:$0xff]  ;;  %v1545_v13 = vld [vmem:[#allocation11 + $0x2f8] sm:$0xff]  ;;  %v4544_v14 = vpack.c.bf16 %v1540_v11, %v1538_v10 }
 0x2ed   :  { %4501 = vmatpush1.bf16.msra.mxu0 %v4500_v18  ;;  %v4606_v18 = vpack.c.bf16 %v1763_v16, %v1762_v15  ;;  %4605 = vmatpush3.bf16.msra.mxu1 %v4604_v17  ;;  %v4546_v15 = vpack.c.bf16 %v1545_v13, %v1543_v12  ;;  %v1542_v16 = vld [vmem:[#allocation11 + $0x2e0] sm:$0xff]  ;;  %v1544_v17 = vld [vmem:[#allocation11 + $0x2f0] sm:$0xff] }
 0x2ee   :  { %4503 = vmatprep.subr.bf16.mxu0 %v4502_v19  ;;  %v858_v19 = vlaneseq  ;;  %v1746_v13 = vld [vmem:[#allocation14 + $0x60] sm:$0xff] }
 0x2ef   :  { %4607 = vmatprep.subr.bf16.mxu1 %v4606_v18  ;;  %v1547_v18 = vld [vmem:[#allocation11 + $0x308] sm:$0xff] }
 0x2f0   :  { %v6375_v20 = vshrl.u32 %v858_v19, 7  ;;  %v1549_v19 = vld [vmem:[#allocation11 + $0x318] sm:$0xff] }
 0x2f1   :  { %4505 = vmatpush1.bf16.msra.mxu0 %v4504_v24 }
 0x2f2   :  { %4507 = vmatprep.subr.bf16.mxu0 %v4506_v25  ;;  %v6378_v21 = vsub.s32 0, %v6375_v20  ;;  %v6383_v23 = vsub.s32 1, %v6375_v20  ;;  %v872_v24 = vsub.s32 3, %v6375_v20  ;;  %v868_v63 = vsub.s32 2, %v6375_v20  ;;  %v3367_v20 = vld [vmem:[#allocation25 + $0xf8] sm:$0xff] }
 0x2f4   :  { %v861_v25 = vrot.slane %v6380_v22, %v6378_v21  ;;  %v865_v26 = vrot.slane %v6380_v22, %v6383_v23  ;;  %v873_v27 = vrot.slane %v6380_v22, %v872_v24  ;;  %v869_v6 = vrot.slane %v6380_v22, %v868_v63  ;;  %v1748_v22 = vld [vmem:[#allocation14 + $0x70] sm:$0xff] }
 0x2f5   :  { %4509 = vmatpush1.bf16.msra.mxu0 %v4508_v30 }
 0x2f6   :  { %4511 = vmatprep.subr.bf16.mxu0 %v4510_v31 }
 0x2f9   :  { %4513 = vmatpush1.bf16.msra.mxu0 %v4512_v34 }
 0x2fa   :  { %4515 = vmatprep.subr.bf16.mxu0 %v4514_v37  ;;  %v1521_v37 = vld [vmem:[#allocation11 + $0x238] sm:$0xff] }
 0x2fb   :  { %v4522_v42 = vpack.c.bf16 %v1521_v37, %v1519_v36  ;;  %v1555_v36 = vld [vmem:[#allocation11 + $0x348] sm:$0xff]  ;;  %v1557_v37 = vld [vmem:[#allocation11 + $0x358] sm:$0xff] }
 0x2fd   :  { %4517 = vmatpush1.bf16.msra.mxu0 %v4516_v40  ;;  %v4520_v40 = vpack.c.bf16 %v1516_v33, %v1514_v32 }
 0x2fe   :  { %4519 = vmatprep.subr.bf16.mxu0 %v4518_v43  ;;  %v1518_v43 = vld [vmem:[#allocation11 + $0x220] sm:$0xff] }
 0x2ff   :  { %v4524_v48 = vpack.c.bf16 %v1520_v44, %v1518_v43  ;;  %v1561_v43 = vld [vmem:[#allocation11 + $0x378] sm:$0xff] }
 0x393   :  { %v1157_v28 = vpop.f32.mrb[0].mxu0 }
 0x394   :  { %v5358_v29 = vadd.f32 %v1157_v28, %v861_v25  ;;  %v6393_v30 = vpop.f32.mrb[0].mxu1  ;;  %v1159_v31 = vpop.f32.mrb[1].mxu0  ;;  %v4548_v25 = vpack.c.bf16 %v1544_v17, %v1542_v16  ;;  %v1548_v28 = vld [vmem:[#allocation11 + $0x310] sm:$0xff]  ;;  %v1765_v17 = vld [vmem:[#allocation14 + $0xf8] sm:$0xff] }
 0x395   :  { %v5359_v34 = vadd.f32 %v1159_v31, %v865_v26  ;;  %v1443_v35 = vpop.f32.mrb[1].mxu1  ;;  %v4550_v26 = vpack.c.bf16 %v1549_v19, %v1547_v18  ;;  %v1553_v31 = vld [vmem:[#allocation11 + $0x338] sm:$0xff]  ;;  %v5360_v11 = vadd.f32 %v6393_v30, %v869_v6 }
 0x396   :  { %v5361_v38 = vadd.f32 %v1443_v35, %v873_v27  ;;  %v1446_v41 = vmax.f32 %v5358_v29, 0.0  ;;  %v1546_v27 = vld [vmem:[#allocation11 + $0x300] sm:$0xff]  ;;  %v1551_v29 = vld [vmem:[#allocation11 + $0x328] sm:$0xff]  ;;  %v1552_v35 = vld [vmem:[#allocation11 + $0x330] sm:$0xff] }
 0x397   :  { %v1447_v39 = vmax.f32 %v5359_v34, 0.0  ;;  %v4552_v32 = vpack.c.bf16 %v1548_v28, %v1546_v27  ;;  %v4554_v33 = vpack.c.bf16 %v1553_v31, %v1551_v29  ;;  %v1550_v34 = vld [vmem:[#allocation11 + $0x320] sm:$0xff]  ;;  %v1448_v12 = vmax.f32 %v5360_v11, 0.0  ;;  %v1764_v16 = vld [vmem:[#allocation14 + $0xf0] sm:$0xff] }
 0x398   :  { %v1449_v45 = vmax.f32 %v5361_v38, 0.0  ;;  %v4556_v38 = vpack.c.bf16 %v1552_v35, %v1550_v34  ;;  %v4610_v18 = vpack.c.bf16 %v1765_v17, %v1764_v16  ;;  %v1749_v19 = vld [vmem:[#allocation14 + $0x78] sm:$0xff] }
 0x399   :  { %1654 = vmatprep.mubr.f32.mxu0 %v1447_v39  ;;  %v4558_v39 = vpack.c.bf16 %v1557_v37, %v1555_v36  ;;  %v1953_v27 = vld [vmem:[#allocation19 + $0x38] sm:$0xff]  ;;  %v1948_v28 = vld [vmem:[#allocation19 + $0x10] sm:$0xff] }
 0x39a   :  { %1655 = vmatmul.mubr.f32.vlgmr.msra.gmra.mrb[2].mxu0 %v1446_v41  ;;  %v1556_v41 = vld [vmem:[#allocation11 + $0x350] sm:$0xff]  ;;  %v1957_v31 = vld [vmem:[#allocation19 + $0x58] sm:$0xff] }
 0x39b   :  { %4521 = vmatpush1.bf16.msra.mxu0 %v4520_v40  ;;  %1725 = vmatprep.mubr.f32.mxu0 %v1449_v45  ;;  %v1554_v40 = vld [vmem:[#allocation11 + $0x340] sm:$0xff]  ;;  %v1952_v29 = vld [vmem:[#allocation19 + $0x30] sm:$0xff] }
 0x39c   :  { %4523 = vmatprep.subr.bf16.mxu0 %v4522_v42  ;;  %v1559_v42 = vld [vmem:[#allocation11 + $0x368] sm:$0xff]  ;;  %v4560_v44 = vpack.c.bf16 %v1556_v41, %v1554_v40  ;;  %v4896_v34 = vpack.c.bf16 %v1952_v29, %v1948_v28  ;;  %v1956_v36 = vld [vmem:[#allocation19 + $0x50] sm:$0xff]  ;;  %v2005_v6 = vld [vmem:[#allocation19 + $0x1d8] sm:$0xff] }
 0x39d   :  { %v4562_v45 = vpack.c.bf16 %v1561_v43, %v1559_v42  ;;  %v1960_v37 = vld [vmem:[#allocation19 + $0x70] sm:$0xff]  ;;  %v2029_v28 = vld [vmem:[#allocation19 + $0x298] sm:$0xff] }
 0x39e   :  { %v4900_v40 = vpack.c.bf16 %v1960_v37, %v1956_v36  ;;  %v1964_v42 = vld [vmem:[#allocation19 + $0x90] sm:$0xff]  ;;  %v2041_v36 = vld [vmem:[#allocation19 + $0x2f8] sm:$0xff] }
 0x39f   :  { %4525 = vmatpush1.bf16.msra.mxu0 %v4524_v48  ;;  %v1563_v48 = vld [vmem:[#allocation11 + $0x388] sm:$0xff]  ;;  %v1968_v43 = vld [vmem:[#allocation19 + $0xb0] sm:$0xff] }
 0x3a0   :  { %4527 = vmatprep.subr.bf16.mxu0 %v4526_v49  ;;  %v1565_v49 = vld [vmem:[#allocation11 + $0x398] sm:$0xff]  ;;  %v4904_v46 = vpack.c.bf16 %v1968_v43, %v1964_v42 }
 0x3a1   :  { %v4566_v51 = vpack.c.bf16 %v1565_v49, %v1563_v48  ;;  %v1972_v48 = vld [vmem:[#allocation19 + $0xd0] sm:$0xff]  ;;  %v2049_v42 = vld [vmem:[#allocation19 + $0x338] sm:$0xff] }
 0x3a2   :  { %v1976_v49 = vld [vmem:[#allocation19 + $0xf0] sm:$0xff] }
 0x3a3   :  { %4529 = vmatpush1.bf16.msra.mxu0 %v4528_v54  ;;  %v1567_v54 = vld [vmem:[#allocation11 + $0x3a8] sm:$0xff]  ;;  %v4908_v52 = vpack.c.bf16 %v1976_v49, %v1972_v48  ;;  %v2008_v11 = vld [vmem:[#allocation19 + $0x1f0] sm:$0xff]  ;;  %v2057_v48 = vld [vmem:[#allocation19 + $0x378] sm:$0xff] }
 0x3a4   :  { %4531 = vmatprep.subr.bf16.mxu0 %v4530_v55  ;;  %v1569_v55 = vld [vmem:[#allocation11 + $0x3b8] sm:$0xff] }
 0x3a5   :  { %v4570_v57 = vpack.c.bf16 %v1569_v55, %v1567_v54  ;;  %v1980_v54 = vld [vmem:[#allocation19 + $0x110] sm:$0xff] }
 0x3a6   :  { %v1984_v55 = vld [vmem:[#allocation19 + $0x130] sm:$0xff] }
 0x3a7   :  { %4533 = vmatpush1.bf16.msra.mxu0 %v4532_v60  ;;  %v1571_v60 = vld [vmem:[#allocation11 + $0x3c8] sm:$0xff]  ;;  %v4912_v58 = vpack.c.bf16 %v1984_v55, %v1980_v54  ;;  %v2012_v16 = vld [vmem:[#allocation19 + $0x210] sm:$0xff]  ;;  %v2065_v54 = vld [vmem:[#allocation19 + $0x3b8] sm:$0xff] }
 0x3a8   :  { %4535 = vmatprep.subr.bf16.mxu0 %v4534_v61  ;;  %v1573_v61 = vld [vmem:[#allocation11 + $0x3d8] sm:$0xff] }
 0x3a9   :  { %v4574_v0 = vpack.c.bf16 %v1573_v61, %v1571_v60  ;;  %v1988_v60 = vld [vmem:[#allocation19 + $0x150] sm:$0xff] }
 0x3aa   :  { %v1992_v61 = vld [vmem:[#allocation19 + $0x170] sm:$0xff] }
 0x3ab   :  { %4537 = vmatpush1.bf16.msra.mxu0 %v4536_v2  ;;  %v1572_v2 = vld [vmem:[#allocation11 + $0x3d0] sm:$0xff] }
 0x3ac   :  { %4539 = vmatprep.subr.bf16.mxu0 %v4538_v3  ;;  %v1575_v3 = vld [vmem:[#allocation11 + $0x3e8] sm:$0xff]  ;;  %v4576_v5 = vpack.c.bf16 %v1572_v2, %v1570_v1  ;;  %v4916_v1 = vpack.c.bf16 %v1992_v61, %v1988_v60  ;;  %v2016_v17 = vld [vmem:[#allocation19 + $0x230] sm:$0xff]  ;;  %v2073_v60 = vld [vmem:[#allocation19 + $0x3f8] sm:$0xff] }
 0x3ad   :  { %v4578_v7 = vpack.c.bf16 %v1577_v4, %v1575_v3  ;;  %v1996_v3 = vld [vmem:[#allocation19 + $0x190] sm:$0xff] }
 0x3ae   :  { %v2000_v4 = vld [vmem:[#allocation19 + $0x1b0] sm:$0xff] }
 0x3af   :  { %4541 = vmatpush1.bf16.msra.mxu0 %v4540_v8  ;;  %v1574_v8 = vld [vmem:[#allocation11 + $0x3e0] sm:$0xff] }
 0x3b0   :  { %4543 = vmatprep.subr.bf16.mxu0 %v4542_v9  ;;  %v1576_v9 = vld [vmem:[#allocation11 + $0x3f0] sm:$0xff] }
 0x3b1   :  { %v4580_v10 = vpack.c.bf16 %v1576_v9, %v1574_v8  ;;  %v4920_v8 = vpack.c.bf16 %v2000_v4, %v1996_v3  ;;  %v2081_v3 = vld [vmem:[#allocation19 + $0x438] sm:$0xff] }
 0x3b3   :  { %4545 = vmatpush1.bf16.msra.mxu0 %v4544_v14  ;;  %v1747_v14 = vld [vmem:[#allocation14 + $0x68] sm:$0xff] }
 0x3b4   :  { %4547 = vmatprep.subr.bf16.mxu0 %v4546_v15  ;;  %v4608_v15 = vpack.c.bf16 %v1747_v14, %v1746_v13  ;;  %v2017_v13 = vld [vmem:[#allocation19 + $0x238] sm:$0xff] }
 0x3b6   :  { %4609 = vmatpush3.bf16.msra.mxu1 %v4608_v15 }
 0x3b7   :  { %4549 = vmatpush1.bf16.msra.mxu0 %v4548_v25  ;;  %v4612_v25 = vpack.c.bf16 %v1749_v19, %v1748_v22  ;;  %4611 = vmatprep.subr.bf16.mxu1 %v4610_v18  ;;  %v2021_v18 = vld [vmem:[#allocation19 + $0x258] sm:$0xff]  ;;  %v4928_v19 = vpack.c.bf16 %v2016_v17, %v2012_v16 }
 0x3b8   :  { %4551 = vmatprep.subr.bf16.mxu0 %v4550_v26  ;;  %v1949_v26 = vld [vmem:[#allocation19 + $0x18] sm:$0xff] }
 0x3b9   :  { %v4894_v30 = vpack.c.bf16 %v1953_v27, %v1949_v26  ;;  %v2025_v22 = vld [vmem:[#allocation19 + $0x278] sm:$0xff]  ;;  %v2020_v26 = vld [vmem:[#allocation19 + $0x250] sm:$0xff] }
 0x3ba   :  { %4613 = vmatpush3.bf16.msra.mxu1 %v4612_v25  ;;  %v4930_v25 = vpack.c.bf16 %v2025_v22, %v2021_v18  ;;  %v2024_v27 = vld [vmem:[#allocation19 + $0x270] sm:$0xff]  ;;  %v2097_v16 = vld [vmem:[#allocation19 + $0x4b8] sm:$0xff] }
 0x3bb   :  { %4553 = vmatpush1.bf16.msra.mxu0 %v4552_v32  ;;  %v1961_v32 = vld [vmem:[#allocation19 + $0x78] sm:$0xff]  ;;  %v4932_v29 = vpack.c.bf16 %v2024_v27, %v2020_v26  ;;  %v2092_v22 = vld [vmem:[#allocation19 + $0x490] sm:$0xff] }
 0x3bc   :  { %4555 = vmatprep.subr.bf16.mxu0 %v4554_v33  ;;  %v5948_v33 = vmov 0.0|0.0   ;;  %v4898_v35 = vpack.c.bf16 %v1961_v32, %v1957_v31  ;;  %v2028_v32 = vld [vmem:[#allocation19 + $0x290] sm:$0xff]  ;;  %v2105_v26 = vld [vmem:[#allocation19 + $0x4f8] sm:$0xff] }
 0x3bd   :  { %4614 = vmatprep.subr.bf16.mxu1 %v5948_v33 }
 0x3bf   :  { %4557 = vmatpush1.bf16.msra.mxu0 %v4556_v38  ;;  %v1965_v38 = vld [vmem:[#allocation19 + $0x98] sm:$0xff] }
 0x3c0   :  { %4559 = vmatprep.subr.bf16.mxu0 %v4558_v39  ;;  %v1969_v39 = vld [vmem:[#allocation19 + $0xb8] sm:$0xff] }
 0x3c1   :  { %v4902_v41 = vpack.c.bf16 %v1969_v39, %v1965_v38  ;;  %v2036_v39 = vld [vmem:[#allocation19 + $0x2d0] sm:$0xff] }
 0x3c3   :  { %4561 = vmatpush1.bf16.msra.mxu0 %v4560_v44  ;;  %v1973_v44 = vld [vmem:[#allocation19 + $0xd8] sm:$0xff] }
 0x3c4   :  { %4563 = vmatprep.subr.bf16.mxu0 %v4562_v45  ;;  %v1977_v45 = vld [vmem:[#allocation19 + $0xf8] sm:$0xff] }
 0x3c5   :  { %v4906_v47 = vpack.c.bf16 %v1977_v45, %v1973_v44  ;;  %v2044_v45 = vld [vmem:[#allocation19 + $0x310] sm:$0xff] }
 0x3c7   :  { %4565 = vmatpush1.bf16.msra.mxu0 %v4564_v50  ;;  %v1981_v50 = vld [vmem:[#allocation19 + $0x118] sm:$0xff] }
 0x3c8   :  { %4567 = vmatprep.subr.bf16.mxu0 %v4566_v51  ;;  %v1985_v51 = vld [vmem:[#allocation19 + $0x138] sm:$0xff] }
 0x3c9   :  { %v4910_v53 = vpack.c.bf16 %v1985_v51, %v1981_v50  ;;  %v2052_v51 = vld [vmem:[#allocation19 + $0x350] sm:$0xff] }
 0x3cb   :  { %4569 = vmatpush1.bf16.msra.mxu0 %v4568_v56  ;;  %v1989_v56 = vld [vmem:[#allocation19 + $0x158] sm:$0xff] }
 0x3cc   :  { %4571 = vmatprep.subr.bf16.mxu0 %v4570_v57  ;;  %v1993_v57 = vld [vmem:[#allocation19 + $0x178] sm:$0xff] }
 0x3cd   :  { %v4914_v59 = vpack.c.bf16 %v1993_v57, %v1989_v56  ;;  %v2060_v57 = vld [vmem:[#allocation19 + $0x390] sm:$0xff] }
 0x3cf   :  { %4573 = vmatpush1.bf16.msra.mxu0 %v4572_v62  ;;  %v1997_v62 = vld [vmem:[#allocation19 + $0x198] sm:$0xff] }
 0x3d0   :  { %4575 = vmatprep.subr.bf16.mxu0 %v4574_v0  ;;  %v2001_v0 = vld [vmem:[#allocation19 + $0x1b8] sm:$0xff] }
 0x3d1   :  { %v4918_v2 = vpack.c.bf16 %v2001_v0, %v1997_v62  ;;  %v2068_v0 = vld [vmem:[#allocation19 + $0x3d0] sm:$0xff] }
 0x3d3   :  { %4577 = vmatpush1.bf16.msra.mxu0 %v4576_v5  ;;  %v1939_v5 = vld [vmem:[#allocation5 + $0x8] sm:$0xff] }
 0x3d4   :  { %4579 = vmatprep.subr.bf16.mxu0 %v4578_v7  ;;  %v2009_v7 = vld [vmem:[#allocation19 + $0x1f8] sm:$0xff] }
 0x3d5   :  { %v4922_v9 = vpack.c.bf16 %v2009_v7, %v2005_v6  ;;  %v2076_v6 = vld [vmem:[#allocation19 + $0x410] sm:$0xff] }
 0x3d6   :  { %v2080_v7 = vld [vmem:[#allocation19 + $0x430] sm:$0xff] }
 0x3d7   :  { %4581 = vmatpush1.bf16.msra.mxu0 %v4580_v10  ;;  %v2004_v10 = vld [vmem:[#allocation19 + $0x1d0] sm:$0xff] }
 0x3d8   :  { %4895 = vmatprep.subr.bf16.mxu0 %v4894_v30  ;;  %v4924_v14 = vpack.c.bf16 %v2008_v11, %v2004_v10  ;;  %v2033_v30 = vld [vmem:[#allocation19 + $0x2b8] sm:$0xff]  ;;  %v1938_v10 = vld [vmem:[#allocation5] sm:$0xff]  ;;  %v4960_v11 = vpack.c.bf16 %v2080_v7, %v2076_v6 }
 0x3d9   :  { %v4934_v31 = vpack.c.bf16 %v2033_v30, %v2029_v28  ;;  %v2100_v30 = vld [vmem:[#allocation19 + $0x4d0] sm:$0xff]  ;;  %v2161_v6 = vld [vmem:[#allocation19 + $0x6b8] sm:$0xff] }
 0x3da   :  { %1726 = vmatmul.mubr.f32.vlgmr.msra.gmra.mrb[2].mxu0 %v1448_v12  ;;  %v2013_v12 = vld [vmem:[#allocation19 + $0x218] sm:$0xff] }
 0x3db   :  { %4897 = vmatpush1.bf16.msra.mxu0 %v4896_v34  ;;  %2828 = vmatprep.mubr.f32.mxu0 %v1939_v5  ;;  %v4926_v15 = vpack.c.bf16 %v2017_v13, %v2013_v12  ;;  %v2032_v34 = vld [vmem:[#allocation19 + $0x2b0] sm:$0xff] }
 0x3dc   :  { %4899 = vmatprep.subr.bf16.mxu0 %v4898_v35  ;;  %v2037_v35 = vld [vmem:[#allocation19 + $0x2d8] sm:$0xff]  ;;  %v4936_v37 = vpack.c.bf16 %v2032_v34, %v2028_v32  ;;  %v2084_v13 = vld [vmem:[#allocation19 + $0x450] sm:$0xff] }
 0x3dd   :  { %v4938_v38 = vpack.c.bf16 %v2041_v36, %v2037_v35  ;;  %v2113_v32 = vld [vmem:[#allocation19 + $0x538] sm:$0xff]  ;;  %v2108_v36 = vld [vmem:[#allocation19 + $0x510] sm:$0xff] }
 0x3df   :  { %4901 = vmatpush1.bf16.msra.mxu0 %v4900_v40  ;;  %v2040_v40 = vld [vmem:[#allocation19 + $0x2f0] sm:$0xff] }
 0x3e0   :  { %4903 = vmatprep.subr.bf16.mxu0 %v4902_v41  ;;  %v2045_v41 = vld [vmem:[#allocation19 + $0x318] sm:$0xff]  ;;  %v4940_v43 = vpack.c.bf16 %v2040_v40, %v2036_v39 }
 0x3e1   :  { %v4942_v44 = vpack.c.bf16 %v2049_v42, %v2045_v41  ;;  %v2121_v39 = vld [vmem:[#allocation19 + $0x578] sm:$0xff]  ;;  %v2116_v42 = vld [vmem:[#allocation19 + $0x550] sm:$0xff] }
 0x3e3   :  { %4905 = vmatpush1.bf16.msra.mxu0 %v4904_v46  ;;  %v2048_v46 = vld [vmem:[#allocation19 + $0x330] sm:$0xff] }
 0x3e4   :  { %4907 = vmatprep.subr.bf16.mxu0 %v4906_v47  ;;  %v2053_v47 = vld [vmem:[#allocation19 + $0x358] sm:$0xff]  ;;  %v4944_v49 = vpack.c.bf16 %v2048_v46, %v2044_v45 }
 0x3e5   :  { %v4946_v50 = vpack.c.bf16 %v2057_v48, %v2053_v47  ;;  %v2129_v45 = vld [vmem:[#allocation19 + $0x5b8] sm:$0xff]  ;;  %v2124_v48 = vld [vmem:[#allocation19 + $0x590] sm:$0xff] }
 0x3e7   :  { %4909 = vmatpush1.bf16.msra.mxu0 %v4908_v52  ;;  %v2056_v52 = vld [vmem:[#allocation19 + $0x370] sm:$0xff] }
 0x3e8   :  { %4911 = vmatprep.subr.bf16.mxu0 %v4910_v53  ;;  %v2061_v53 = vld [vmem:[#allocation19 + $0x398] sm:$0xff]  ;;  %v4948_v55 = vpack.c.bf16 %v2056_v52, %v2052_v51 }
 0x3e9   :  { %v4950_v56 = vpack.c.bf16 %v2065_v54, %v2061_v53  ;;  %v2137_v51 = vld [vmem:[#allocation19 + $0x5f8] sm:$0xff]  ;;  %v2132_v54 = vld [vmem:[#allocation19 + $0x5d0] sm:$0xff] }
 0x3eb   :  { %4913 = vmatpush1.bf16.msra.mxu0 %v4912_v58  ;;  %v2064_v58 = vld [vmem:[#allocation19 + $0x3b0] sm:$0xff] }
 0x3ec   :  { %4915 = vmatprep.subr.bf16.mxu0 %v4914_v59  ;;  %v2069_v59 = vld [vmem:[#allocation19 + $0x3d8] sm:$0xff]  ;;  %v4952_v61 = vpack.c.bf16 %v2064_v58, %v2060_v57 }
 0x3ed   :  { %v4954_v62 = vpack.c.bf16 %v2073_v60, %v2069_v59  ;;  %v2145_v57 = vld [vmem:[#allocation19 + $0x638] sm:$0xff]  ;;  %v2140_v60 = vld [vmem:[#allocation19 + $0x610] sm:$0xff] }
 0x3ef   :  { %4917 = vmatpush1.bf16.msra.mxu0 %v4916_v1  ;;  %v2072_v1 = vld [vmem:[#allocation19 + $0x3f0] sm:$0xff] }
 0x3f0   :  { %4919 = vmatprep.subr.bf16.mxu0 %v4918_v2  ;;  %v2077_v2 = vld [vmem:[#allocation19 + $0x418] sm:$0xff]  ;;  %v4956_v4 = vpack.c.bf16 %v2072_v1, %v2068_v0 }
 0x3f1   :  { %v4958_v5 = vpack.c.bf16 %v2081_v3, %v2077_v2  ;;  %v2153_v0 = vld [vmem:[#allocation19 + $0x678] sm:$0xff]  ;;  %v2148_v3 = vld [vmem:[#allocation19 + $0x650] sm:$0xff] }
 0x3f3   :  { %4921 = vmatpush1.bf16.msra.mxu0 %v4920_v8  ;;  %v2085_v8 = vld [vmem:[#allocation19 + $0x458] sm:$0xff] }
 0x3f4   :  { %4923 = vmatprep.subr.bf16.mxu0 %v4922_v9  ;;  %v2089_v9 = vld [vmem:[#allocation19 + $0x478] sm:$0xff] }
 0x3f5   :  { %v4962_v12 = vpack.c.bf16 %v2089_v9, %v2085_v8  ;;  %v2156_v9 = vld [vmem:[#allocation19 + $0x690] sm:$0xff] }
 0x3f7   :  { %4925 = vmatpush1.bf16.msra.mxu0 %v4924_v14  ;;  %v2088_v14 = vld [vmem:[#allocation19 + $0x470] sm:$0xff] }
 0x3f8   :  { %4927 = vmatprep.subr.bf16.mxu0 %v4926_v15  ;;  %v2093_v15 = vld [vmem:[#allocation19 + $0x498] sm:$0xff]  ;;  %v4964_v17 = vpack.c.bf16 %v2088_v14, %v2084_v13 }
 0x3f9   :  { %v4966_v18 = vpack.c.bf16 %v2097_v16, %v2093_v15  ;;  %v2164_v15 = vld [vmem:[#allocation19 + $0x6d0] sm:$0xff] }
 0x3fa   :  { %v2168_v16 = vld [vmem:[#allocation19 + $0x6f0] sm:$0xff] }
 0x3fb   :  { %4929 = vmatpush1.bf16.msra.mxu0 %v4928_v19  ;;  %v2096_v19 = vld [vmem:[#allocation19 + $0x4b0] sm:$0xff] }
 0x3fc   :  { %4931 = vmatprep.subr.bf16.mxu0 %v4930_v25  ;;  %v2101_v25 = vld [vmem:[#allocation19 + $0x4d8] sm:$0xff]  ;;  %v4968_v27 = vpack.c.bf16 %v2096_v19, %v2092_v22  ;;  %v5004_v22 = vpack.c.bf16 %v2168_v16, %v2164_v15  ;;  %v1859_v15 = vld [vmem:[%s6678_s29 + $0x78] sm:$0xff] }
 0x3fd   :  { %v4970_v28 = vpack.c.bf16 %v2105_v26, %v2101_v25  ;;  %v2172_v25 = vld [vmem:[#allocation19 + $0x710] sm:$0xff] }
 0x3fe   :  { %v2176_v26 = vld [vmem:[#allocation19 + $0x730] sm:$0xff] }
 0x3ff   :  { %4933 = vmatpush1.bf16.msra.mxu0 %v4932_v29  ;;  %v2104_v29 = vld [vmem:[#allocation19 + $0x4f0] sm:$0xff] }
 0x400   :  { %4935 = vmatprep.subr.bf16.mxu0 %v4934_v31  ;;  %v2109_v31 = vld [vmem:[#allocation19 + $0x518] sm:$0xff]  ;;  %v4972_v34 = vpack.c.bf16 %v2104_v29, %v2100_v30  ;;  %v5008_v30 = vpack.c.bf16 %v2176_v26, %v2172_v25  ;;  %v1951_v25 = vld [vmem:[#allocation19 + $0x28] sm:$0xff]  ;;  %v2204_v26 = vld [vmem:[#allocation19 + $0x810] sm:$0xff] }
 0x401   :  { %v4974_v35 = vpack.c.bf16 %v2113_v32, %v2109_v31  ;;  %v2180_v31 = vld [vmem:[#allocation19 + $0x750] sm:$0xff] }
 0x402   :  { %v2184_v32 = vld [vmem:[#allocation19 + $0x770] sm:$0xff] }
 0x403   :  { %4937 = vmatpush1.bf16.msra.mxu0 %v4936_v37  ;;  %v2112_v37 = vld [vmem:[#allocation19 + $0x530] sm:$0xff] }
 0x404   :  { %4939 = vmatprep.subr.bf16.mxu0 %v4938_v38  ;;  %v2117_v38 = vld [vmem:[#allocation19 + $0x558] sm:$0xff]  ;;  %v4976_v40 = vpack.c.bf16 %v2112_v37, %v2108_v36  ;;  %v5012_v37 = vpack.c.bf16 %v2184_v32, %v2180_v31  ;;  %v5950_v32 = vmov 0.0  }
 0x405   :  { %v4978_v41 = vpack.c.bf16 %v2121_v39, %v2117_v38  ;;  %v1578_v36 = vld [vmem:[#allocation13] sm:$0x3]  ;;  %v2188_v39 = vld [vmem:[#allocation19 + $0x790] sm:$0xff] }
 0x407   :  { %4941 = vmatpush1.bf16.msra.mxu0 %v4940_v43  ;;  %v2120_v43 = vld [vmem:[#allocation19 + $0x570] sm:$0xff] }
 0x408   :  { %4943 = vmatprep.subr.bf16.mxu0 %v4942_v44  ;;  %v2125_v44 = vld [vmem:[#allocation19 + $0x598] sm:$0xff]  ;;  %v4980_v46 = vpack.c.bf16 %v2120_v43, %v2116_v42  ;;  %v1587_v42 = vrot.slane %v1578_v36, %v6383_v23 }
 0x409   :  { %v4982_v47 = vpack.c.bf16 %v2129_v45, %v2125_v44 }
 0x40b   :  { %4945 = vmatpush1.bf16.msra.mxu0 %v4944_v49  ;;  %v2128_v49 = vld [vmem:[#allocation19 + $0x5b0] sm:$0xff] }
 0x40c   :  { %4947 = vmatprep.subr.bf16.mxu0 %v4946_v50  ;;  %v2133_v50 = vld [vmem:[#allocation19 + $0x5d8] sm:$0xff]  ;;  %v4984_v52 = vpack.c.bf16 %v2128_v49, %v2124_v48 }
 0x40d   :  { %v4986_v53 = vpack.c.bf16 %v2137_v51, %v2133_v50  ;;  %v1845_v48 = vld [vmem:[%s6678_s29 + $0x8] sm:$0xff] }
 0x40f   :  { %4949 = vmatpush1.bf16.msra.mxu0 %v4948_v55  ;;  %v2136_v55 = vld [vmem:[#allocation19 + $0x5f0] sm:$0xff] }
 0x410   :  { %4951 = vmatprep.subr.bf16.mxu0 %v4950_v56  ;;  %v2141_v56 = vld [vmem:[#allocation19 + $0x618] sm:$0xff]  ;;  %v4988_v58 = vpack.c.bf16 %v2136_v55, %v2132_v54  ;;  %v1847_v54 = vld [vmem:[%s6678_s29 + $0x18] sm:$0xff] }
 0x411   :  { %v4990_v59 = vpack.c.bf16 %v2145_v57, %v2141_v56  ;;  %v1848_v56 = vld [vmem:[%s6678_s29 + $0x20] sm:$0xff]  ;;  %v1849_v57 = vld [vmem:[%s6678_s29 + $0x28] sm:$0xff] }
 0x413   :  { %4953 = vmatpush1.bf16.msra.mxu0 %v4952_v61  ;;  %v2144_v61 = vld [vmem:[#allocation19 + $0x630] sm:$0xff] }
 0x414   :  { %4955 = vmatprep.subr.bf16.mxu0 %v4954_v62  ;;  %v2149_v62 = vld [vmem:[#allocation19 + $0x658] sm:$0xff]  ;;  %v4992_v1 = vpack.c.bf16 %v2144_v61, %v2140_v60  ;;  %v1851_v60 = vld [vmem:[%s6678_s29 + $0x38] sm:$0xff] }
 0x415   :  { %v4994_v2 = vpack.c.bf16 %v2153_v0, %v2149_v62  ;;  %v1852_v62 = vld [vmem:[%s6678_s29 + $0x40] sm:$0xff]  ;;  %v1853_v0 = vld [vmem:[%s6678_s29 + $0x48] sm:$0xff] }
 0x417   :  { %4957 = vmatpush1.bf16.msra.mxu0 %v4956_v4  ;;  %v2152_v4 = vld [vmem:[#allocation19 + $0x670] sm:$0xff] }
 0x418   :  { %4959 = vmatprep.subr.bf16.mxu0 %v4958_v5  ;;  %v2157_v5 = vld [vmem:[#allocation19 + $0x698] sm:$0xff]  ;;  %v4996_v7 = vpack.c.bf16 %v2152_v4, %v2148_v3  ;;  %v1855_v3 = vld [vmem:[%s6678_s29 + $0x58] sm:$0xff] }
 0x419   :  { %v4998_v8 = vpack.c.bf16 %v2161_v6, %v2157_v5  ;;  %v1856_v5 = vld [vmem:[%s6678_s29 + $0x60] sm:$0xff]  ;;  %v1857_v6 = vld [vmem:[%s6678_s29 + $0x68] sm:$0xff] }
 0x41a   :  { %2829 = vmatmul.mubr.f32.vlgmr.msra.gmra.mrb[4].mxu0 %v1938_v10  ;;  %v2160_v10 = vld [vmem:[#allocation19 + $0x6b0] sm:$0xff] }
 0x41b   :  { %4961 = vmatpush1.bf16.msra.mxu0 %v4960_v11  ;;  %v2165_v11 = vld [vmem:[#allocation19 + $0x6d8] sm:$0xff]  ;;  %v5000_v13 = vpack.c.bf16 %v2160_v10, %v2156_v9 }
 0x41c   :  { %4963 = vmatprep.subr.bf16.mxu0 %v4962_v12  ;;  %v2169_v12 = vld [vmem:[#allocation19 + $0x6f8] sm:$0xff] }
 0x41d   :  { %v5002_v14 = vpack.c.bf16 %v2169_v12, %v2165_v11  ;;  %v2201_v9 = vld [vmem:[#allocation19 + $0x7f8] sm:$0xff]  ;;  %v2196_v11 = vld [vmem:[#allocation19 + $0x7d0] sm:$0xff] }
 0x41e   :  { %v2200_v12 = vld [vmem:[#allocation19 + $0x7f0] sm:$0xff] }
 0x41f   :  { %4965 = vmatpush1.bf16.msra.mxu0 %v4964_v17  ;;  %v2173_v17 = vld [vmem:[#allocation19 + $0x718] sm:$0xff] }
 0x420   :  { %4967 = vmatprep.subr.bf16.mxu0 %v4966_v18  ;;  %v2177_v18 = vld [vmem:[#allocation19 + $0x738] sm:$0xff] }
 0x421   :  { %v5006_v19 = vpack.c.bf16 %v2177_v18, %v2173_v17  ;;  %v2205_v17 = vld [vmem:[#allocation19 + $0x818] sm:$0xff] }
 0x422   :  { %v2209_v18 = vld [vmem:[#allocation19 + $0x838] sm:$0xff] }
 0x423   :  { %4969 = vmatpush1.bf16.msra.mxu0 %v4968_v27  ;;  %v2181_v27 = vld [vmem:[#allocation19 + $0x758] sm:$0xff] }
 0x424   :  { %4971 = vmatprep.subr.bf16.mxu0 %v4970_v28  ;;  %v2185_v28 = vld [vmem:[#allocation19 + $0x778] sm:$0xff] }
 0x425   :  { %v5010_v29 = vpack.c.bf16 %v2185_v28, %v2181_v27  ;;  %v6458_v27 = vld [vmem:[#allocation5 + $0x18] sm:$0xff] }
 0x426   :  { %2899 = vmatprep.mubr.f32.mxu0 %v6458_v27 }
 0x427   :  { %4973 = vmatpush1.bf16.msra.mxu0 %v4972_v34  ;;  %v2189_v34 = vld [vmem:[#allocation19 + $0x798] sm:$0xff] }
 0x428   :  { %4975 = vmatprep.subr.bf16.mxu0 %v4974_v35  ;;  %v2193_v35 = vld [vmem:[#allocation19 + $0x7b8] sm:$0xff] }
 0x429   :  { %v5014_v38 = vpack.c.bf16 %v2193_v35, %v2189_v34  ;;  %v2213_v34 = vld [vmem:[#allocation19 + $0x858] sm:$0xff] }
 0x42a   :  { %v2217_v35 = vld [vmem:[#allocation19 + $0x878] sm:$0xff] }
 0x42b   :  { %4977 = vmatpush1.bf16.msra.mxu0 %v4976_v40  ;;  %v2192_v40 = vld [vmem:[#allocation19 + $0x7b0] sm:$0xff] }
 0x42c   :  { %4979 = vmatprep.subr.bf16.mxu0 %v4978_v41  ;;  %v1583_v41 = vrot.slane %v1578_v36, %v6378_v21  ;;  %v5016_v43 = vpack.c.bf16 %v2192_v40, %v2188_v39  ;;  %v5026_v36 = vpack.c.bf16 %v2217_v35, %v2213_v34  ;;  %v2221_v40 = vld [vmem:[#allocation19 + $0x898] sm:$0xff]  ;;  %v2284_v35 = vld [vmem:[#allocation19 + $0xa90] sm:$0xff] }
 0x42f   :  { %4981 = vmatpush1.bf16.msra.mxu0 %v4980_v46 }
 0x430   :  { %4983 = vmatprep.subr.bf16.mxu0 %v4982_v47  ;;  %v1844_v47 = vld [vmem:[%s6678_s29] sm:$0xff] }
 0x431   :  { %v4615_v51 = vpack.c.bf16 %v1845_v48, %v1844_v47  ;;  %v2233_v47 = vld [vmem:[#allocation19 + $0x8f8] sm:$0xff] }
 0x433   :  { %4985 = vmatpush1.bf16.msra.mxu0 %v4984_v52 }
 0x434   :  { %4987 = vmatprep.subr.bf16.mxu0 %v4986_v53  ;;  %v1846_v53 = vld [vmem:[%s6678_s29 + $0x10] sm:$0xff] }
 0x435   :  { %v4618_v55 = vpack.c.bf16 %v1847_v54, %v1846_v53  ;;  %v2241_v53 = vld [vmem:[#allocation19 + $0x938] sm:$0xff] }
 0x437   :  { %4989 = vmatpush1.bf16.msra.mxu0 %v4988_v58  ;;  %v4621_v58 = vpack.c.bf16 %v1849_v57, %v1848_v56  ;;  %v2240_v56 = vld [vmem:[#allocation19 + $0x930] sm:$0xff] }
 0x438   :  { %4991 = vmatprep.subr.bf16.mxu0 %v4990_v59  ;;  %v1850_v59 = vld [vmem:[%s6678_s29 + $0x30] sm:$0xff] }
 0x439   :  { %v4624_v61 = vpack.c.bf16 %v1851_v60, %v1850_v59  ;;  %v2249_v59 = vld [vmem:[#allocation19 + $0x978] sm:$0xff] }
 0x43b   :  { %4993 = vmatpush1.bf16.msra.mxu0 %v4992_v1  ;;  %v4627_v1 = vpack.c.bf16 %v1853_v0, %v1852_v62  ;;  %v2248_v62 = vld [vmem:[#allocation19 + $0x970] sm:$0xff] }
 0x43c   :  { %4995 = vmatprep.subr.bf16.mxu0 %v4994_v2  ;;  %v1854_v2 = vld [vmem:[%s6678_s29 + $0x50] sm:$0xff] }
 0x43d   :  { %v4630_v4 = vpack.c.bf16 %v1855_v3, %v1854_v2  ;;  %v2257_v2 = vld [vmem:[#allocation19 + $0x9b8] sm:$0xff] }
 0x43f   :  { %4997 = vmatpush1.bf16.msra.mxu0 %v4996_v7  ;;  %v4633_v7 = vpack.c.bf16 %v1857_v6, %v1856_v5  ;;  %v2256_v5 = vld [vmem:[#allocation19 + $0x9b0] sm:$0xff] }
 0x440   :  { %4999 = vmatprep.subr.bf16.mxu0 %v4998_v8  ;;  %v2197_v8 = vld [vmem:[#allocation19 + $0x7d8] sm:$0xff] }
 0x441   :  { %v5018_v10 = vpack.c.bf16 %v2201_v9, %v2197_v8  ;;  %v2265_v8 = vld [vmem:[#allocation19 + $0x9f8] sm:$0xff] }
 0x443   :  { %5001 = vmatpush1.bf16.msra.mxu0 %v5000_v13  ;;  %v5020_v13 = vpack.c.bf16 %v2200_v12, %v2196_v11  ;;  %v2264_v11 = vld [vmem:[#allocation19 + $0x9f0] sm:$0xff] }
 0x444   :  { %5003 = vmatprep.subr.bf16.mxu0 %v5002_v14  ;;  %v1858_v14 = vld [vmem:[%s6678_s29 + $0x70] sm:$0xff] }
 0x445   :  { %v4636_v16 = vpack.c.bf16 %v1859_v15, %v1858_v14  ;;  %v2273_v14 = vld [vmem:[#allocation19 + $0xa38] sm:$0xff] }
 0x447   :  { %5005 = vmatpush1.bf16.msra.mxu0 %v5004_v22  ;;  %v5022_v22 = vpack.c.bf16 %v2209_v18, %v2205_v17  ;;  %v2272_v17 = vld [vmem:[#allocation19 + $0xa30] sm:$0xff] }
 0x448   :  { %5007 = vmatprep.subr.bf16.mxu0 %v5006_v19  ;;  %v1947_v19 = vld [vmem:[#allocation19 + $0x8] sm:$0xff] }
 0x449   :  { %v4638_v28 = vpack.c.bf16 %v1951_v25, %v1947_v19  ;;  %v2281_v19 = vld [vmem:[#allocation19 + $0xa78] sm:$0xff] }
 0x44b   :  { %5009 = vmatpush1.bf16.msra.mxu0 %v5008_v30  ;;  %v2208_v30 = vld [vmem:[#allocation19 + $0x830] sm:$0xff] }
 0x44c   :  { %5011 = vmatprep.subr.bf16.mxu0 %v5010_v29  ;;  %v1940_v29 = vld [vmem:[#allocation5 + $0x10] sm:$0xff]  ;;  %v5024_v31 = vpack.c.bf16 %v2208_v30, %v2204_v26  ;;  %v2276_v26 = vld [vmem:[#allocation19 + $0xa50] sm:$0xff] }
 0x44f   :  { %5013 = vmatpush1.bf16.msra.mxu0 %v5012_v37  ;;  %v2212_v37 = vld [vmem:[#allocation19 + $0x850] sm:$0xff] }
 0x450   :  { %5015 = vmatprep.subr.bf16.mxu0 %v5014_v38  ;;  %v2216_v38 = vld [vmem:[#allocation19 + $0x870] sm:$0xff] }
 0x451   :  { %v5028_v39 = vpack.c.bf16 %v2216_v38, %v2212_v37  ;;  %v2293_v38 = vld [vmem:[#allocation19 + $0xad8] sm:$0xff] }
 0x453   :  { %5017 = vmatpush1.bf16.msra.mxu0 %v5016_v43  ;;  %v2220_v43 = vld [vmem:[#allocation19 + $0x890] sm:$0xff] }
 0x454   :  { %5019 = vmatprep.subr.bf16.mxu0 %v5018_v10  ;;  %v2260_v10 = vld [vmem:[#allocation19 + $0x9d0] sm:$0xff] }
 0x455   :  { %v5052_v12 = vpack.c.bf16 %v2264_v11, %v2260_v10  ;;  %v2332_v10 = vld [vmem:[#allocation19 + $0xc10] sm:$0xff] }
 0x456   :  { %v2336_v11 = vld [vmem:[#allocation19 + $0xc30] sm:$0xff] }
 0x457   :  { %5021 = vmatpush1.bf16.msra.mxu0 %v5020_v13  ;;  %v2269_v13 = vld [vmem:[#allocation19 + $0xa18] sm:$0xff] }
 0x458   :  { %5023 = vmatprep.subr.bf16.mxu0 %v5022_v22  ;;  %v5054_v15 = vpack.c.bf16 %v2273_v14, %v2269_v13  ;;  %v2277_v22 = vld [vmem:[#allocation19 + $0xa58] sm:$0xff] }
 0x459   :  { %v5058_v25 = vpack.c.bf16 %v2281_v19, %v2277_v22  ;;  %v2341_v13 = vld [vmem:[#allocation19 + $0xc58] sm:$0xff] }
 0x45a   :  { %2900 = vmatmul.mubr.f32.vlgmr.msra.gmra.mrb[4].mxu0 %v1940_v29  ;;  %v2285_v29 = vld [vmem:[#allocation19 + $0xa98] sm:$0xff] }
 0x45b   :  { %5025 = vmatpush1.bf16.msra.mxu0 %v5024_v31  ;;  %v2289_v31 = vld [vmem:[#allocation19 + $0xab8] sm:$0xff] }
 0x45c   :  { %5027 = vmatprep.subr.bf16.mxu0 %v5026_v36  ;;  %v5062_v34 = vpack.c.bf16 %v2289_v31, %v2285_v29  ;;  %v2288_v36 = vld [vmem:[#allocation19 + $0xab0] sm:$0xff]  ;;  %v2345_v14 = vld [vmem:[#allocation19 + $0xc78] sm:$0xff] }
 0x45d   :  { %v5064_v37 = vpack.c.bf16 %v2288_v36, %v2284_v35  ;;  %v2349_v22 = vld [vmem:[#allocation19 + $0xc98] sm:$0xff]  ;;  %v2356_v35 = vld [vmem:[#allocation19 + $0xcd0] sm:$0xff] }
 0x45e   :  { %v2353_v19 = vld [vmem:[#allocation19 + $0xcb8] sm:$0xff]  ;;  %v2360_v36 = vld [vmem:[#allocation19 + $0xcf0] sm:$0xff] }
 0x45f   :  { %5029 = vmatpush1.bf16.msra.mxu0 %v5028_v39  ;;  %v2297_v39 = vld [vmem:[#allocation19 + $0xaf8] sm:$0xff] }
 0x460   :  { %v2357_v29 = vld [vmem:[#allocation19 + $0xcd8] sm:$0xff] }
 0x461   :  { %v2361_v31 = vld [vmem:[#allocation19 + $0xcf8] sm:$0xff] }
 0x4ad   :  { %v1727_v44 = vpop.f32.mrb[2].mxu0 }
 0x4ae   :  { %v5362_v45 = vadd.f32 %v1727_v44, %v1583_v41  ;;  %v1729_v46 = vpop.f32.mrb[3].mxu0  ;;  %v2225_v41 = vld [vmem:[#allocation19 + $0x8b8] sm:$0xff]  ;;  %v2224_v44 = vld [vmem:[#allocation19 + $0x8b0] sm:$0xff] }
 0x4af   :  { %v5363_v49 = vadd.f32 %v1729_v46, %v1587_v42  ;;  %v5030_v42 = vpack.c.bf16 %v2225_v41, %v2221_v40  ;;  %v2229_v46 = vld [vmem:[#allocation19 + $0x8d8] sm:$0xff]  ;;  %v5066_v40 = vpack.c.bf16 %v2297_v39, %v2293_v38  ;;  %v2292_v41 = vld [vmem:[#allocation19 + $0xad0] sm:$0xff] }
 0x4b0   :  { %v1732_v52 = vmax.f32 %v5362_v45, 0.0  ;;  %v5032_v45 = vpack.c.bf16 %v2224_v44, %v2220_v43  ;;  %v5034_v48 = vpack.c.bf16 %v2233_v47, %v2229_v46  ;;  %v2301_v44 = vld [vmem:[#allocation19 + $0xb18] sm:$0xff]  ;;  %v2300_v47 = vld [vmem:[#allocation19 + $0xb10] sm:$0xff] }
 0x4b1   :  { %v1733_v50 = vmax.f32 %v5363_v49, 0.0  ;;  %5031 = vmatprep.subr.bf16.mxu0 %v5030_v42  ;;  %v2228_v49 = vld [vmem:[#allocation19 + $0x8d0] sm:$0xff]  ;;  %v2365_v38 = vld [vmem:[#allocation19 + $0xd18] sm:$0xff] }
 0x4b2   :  { %5033 = vmatpush1.bf16.msra.mxu0 %v5032_v45  ;;  %v2296_v42 = vld [vmem:[#allocation19 + $0xaf0] sm:$0xff]  ;;  %v2305_v45 = vld [vmem:[#allocation19 + $0xb38] sm:$0xff] }
 0x4b3   :  { %1837 = vmatprep.mubr.f32.mxu1 %v1733_v50  ;;  %v2232_v50 = vld [vmem:[#allocation19 + $0x8f0] sm:$0xff]  ;;  %5035 = vmatprep.subr.bf16.mxu0 %v5034_v48  ;;  %v5068_v43 = vpack.c.bf16 %v2296_v42, %v2292_v41  ;;  %v5070_v46 = vpack.c.bf16 %v2305_v45, %v2301_v44  ;;  %v2369_v39 = vld [vmem:[#allocation19 + $0xd38] sm:$0xff] }
 0x4b4   :  { %1838 = vmatmul.mubr.f32.vlgmr.msra.gmra.mrb[2].mxu1 %v1732_v52  ;;  %v2237_v52 = vld [vmem:[#allocation19 + $0x918] sm:$0xff]  ;;  %v2304_v48 = vld [vmem:[#allocation19 + $0xb30] sm:$0xff] }
 0x4b5   :  { %4616 = vmatpush3.bf16.msra.mxu1 %v4615_v51  ;;  %3869 = vmatprep.mubr.msk.f32.mxu1 %vm5949_vm0, %v5950_v32  ;;  %v5036_v51 = vpack.c.bf16 %v2232_v50, %v2228_v49  ;;  %v5038_v54 = vpack.c.bf16 %v2241_v53, %v2237_v52  ;;  %v5072_v49 = vpack.c.bf16 %v2304_v48, %v2300_v47  ;;  %v2309_v50 = vld [vmem:[#allocation19 + $0xb58] sm:$0xff]  ;;  %v2308_v53 = vld [vmem:[#allocation19 + $0xb50] sm:$0xff] }
 0x4b6   :  { %4617 = vmatprep.subr.bf16.mxu1 %v5948_v33  ;;  %v2364_v41 = vld [vmem:[#allocation19 + $0xd10] sm:$0xff]  ;;  %v2373_v44 = vld [vmem:[#allocation19 + $0xd58] sm:$0xff] }
 0x4b7   :  { %5037 = vmatpush1.bf16.msra.mxu0 %v5036_v51  ;;  %v2313_v51 = vld [vmem:[#allocation19 + $0xb78] sm:$0xff]  ;;  %v2368_v42 = vld [vmem:[#allocation19 + $0xd30] sm:$0xff] }
 0x4b8   :  { %5039 = vmatprep.subr.bf16.mxu0 %v5038_v54  ;;  %v5074_v52 = vpack.c.bf16 %v2313_v51, %v2309_v50  ;;  %v2312_v54 = vld [vmem:[#allocation19 + $0xb70] sm:$0xff]  ;;  %v2377_v45 = vld [vmem:[#allocation19 + $0xd78] sm:$0xff] }
 0x4b9   :  { %4619 = vmatpush3.bf16.msra.mxu1 %v4618_v55  ;;  %v2236_v55 = vld [vmem:[#allocation19 + $0x910] sm:$0xff]  ;;  %v2381_v50 = vld [vmem:[#allocation19 + $0xd98] sm:$0xff] }
 0x4ba   :  { %4620 = vmatprep.subr.bf16.mxu1 %v5948_v33  ;;  %v5040_v57 = vpack.c.bf16 %v2240_v56, %v2236_v55  ;;  %v5076_v55 = vpack.c.bf16 %v2312_v54, %v2308_v53  ;;  %v2317_v56 = vld [vmem:[#allocation19 + $0xb98] sm:$0xff]  ;;  %v2372_v47 = vld [vmem:[#allocation19 + $0xd50] sm:$0xff] }
 0x4bb   :  { %v2376_v48 = vld [vmem:[#allocation19 + $0xd70] sm:$0xff]  ;;  %v2385_v51 = vld [vmem:[#allocation19 + $0xdb8] sm:$0xff] }
 0x4bc   :  { %5041 = vmatpush1.bf16.msra.mxu0 %v5040_v57  ;;  %v2321_v57 = vld [vmem:[#allocation19 + $0xbb8] sm:$0xff]  ;;  %v2380_v53 = vld [vmem:[#allocation19 + $0xd90] sm:$0xff] }
 0x4bd   :  { %4622 = vmatpush3.bf16.msra.mxu1 %v4621_v58  ;;  %v2245_v58 = vld [vmem:[#allocation19 + $0x958] sm:$0xff]  ;;  %v2384_v54 = vld [vmem:[#allocation19 + $0xdb0] sm:$0xff] }
 0x4be   :  { %4623 = vmatprep.subr.bf16.mxu1 %v5948_v33  ;;  %v5042_v60 = vpack.c.bf16 %v2249_v59, %v2245_v58  ;;  %v5078_v58 = vpack.c.bf16 %v2321_v57, %v2317_v56  ;;  %v2316_v59 = vld [vmem:[#allocation19 + $0xb90] sm:$0xff]  ;;  %v2389_v56 = vld [vmem:[#allocation19 + $0xdd8] sm:$0xff] }
 0x4bf   :  { %v2393_v57 = vld [vmem:[#allocation19 + $0xdf8] sm:$0xff] }
 0x4c0   :  { %5043 = vmatprep.subr.bf16.mxu0 %v5042_v60  ;;  %v2320_v60 = vld [vmem:[#allocation19 + $0xbb0] sm:$0xff] }
 0x4c1   :  { %4625 = vmatpush3.bf16.msra.mxu1 %v4624_v61  ;;  %v2244_v61 = vld [vmem:[#allocation19 + $0x950] sm:$0xff] }
 0x4c2   :  { %4626 = vmatprep.subr.bf16.mxu1 %v5948_v33  ;;  %v5044_v0 = vpack.c.bf16 %v2248_v62, %v2244_v61  ;;  %v5080_v61 = vpack.c.bf16 %v2320_v60, %v2316_v59  ;;  %v2325_v62 = vld [vmem:[#allocation19 + $0xbd8] sm:$0xff]  ;;  %v2388_v59 = vld [vmem:[#allocation19 + $0xdd0] sm:$0xff] }
 0x4c3   :  { %v2392_v60 = vld [vmem:[#allocation19 + $0xdf0] sm:$0xff] }
 0x4c4   :  { %5045 = vmatpush1.bf16.msra.mxu0 %v5044_v0  ;;  %v2329_v0 = vld [vmem:[#allocation19 + $0xbf8] sm:$0xff] }
 0x4c5   :  { %4628 = vmatpush3.bf16.msra.mxu1 %v4627_v1  ;;  %v2253_v1 = vld [vmem:[#allocation19 + $0x998] sm:$0xff] }
 0x4c6   :  { %4629 = vmatprep.subr.bf16.mxu1 %v5948_v33  ;;  %v5046_v3 = vpack.c.bf16 %v2257_v2, %v2253_v1  ;;  %v5082_v1 = vpack.c.bf16 %v2329_v0, %v2325_v62  ;;  %v2324_v2 = vld [vmem:[#allocation19 + $0xbd0] sm:$0xff]  ;;  %v2397_v62 = vld [vmem:[#allocation19 + $0xe18] sm:$0xff] }
 0x4c7   :  { %v2401_v0 = vld [vmem:[#allocation19 + $0xe38] sm:$0xff] }
 0x4c8   :  { %5047 = vmatprep.subr.bf16.mxu0 %v5046_v3  ;;  %v2328_v3 = vld [vmem:[#allocation19 + $0xbf0] sm:$0xff] }
 0x4c9   :  { %4631 = vmatpush3.bf16.msra.mxu1 %v4630_v4  ;;  %v2252_v4 = vld [vmem:[#allocation19 + $0x990] sm:$0xff] }
 0x4ca   :  { %4632 = vmatprep.subr.bf16.mxu1 %v5948_v33  ;;  %v5048_v6 = vpack.c.bf16 %v2256_v5, %v2252_v4  ;;  %v5084_v4 = vpack.c.bf16 %v2328_v3, %v2324_v2  ;;  %v2333_v5 = vld [vmem:[#allocation19 + $0xc18] sm:$0xff]  ;;  %v2396_v2 = vld [vmem:[#allocation19 + $0xe10] sm:$0xff] }
 0x4cb   :  { %v2400_v3 = vld [vmem:[#allocation19 + $0xe30] sm:$0xff] }
 0x4cc   :  { %5049 = vmatpush1.bf16.msra.mxu0 %v5048_v6  ;;  %v2337_v6 = vld [vmem:[#allocation19 + $0xc38] sm:$0xff] }
 0x4cd   :  { %4634 = vmatpush3.bf16.msra.mxu1 %v4633_v7  ;;  %v2261_v7 = vld [vmem:[#allocation19 + $0x9d8] sm:$0xff] }
 0x4ce   :  { %4635 = vmatprep.subr.bf16.mxu1 %v5948_v33  ;;  %v5050_v9 = vpack.c.bf16 %v2265_v8, %v2261_v7  ;;  %v6463_v7 = vld [vmem:[#allocation5 + $0x28] sm:$0xff]  ;;  %v5086_v8 = vpack.c.bf16 %v2337_v6, %v2333_v5 }
 0x4cf   :  { %2970 = vmatprep.mubr.f32.mxu0 %v6463_v7  ;;  %v2405_v5 = vld [vmem:[#allocation19 + $0xe58] sm:$0xff] }
 0x4d0   :  { %5051 = vmatprep.subr.bf16.mxu0 %v5050_v9  ;;  %v1942_v9 = vld [vmem:[#allocation5 + $0x20] sm:$0xff]  ;;  %v2409_v6 = vld [vmem:[#allocation19 + $0xe78] sm:$0xff] }
 0x4d1   :  { %4637 = vmatpush3.bf16.msra.mxu1 %v4636_v16  ;;  %5053 = vmatpush1.bf16.msra.mxu0 %v5052_v12  ;;  %v2268_v16 = vld [vmem:[#allocation19 + $0xa10] sm:$0xff]  ;;  %v5088_v12 = vpack.c.bf16 %v2336_v11, %v2332_v10 }
 0x4d2   :  { %4639 = vmatprep.subr.bf16.mxu1 %v4638_v28  ;;  %5055 = vmatprep.subr.bf16.mxu0 %v5054_v15  ;;  %v5056_v18 = vpack.c.bf16 %v2272_v17, %v2268_v16  ;;  %v2280_v28 = vld [vmem:[#allocation19 + $0xa70] sm:$0xff]  ;;  %v5090_v15 = vpack.c.bf16 %v2345_v14, %v2341_v13  ;;  %v2417_v13 = vld [vmem:[#allocation19 + $0xeb8] sm:$0xff] }
 0x4d3   :  { %v5060_v30 = vpack.c.bf16 %v2280_v28, %v2276_v26  ;;  %v2340_v16 = vld [vmem:[#allocation19 + $0xc50] sm:$0xff] }
 0x4d4   :  { %v2344_v17 = vld [vmem:[#allocation19 + $0xc70] sm:$0xff] }
 0x4d5   :  { %5057 = vmatpush1.bf16.msra.mxu0 %v5056_v18  ;;  %v5092_v18 = vpack.c.bf16 %v2344_v17, %v2340_v16  ;;  %v2348_v26 = vld [vmem:[#allocation19 + $0xc90] sm:$0xff] }
 0x4d6   :  { %5059 = vmatprep.subr.bf16.mxu0 %v5058_v25  ;;  %v5094_v25 = vpack.c.bf16 %v2353_v19, %v2349_v22  ;;  %v2352_v28 = vld [vmem:[#allocation19 + $0xcb0] sm:$0xff]  ;;  %v2425_v22 = vld [vmem:[#allocation19 + $0xef8] sm:$0xff] }
 0x4d7   :  { %v2408_v10 = vld [vmem:[#allocation19 + $0xe70] sm:$0xff] }
 0x4d8   :  { %v2416_v16 = vld [vmem:[#allocation19 + $0xeb0] sm:$0xff] }
 0x4d9   :  { %5061 = vmatpush1.bf16.msra.mxu0 %v5060_v30  ;;  %v5096_v30 = vpack.c.bf16 %v2352_v28, %v2348_v26  ;;  %v2424_v26 = vld [vmem:[#allocation19 + $0xef0] sm:$0xff] }
 0x4da   :  { %5063 = vmatprep.subr.bf16.mxu0 %v5062_v34  ;;  %v5098_v34 = vpack.c.bf16 %v2361_v31, %v2357_v29  ;;  %v2433_v29 = vld [vmem:[#allocation19 + $0xf38] sm:$0xff] }
 0x4dd   :  { %5065 = vmatpush1.bf16.msra.mxu0 %v5064_v37  ;;  %v5100_v37 = vpack.c.bf16 %v2360_v36, %v2356_v35  ;;  %v2432_v35 = vld [vmem:[#allocation19 + $0xf30] sm:$0xff] }
 0x4de   :  { %5067 = vmatprep.subr.bf16.mxu0 %v5066_v40  ;;  %v5102_v40 = vpack.c.bf16 %v2369_v39, %v2365_v38  ;;  %v2441_v38 = vld [vmem:[#allocation19 + $0xf78] sm:$0xff] }
 0x4e1   :  { %5069 = vmatpush1.bf16.msra.mxu0 %v5068_v43  ;;  %v5104_v43 = vpack.c.bf16 %v2368_v42, %v2364_v41  ;;  %v2440_v41 = vld [vmem:[#allocation19 + $0xf70] sm:$0xff] }
 0x4e2   :  { %5071 = vmatprep.subr.bf16.mxu0 %v5070_v46  ;;  %v5106_v46 = vpack.c.bf16 %v2377_v45, %v2373_v44  ;;  %v2449_v44 = vld [vmem:[#allocation19 + $0xfb8] sm:$0xff] }
 0x4e5   :  { %5073 = vmatpush1.bf16.msra.mxu0 %v5072_v49  ;;  %v5108_v49 = vpack.c.bf16 %v2376_v48, %v2372_v47  ;;  %v2448_v47 = vld [vmem:[#allocation19 + $0xfb0] sm:$0xff] }
 0x4e6   :  { %5075 = vmatprep.subr.bf16.mxu0 %v5074_v52  ;;  %v5110_v52 = vpack.c.bf16 %v2385_v51, %v2381_v50  ;;  %v2453_v50 = vld [vmem:[#allocation19 + $0xfd8] sm:$0xff] }
 0x4e7   :  { %v2457_v51 = vld [vmem:[#allocation19 + $0xff8] sm:$0xff] }
 0x4e9   :  { %5077 = vmatpush1.bf16.msra.mxu0 %v5076_v55  ;;  %v5112_v55 = vpack.c.bf16 %v2384_v54, %v2380_v53  ;;  %v5146_v54 = vpack.c.bf16 %v2457_v51, %v2453_v50  ;;  %v2002_v51 = vld [vmem:[#allocation19 + $0x1c0] sm:$0xff] }
 0x4ea   :  { %5079 = vmatprep.subr.bf16.mxu0 %v5078_v58  ;;  %v5114_v58 = vpack.c.bf16 %v2393_v57, %v2389_v56  ;;  %v1946_v57 = vld [vmem:[#allocation19] sm:$0xff] }
 0x4ed   :  { %5081 = vmatpush1.bf16.msra.mxu0 %v5080_v61  ;;  %v5116_v61 = vpack.c.bf16 %v2392_v60, %v2388_v59  ;;  %v2456_v59 = vld [vmem:[#allocation19 + $0xff0] sm:$0xff]  ;;  %v1955_v60 = vld [vmem:[#allocation19 + $0x48] sm:$0xff] }
 0x4ee   :  { %5083 = vmatprep.subr.bf16.mxu0 %v5082_v1  ;;  %v5118_v1 = vpack.c.bf16 %v2401_v0, %v2397_v62 }
 0x4f1   :  { %5085 = vmatpush1.bf16.msra.mxu0 %v5084_v4  ;;  %v5120_v4 = vpack.c.bf16 %v2400_v3, %v2396_v2  ;;  %v6466_v2 = vld [vmem:[#allocation5 + $0x38] sm:$0xff]  ;;  %v1944_v3 = vld [vmem:[#allocation5 + $0x30] sm:$0xff] }
 0x4f2   :  { %5087 = vmatprep.subr.bf16.mxu0 %v5086_v8  ;;  %v5122_v8 = vpack.c.bf16 %v2409_v6, %v2405_v5  ;;  %v1954_v6 = vld [vmem:[#allocation19 + $0x40] sm:$0xff] }
 0x4f4   :  { %2971 = vmatmul.mubr.f32.vlgmr.msra.gmra.mrb[4].mxu0 %v1942_v9  ;;  %v2404_v9 = vld [vmem:[#allocation19 + $0xe50] sm:$0xff] }
 0x4f5   :  { %5089 = vmatpush1.bf16.msra.mxu0 %v5088_v12  ;;  %v5124_v11 = vpack.c.bf16 %v2408_v10, %v2404_v9  ;;  %v2413_v12 = vld [vmem:[#allocation19 + $0xe98] sm:$0xff]  ;;  %3041 = vmatprep.mubr.f32.mxu0 %v6466_v2  ;;  %v1963_v9 = vld [vmem:[#allocation19 + $0x88] sm:$0xff] }
 0x4f6   :  { %5091 = vmatprep.subr.bf16.mxu0 %v5090_v15  ;;  %v5126_v14 = vpack.c.bf16 %v2417_v13, %v2413_v12  ;;  %v2412_v15 = vld [vmem:[#allocation19 + $0xe90] sm:$0xff]  ;;  %v1967_v10 = vld [vmem:[#allocation19 + $0xa8] sm:$0xff] }
 0x4f7   :  { %v5128_v17 = vpack.c.bf16 %v2416_v16, %v2412_v15  ;;  %v5432_v12 = vld [vmem:[#allocation5 + $0x8] sm:$0xff]  ;;  %v4646_v13 = vpack.c.bf16 %v1967_v10, %v1963_v9  ;;  %v1966_v15 = vld [vmem:[#allocation19 + $0xa0] sm:$0xff]  ;;  %v1971_v16 = vld [vmem:[#allocation19 + $0xc8] sm:$0xff] }
 0x4f8   :  { %v2030_v9 = vld [vmem:[#allocation19 + $0x2a0] sm:$0xff]  ;;  %v2035_v10 = vld [vmem:[#allocation19 + $0x2c8] sm:$0xff] }
 0x4f9   :  { %5093 = vmatpush1.bf16.msra.mxu0 %v5092_v18  ;;  %v2421_v18 = vld [vmem:[#allocation19 + $0xed8] sm:$0xff] }
 0x4fa   :  { %5095 = vmatprep.subr.bf16.mxu0 %v5094_v25  ;;  %v5130_v19 = vpack.c.bf16 %v2425_v22, %v2421_v18  ;;  %v2420_v25 = vld [vmem:[#allocation19 + $0xed0] sm:$0xff] }
 0x4fb   :  { %v5132_v28 = vpack.c.bf16 %v2424_v26, %v2420_v25  ;;  %v1974_v25 = vld [vmem:[#allocation19 + $0xe0] sm:$0xff]  ;;  %v1979_v26 = vld [vmem:[#allocation19 + $0x108] sm:$0xff] }
 0x4fd   :  { %5097 = vmatpush1.bf16.msra.mxu0 %v5096_v30  ;;  %v2429_v30 = vld [vmem:[#allocation19 + $0xf18] sm:$0xff] }
 0x4fe   :  { %5099 = vmatprep.subr.bf16.mxu0 %v5098_v34  ;;  %v5134_v31 = vpack.c.bf16 %v2433_v29, %v2429_v30  ;;  %v2428_v34 = vld [vmem:[#allocation19 + $0xf10] sm:$0xff] }
 0x4ff   :  { %v5136_v36 = vpack.c.bf16 %v2432_v35, %v2428_v34  ;;  %v1982_v34 = vld [vmem:[#allocation19 + $0x120] sm:$0xff]  ;;  %v1987_v35 = vld [vmem:[#allocation19 + $0x148] sm:$0xff] }
 0x501   :  { %5101 = vmatpush1.bf16.msra.mxu0 %v5100_v37  ;;  %v2437_v37 = vld [vmem:[#allocation19 + $0xf58] sm:$0xff] }
 0x502   :  { %5103 = vmatprep.subr.bf16.mxu0 %v5102_v40  ;;  %v5138_v39 = vpack.c.bf16 %v2441_v38, %v2437_v37  ;;  %v2436_v40 = vld [vmem:[#allocation19 + $0xf50] sm:$0xff] }
 0x503   :  { %v5140_v42 = vpack.c.bf16 %v2440_v41, %v2436_v40  ;;  %v1990_v40 = vld [vmem:[#allocation19 + $0x160] sm:$0xff]  ;;  %v1995_v41 = vld [vmem:[#allocation19 + $0x188] sm:$0xff] }
 0x505   :  { %5105 = vmatpush1.bf16.msra.mxu0 %v5104_v43  ;;  %v2445_v43 = vld [vmem:[#allocation19 + $0xf98] sm:$0xff] }
 0x506   :  { %5107 = vmatprep.subr.bf16.mxu0 %v5106_v46  ;;  %v5142_v45 = vpack.c.bf16 %v2449_v44, %v2445_v43  ;;  %v2444_v46 = vld [vmem:[#allocation19 + $0xf90] sm:$0xff] }
 0x507   :  { %v5144_v48 = vpack.c.bf16 %v2448_v47, %v2444_v46  ;;  %v1998_v46 = vld [vmem:[#allocation19 + $0x1a0] sm:$0xff]  ;;  %v2003_v47 = vld [vmem:[#allocation19 + $0x1c8] sm:$0xff] }
 0x509   :  { %5109 = vmatpush1.bf16.msra.mxu0 %v5108_v49 }
 0x50a   :  { %5111 = vmatprep.subr.bf16.mxu0 %v5110_v52  ;;  %v3707_v52 = vld [vmem:[#allocation16] ss:$0 sm:$0xff] }
 0x50d   :  { %5113 = vmatpush1.bf16.msra.mxu0 %v5112_v55  ;;  %v2452_v55 = vld [vmem:[#allocation19 + $0xfd0] sm:$0xff] }
 0x50e   :  { %5115 = vmatprep.subr.bf16.mxu0 %v5114_v58  ;;  %v1950_v58 = vld [vmem:[#allocation19 + $0x20] sm:$0xff]  ;;  %v5148_v62 = vpack.c.bf16 %v2456_v59, %v2452_v55  ;;  %v2019_v59 = vld [vmem:[#allocation19 + $0x248] sm:$0xff] }
 0x511   :  { %5117 = vmatpush1.bf16.msra.mxu0 %v5116_v61  ;;  %v1959_v61 = vld [vmem:[#allocation19 + $0x68] sm:$0xff] }
 0x512   :  { %5119 = vmatprep.subr.bf16.mxu0 %v5118_v1  ;;  %v4640_v1 = vpack.c.bf16 %v1950_v58, %v1946_v57  ;;  %v4642_v5 = vpack.c.bf16 %v1959_v61, %v1955_v60  ;;  %v2010_v57 = vld [vmem:[#allocation19 + $0x200] sm:$0xff]  ;;  %v2023_v60 = vld [vmem:[#allocation19 + $0x268] sm:$0xff] }
 0x513   :  { %v2014_v58 = vld [vmem:[#allocation19 + $0x220] sm:$0xff] }
 0x514   :  { %v4672_v61 = vpack.c.bf16 %v2014_v58, %v2010_v57  ;;  %v2082_v57 = vld [vmem:[#allocation19 + $0x440] sm:$0xff] }
 0x515   :  { %5121 = vmatpush1.bf16.msra.mxu0 %v5120_v4  ;;  %v2086_v58 = vld [vmem:[#allocation19 + $0x460] sm:$0xff] }
 0x516   :  { %5123 = vmatprep.subr.bf16.mxu0 %v5122_v8  ;;  %v1958_v8 = vld [vmem:[#allocation19 + $0x60] sm:$0xff] }
 0x519   :  { %5125 = vmatpush1.bf16.msra.mxu0 %v5124_v11  ;;  %v4644_v11 = vpack.c.bf16 %v1958_v8, %v1954_v6  ;;  %v2026_v8 = vld [vmem:[#allocation19 + $0x280] sm:$0xff] }
 0x51a   :  { %5127 = vmatprep.subr.bf16.mxu0 %v5126_v14  ;;  %v1962_v14 = vld [vmem:[#allocation19 + $0x80] sm:$0xff] }
 0x51b   :  { %v4648_v18 = vpack.c.bf16 %v1966_v15, %v1962_v14  ;;  %v2034_v14 = vld [vmem:[#allocation19 + $0x2c0] sm:$0xff] }
 0x51c   :  { %v2038_v15 = vld [vmem:[#allocation19 + $0x2e0] sm:$0xff] }
 0x51d   :  { %5129 = vmatpush1.bf16.msra.mxu0 %v5128_v17  ;;  %v1975_v17 = vld [vmem:[#allocation19 + $0xe8] sm:$0xff] }
 0x51e   :  { %5131 = vmatprep.subr.bf16.mxu0 %v5130_v19  ;;  %v4650_v22 = vpack.c.bf16 %v1975_v17, %v1971_v16  ;;  %v1970_v19 = vld [vmem:[#allocation19 + $0xc0] sm:$0xff]  ;;  %v2043_v16 = vld [vmem:[#allocation19 + $0x308] sm:$0xff] }
 0x51f   :  { %v4652_v30 = vpack.c.bf16 %v1974_v25, %v1970_v19  ;;  %v2047_v17 = vld [vmem:[#allocation19 + $0x328] sm:$0xff]  ;;  %v2042_v19 = vld [vmem:[#allocation19 + $0x300] sm:$0xff] }
 0x520   :  { %v2046_v25 = vld [vmem:[#allocation19 + $0x320] sm:$0xff] }
 0x521   :  { %5133 = vmatpush1.bf16.msra.mxu0 %v5132_v28  ;;  %v1983_v28 = vld [vmem:[#allocation19 + $0x128] sm:$0xff] }
 0x522   :  { %5135 = vmatprep.subr.bf16.mxu0 %v5134_v31  ;;  %v4654_v29 = vpack.c.bf16 %v1983_v28, %v1979_v26  ;;  %v1978_v31 = vld [vmem:[#allocation19 + $0x100] sm:$0xff]  ;;  %v2051_v26 = vld [vmem:[#allocation19 + $0x348] sm:$0xff] }
 0x523   :  { %v4656_v37 = vpack.c.bf16 %v1982_v34, %v1978_v31  ;;  %v2055_v28 = vld [vmem:[#allocation19 + $0x368] sm:$0xff]  ;;  %v2050_v31 = vld [vmem:[#allocation19 + $0x340] sm:$0xff] }
 0x524   :  { %v2054_v34 = vld [vmem:[#allocation19 + $0x360] sm:$0xff] }
 0x525   :  { %5137 = vmatpush1.bf16.msra.mxu0 %v5136_v36  ;;  %v1991_v36 = vld [vmem:[#allocation19 + $0x168] sm:$0xff] }
 0x526   :  { %5139 = vmatprep.subr.bf16.mxu0 %v5138_v39  ;;  %v4658_v38 = vpack.c.bf16 %v1991_v36, %v1987_v35  ;;  %v1986_v39 = vld [vmem:[#allocation19 + $0x140] sm:$0xff]  ;;  %v2059_v35 = vld [vmem:[#allocation19 + $0x388] sm:$0xff] }
 0x527   :  { %v4660_v43 = vpack.c.bf16 %v1990_v40, %v1986_v39  ;;  %v2063_v36 = vld [vmem:[#allocation19 + $0x3a8] sm:$0xff]  ;;  %v2058_v39 = vld [vmem:[#allocation19 + $0x380] sm:$0xff] }
 0x528   :  { %v2062_v40 = vld [vmem:[#allocation19 + $0x3a0] sm:$0xff] }
 0x529   :  { %5141 = vmatpush1.bf16.msra.mxu0 %v5140_v42  ;;  %v1999_v42 = vld [vmem:[#allocation19 + $0x1a8] sm:$0xff] }
 0x52a   :  { %5143 = vmatprep.subr.bf16.mxu0 %v5142_v45  ;;  %v4662_v44 = vpack.c.bf16 %v1999_v42, %v1995_v41  ;;  %v1994_v45 = vld [vmem:[#allocation19 + $0x180] sm:$0xff]  ;;  %v2067_v41 = vld [vmem:[#allocation19 + $0x3c8] sm:$0xff] }
 0x52b   :  { %v2071_v42 = vld [vmem:[#allocation19 + $0x3e8] sm:$0xff] }
 0x52d   :  { %5145 = vmatpush1.bf16.msra.mxu0 %v5144_v48  ;;  %v2007_v48 = vld [vmem:[#allocation19 + $0x1e8] sm:$0xff] }
 0x52e   :  { %5147 = vmatprep.subr.bf16.mxu0 %v5146_v54  ;;  %v4666_v50 = vpack.c.bf16 %v2007_v48, %v2003_v47  ;;  %v2015_v54 = vld [vmem:[#allocation19 + $0x228] sm:$0xff] }
 0x52f   :  { %v2075_v47 = vld [vmem:[#allocation19 + $0x408] sm:$0xff] }
 0x530   :  { %v2079_v48 = vld [vmem:[#allocation19 + $0x428] sm:$0xff] }
 0x531   :  { %5149 = vmatpush1.bf16.msra.mxu0 %v5148_v62  ;;  %v4674_v62 = vpack.c.bf16 %v2023_v60, %v2019_v59  ;;  %v2091_v59 = vld [vmem:[#allocation19 + $0x488] sm:$0xff] }
 0x532   :  { %v2095_v60 = vld [vmem:[#allocation19 + $0x4a8] sm:$0xff] }
 0x534   :  { %3042 = vmatmul.mubr.f32.vlgmr.msra.gmra.mrb[4].mxu0 %v1944_v3  ;;  %v2027_v3 = vld [vmem:[#allocation19 + $0x288] sm:$0xff] }
 0x587   :  { %v3748_v49 = vpop.f32.mrb[2].mxu1 }
 0x588   :  { %v3749_v53 = vpop.f32.mrb[3].mxu1 }
 0x589   :  { %v3750_v56 = vadd.f32 %v3749_v53, %v3748_v49  ;;  %v4664_v49 = vpack.c.bf16 %v1998_v46, %v1994_v45  ;;  %v2011_v53 = vld [vmem:[#allocation19 + $0x208] sm:$0xff]  ;;  %v2066_v45 = vld [vmem:[#allocation19 + $0x3c0] sm:$0xff] }
 0x58a   :  { %v2070_v46 = vld [vmem:[#allocation19 + $0x3e0] sm:$0xff] }
 0x58b   :  { %v1840_v0 = vadd.f32 %v3750_v56, %v3707_v52  ;;  %v2006_v52 = vld [vmem:[#allocation19 + $0x1e0] sm:$0xff]  ;;  %v4670_v56 = vpack.c.bf16 %v2015_v54, %v2011_v53  ;;  %v2083_v53 = vld [vmem:[#allocation19 + $0x448] sm:$0xff] }
 0x58c   :  { %v4668_v55 = vpack.c.bf16 %v2006_v52, %v2002_v51  ;;  %v2074_v51 = vld [vmem:[#allocation19 + $0x400] sm:$0xff]  ;;  %v2087_v54 = vld [vmem:[#allocation19 + $0x468] sm:$0xff] }
 0x58d   :  { %v1843_v4 = vmax.f32 %v1840_v0, 0.0  ;;  %v2018_v0 = vld [vmem:[#allocation19 + $0x240] sm:$0xff] }
 0x58e   :  { %v2078_v52 = vld [vmem:[#allocation19 + $0x420] sm:$0xff] }
 0x58f   :  { %3870 = vmatmul.mubr.f32.vlgmr.msra.gmra.mrb[4].mxu1 %v1843_v4  ;;  %v2031_v4 = vld [vmem:[#allocation19 + $0x2a8] sm:$0xff] }
 0x590   :  { %4641 = vmatpush1.bf16.msra.mxu1 %v4640_v1  ;;  %2544 = vmatprep.mubr.f32.mxu1 %v5432_v12  ;;  %v2022_v1 = vld [vmem:[#allocation19 + $0x260] sm:$0xff]  ;;  %v4678_v6 = vpack.c.bf16 %v2031_v4, %v2027_v3  ;;  %v4680_v12 = vpack.c.bf16 %v2030_v9, %v2026_v8  ;;  %v2099_v4 = vld [vmem:[#allocation19 + $0x4c8] sm:$0xff] }
 0x591   :  { %4643 = vmatprep.subr.bf16.mxu1 %v4642_v5  ;;  %v4676_v5 = vpack.c.bf16 %v2022_v1, %v2018_v0  ;;  %v4710_v0 = vpack.c.bf16 %v2095_v60, %v2091_v59  ;;  %v2090_v1 = vld [vmem:[#allocation19 + $0x480] sm:$0xff]  ;;  %v2163_v59 = vld [vmem:[#allocation19 + $0x6c8] sm:$0xff] }
 0x592   :  { %v2094_v3 = vld [vmem:[#allocation19 + $0x4a0] sm:$0xff]  ;;  %v2167_v60 = vld [vmem:[#allocation19 + $0x6e8] sm:$0xff] }
 0x593   :  { %v2098_v9 = vld [vmem:[#allocation19 + $0x4c0] sm:$0xff] }
 0x594   :  { %4645 = vmatpush1.bf16.msra.mxu1 %v4644_v11  ;;  %v2039_v11 = vld [vmem:[#allocation19 + $0x2e8] sm:$0xff] }
 0x595   :  { %4647 = vmatprep.subr.bf16.mxu1 %v4646_v13  ;;  %v4682_v13 = vpack.c.bf16 %v2039_v11, %v2035_v10  ;;  %v2102_v10 = vld [vmem:[#allocation19 + $0x4e0] sm:$0xff]  ;;  %v2107_v11 = vld [vmem:[#allocation19 + $0x508] sm:$0xff] }
 0x598   :  { %4649 = vmatpush1.bf16.msra.mxu1 %v4648_v18  ;;  %v4684_v18 = vpack.c.bf16 %v2038_v15, %v2034_v14  ;;  %v2106_v15 = vld [vmem:[#allocation19 + $0x500] sm:$0xff] }
 0x599   :  { %4651 = vmatprep.subr.bf16.mxu1 %v4650_v22  ;;  %v4686_v22 = vpack.c.bf16 %v2047_v17, %v2043_v16  ;;  %v2115_v16 = vld [vmem:[#allocation19 + $0x548] sm:$0xff] }
 0x59a   :  { %v2119_v17 = vld [vmem:[#allocation19 + $0x568] sm:$0xff] }
 0x59c   :  { %4653 = vmatpush1.bf16.msra.mxu1 %v4652_v30  ;;  %v4688_v30 = vpack.c.bf16 %v2046_v25, %v2042_v19  ;;  %v2114_v19 = vld [vmem:[#allocation19 + $0x540] sm:$0xff] }
 0x59d   :  { %4655 = vmatprep.subr.bf16.mxu1 %v4654_v29  ;;  %v4690_v29 = vpack.c.bf16 %v2055_v28, %v2051_v26  ;;  %v2118_v25 = vld [vmem:[#allocation19 + $0x560] sm:$0xff]  ;;  %v2123_v26 = vld [vmem:[#allocation19 + $0x588] sm:$0xff] }
 0x59e   :  { %v2127_v28 = vld [vmem:[#allocation19 + $0x5a8] sm:$0xff] }
 0x5a0   :  { %4657 = vmatpush1.bf16.msra.mxu1 %v4656_v37  ;;  %v4692_v37 = vpack.c.bf16 %v2054_v34, %v2050_v31  ;;  %v2122_v31 = vld [vmem:[#allocation19 + $0x580] sm:$0xff] }
 0x5a1   :  { %4659 = vmatprep.subr.bf16.mxu1 %v4658_v38  ;;  %v4694_v38 = vpack.c.bf16 %v2063_v36, %v2059_v35  ;;  %v2126_v34 = vld [vmem:[#allocation19 + $0x5a0] sm:$0xff]  ;;  %v2131_v35 = vld [vmem:[#allocation19 + $0x5c8] sm:$0xff] }
 0x5a2   :  { %v2135_v36 = vld [vmem:[#allocation19 + $0x5e8] sm:$0xff] }
 0x5a4   :  { %4661 = vmatpush1.bf16.msra.mxu1 %v4660_v43  ;;  %v4696_v43 = vpack.c.bf16 %v2062_v40, %v2058_v39  ;;  %v2130_v39 = vld [vmem:[#allocation19 + $0x5c0] sm:$0xff] }
 0x5a5   :  { %4663 = vmatprep.subr.bf16.mxu1 %v4662_v44  ;;  %v4698_v44 = vpack.c.bf16 %v2071_v42, %v2067_v41  ;;  %v2134_v40 = vld [vmem:[#allocation19 + $0x5e0] sm:$0xff]  ;;  %v2139_v41 = vld [vmem:[#allocation19 + $0x608] sm:$0xff] }
 0x5a6   :  { %v2143_v42 = vld [vmem:[#allocation19 + $0x628] sm:$0xff] }
 0x5a8   :  { %4665 = vmatpush1.bf16.msra.mxu1 %v4664_v49  ;;  %v4700_v49 = vpack.c.bf16 %v2070_v46, %v2066_v45  ;;  %v2138_v45 = vld [vmem:[#allocation19 + $0x600] sm:$0xff] }
 0x5a9   :  { %4667 = vmatprep.subr.bf16.mxu1 %v4666_v50  ;;  %v4702_v50 = vpack.c.bf16 %v2079_v48, %v2075_v47  ;;  %v2142_v46 = vld [vmem:[#allocation19 + $0x620] sm:$0xff]  ;;  %v2147_v47 = vld [vmem:[#allocation19 + $0x648] sm:$0xff] }
 0x5aa   :  { %v2151_v48 = vld [vmem:[#allocation19 + $0x668] sm:$0xff] }
 0x5ac   :  { %4669 = vmatpush1.bf16.msra.mxu1 %v4668_v55  ;;  %v4704_v55 = vpack.c.bf16 %v2078_v52, %v2074_v51  ;;  %v2146_v51 = vld [vmem:[#allocation19 + $0x640] sm:$0xff] }
 0x5ad   :  { %4671 = vmatprep.subr.bf16.mxu1 %v4670_v56  ;;  %v4706_v56 = vpack.c.bf16 %v2087_v54, %v2083_v53  ;;  %v2150_v52 = vld [vmem:[#allocation19 + $0x660] sm:$0xff]  ;;  %v2155_v53 = vld [vmem:[#allocation19 + $0x688] sm:$0xff] }
 0x5ae   :  { %v2159_v54 = vld [vmem:[#allocation19 + $0x6a8] sm:$0xff] }
 0x5b0   :  { %4673 = vmatpush1.bf16.msra.mxu1 %v4672_v61  ;;  %v5433_v61 = vld [vmem:[#allocation5] sm:$0xff] }
 0x5b1   :  { %4675 = vmatprep.subr.bf16.mxu1 %v4674_v62  ;;  %v4708_v62 = vpack.c.bf16 %v2086_v58, %v2082_v57  ;;  %v2154_v57 = vld [vmem:[#allocation19 + $0x680] sm:$0xff] }
 0x5b2   :  { %v2158_v58 = vld [vmem:[#allocation19 + $0x6a0] sm:$0xff] }
 0x5b4   :  { %4677 = vmatpush1.bf16.msra.mxu1 %v4676_v5  ;;  %v2103_v5 = vld [vmem:[#allocation19 + $0x4e8] sm:$0xff] }
 0x5b5   :  { %4679 = vmatprep.subr.bf16.mxu1 %v4678_v6  ;;  %v4712_v6 = vpack.c.bf16 %v2094_v3, %v2090_v1  ;;  %v4714_v8 = vpack.c.bf16 %v2103_v5, %v2099_v4  ;;  %v2166_v1 = vld [vmem:[#allocation19 + $0x6e0] sm:$0xff]  ;;  %v2171_v3 = vld [vmem:[#allocation19 + $0x708] sm:$0xff] }
 0x5b6   :  { %v2175_v4 = vld [vmem:[#allocation19 + $0x728] sm:$0xff] }
 0x5b8   :  { %4681 = vmatpush1.bf16.msra.mxu1 %v4680_v12  ;;  %v2111_v12 = vld [vmem:[#allocation19 + $0x528] sm:$0xff] }
 0x5b9   :  { %4683 = vmatprep.subr.bf16.mxu1 %v4682_v13  ;;  %v4716_v13 = vpack.c.bf16 %v2102_v10, %v2098_v9  ;;  %v4718_v14 = vpack.c.bf16 %v2111_v12, %v2107_v11  ;;  %v2174_v9 = vld [vmem:[#allocation19 + $0x720] sm:$0xff]  ;;  %v2179_v10 = vld [vmem:[#allocation19 + $0x748] sm:$0xff] }
 0x5ba   :  { %v2183_v11 = vld [vmem:[#allocation19 + $0x768] sm:$0xff] }
 0x5bc   :  { %4685 = vmatpush1.bf16.msra.mxu1 %v4684_v18 }
 0x5bd   :  { %4687 = vmatprep.subr.bf16.mxu1 %v4686_v22  ;;  %v4722_v22 = vpack.c.bf16 %v2119_v17, %v2115_v16  ;;  %v2191_v16 = vld [vmem:[#allocation19 + $0x7a8] sm:$0xff] }
 0x5c0   :  { %4689 = vmatpush1.bf16.msra.mxu1 %v4688_v30  ;;  %v4724_v30 = vpack.c.bf16 %v2118_v25, %v2114_v19  ;;  %v2190_v19 = vld [vmem:[#allocation19 + $0x7a0] sm:$0xff]  ;;  %v2195_v25 = vld [vmem:[#allocation19 + $0x7c8] sm:$0xff] }
 0x5c1   :  { %4691 = vmatprep.subr.bf16.mxu1 %v4690_v29  ;;  %v4726_v29 = vpack.c.bf16 %v2127_v28, %v2123_v26  ;;  %v2199_v26 = vld [vmem:[#allocation19 + $0x7e8] sm:$0xff] }
 0x5c4   :  { %4693 = vmatpush1.bf16.msra.mxu1 %v4692_v37  ;;  %v4728_v37 = vpack.c.bf16 %v2126_v34, %v2122_v31  ;;  %v2198_v31 = vld [vmem:[#allocation19 + $0x7e0] sm:$0xff]  ;;  %v2203_v34 = vld [vmem:[#allocation19 + $0x808] sm:$0xff] }
 0x5c5   :  { %4695 = vmatprep.subr.bf16.mxu1 %v4694_v38  ;;  %v4730_v38 = vpack.c.bf16 %v2135_v36, %v2131_v35  ;;  %v2207_v35 = vld [vmem:[#allocation19 + $0x828] sm:$0xff] }
 0x5c8   :  { %4697 = vmatpush1.bf16.msra.mxu1 %v4696_v43  ;;  %v4732_v43 = vpack.c.bf16 %v2134_v40, %v2130_v39  ;;  %v2206_v39 = vld [vmem:[#allocation19 + $0x820] sm:$0xff]  ;;  %v2211_v40 = vld [vmem:[#allocation19 + $0x848] sm:$0xff] }
 0x5c9   :  { %4699 = vmatprep.subr.bf16.mxu1 %v4698_v44  ;;  %v4734_v44 = vpack.c.bf16 %v2143_v42, %v2139_v41  ;;  %v2215_v41 = vld [vmem:[#allocation19 + $0x868] sm:$0xff] }
 0x5cc   :  { %4701 = vmatpush1.bf16.msra.mxu1 %v4700_v49  ;;  %v4736_v49 = vpack.c.bf16 %v2142_v46, %v2138_v45  ;;  %v2214_v45 = vld [vmem:[#allocation19 + $0x860] sm:$0xff]  ;;  %v2219_v46 = vld [vmem:[#allocation19 + $0x888] sm:$0xff] }
 0x5cd   :  { %4703 = vmatprep.subr.bf16.mxu1 %v4702_v50  ;;  %v4738_v50 = vpack.c.bf16 %v2151_v48, %v2147_v47  ;;  %v2223_v47 = vld [vmem:[#allocation19 + $0x8a8] sm:$0xff]  ;;  %v5434_v48 = vld [vmem:[#allocation5 + $0x10] sm:$0xff] }
 0x5cf   :  { %2545 = vmatmul.mubr.f32.vlgmr.msra.gmra.mrb[6].mxu1 %v5433_v61  ;;  %v4744_v61 = vpack.c.bf16 %v2158_v58, %v2154_v57  ;;  %v2226_v57 = vld [vmem:[#allocation19 + $0x8c0] sm:$0xff] }
 0x5d0   :  { %4705 = vmatpush1.bf16.msra.mxu1 %v4704_v55  ;;  %2615 = vmatprep.mubr.f32.mxu1 %v6458_v27  ;;  %v2110_v27 = vld [vmem:[#allocation19 + $0x520] sm:$0xff]  ;;  %v4740_v55 = vpack.c.bf16 %v2150_v52, %v2146_v51 }
 0x5d1   :  { %4707 = vmatprep.subr.bf16.mxu1 %v4706_v56  ;;  %v4720_v18 = vpack.c.bf16 %v2110_v27, %v2106_v15  ;;  %v4742_v56 = vpack.c.bf16 %v2159_v54, %v2155_v53  ;;  %v2182_v15 = vld [vmem:[#allocation19 + $0x760] sm:$0xff]  ;;  %v2187_v27 = vld [vmem:[#allocation19 + $0x788] sm:$0xff] }
 0x5d2   :  { %v2218_v51 = vld [vmem:[#allocation19 + $0x880] sm:$0xff]  ;;  %v2227_v53 = vld [vmem:[#allocation19 + $0x8c8] sm:$0xff] }
 0x5d3   :  { %v2222_v52 = vld [vmem:[#allocation19 + $0x8a0] sm:$0xff]  ;;  %v2231_v54 = vld [vmem:[#allocation19 + $0x8e8] sm:$0xff] }
 0x5d4   :  { %4709 = vmatpush1.bf16.msra.mxu1 %v4708_v62  ;;  %v4746_v62 = vpack.c.bf16 %v2167_v60, %v2163_v59  ;;  %v2230_v58 = vld [vmem:[#allocation19 + $0x8e0] sm:$0xff]  ;;  %v2235_v59 = vld [vmem:[#allocation19 + $0x908] sm:$0xff] }
 0x5d5   :  { %4711 = vmatprep.subr.bf16.mxu1 %v4710_v0  ;;  %v2162_v0 = vld [vmem:[#allocation19 + $0x6c0] sm:$0xff]  ;;  %v2239_v60 = vld [vmem:[#allocation19 + $0x928] sm:$0xff] }
 0x5d6   :  { %v4748_v5 = vpack.c.bf16 %v2166_v1, %v2162_v0  ;;  %v2234_v0 = vld [vmem:[#allocation19 + $0x900] sm:$0xff]  ;;  %v2243_v1 = vld [vmem:[#allocation19 + $0x948] sm:$0xff] }
 0x5d8   :  { %4713 = vmatpush1.bf16.msra.mxu1 %v4712_v6  ;;  %v4750_v6 = vpack.c.bf16 %v2175_v4, %v2171_v3  ;;  %v2247_v3 = vld [vmem:[#allocation19 + $0x968] sm:$0xff] }
 0x5d9   :  { %4715 = vmatprep.subr.bf16.mxu1 %v4714_v8  ;;  %v2170_v8 = vld [vmem:[#allocation19 + $0x700] sm:$0xff] }
 0x5da   :  { %v4752_v12 = vpack.c.bf16 %v2174_v9, %v2170_v8  ;;  %v2246_v8 = vld [vmem:[#allocation19 + $0x960] sm:$0xff]  ;;  %v2251_v9 = vld [vmem:[#allocation19 + $0x988] sm:$0xff] }
 0x5dc   :  { %4717 = vmatpush1.bf16.msra.mxu1 %v4716_v13  ;;  %v4754_v13 = vpack.c.bf16 %v2183_v11, %v2179_v10  ;;  %v2255_v10 = vld [vmem:[#allocation19 + $0x9a8] sm:$0xff] }
 0x5dd   :  { %4719 = vmatprep.subr.bf16.mxu1 %v4718_v14  ;;  %v2178_v14 = vld [vmem:[#allocation19 + $0x740] sm:$0xff] }
 0x5de   :  { %v4756_v17 = vpack.c.bf16 %v2182_v15, %v2178_v14  ;;  %v2254_v14 = vld [vmem:[#allocation19 + $0x9a0] sm:$0xff]  ;;  %v2259_v15 = vld [vmem:[#allocation19 + $0x9c8] sm:$0xff] }
 0x5e0   :  { %4721 = vmatpush1.bf16.msra.mxu1 %v4720_v18  ;;  %v4758_v18 = vpack.c.bf16 %v2191_v16, %v2187_v27  ;;  %v2263_v27 = vld [vmem:[#allocation19 + $0x9e8] sm:$0xff] }
 0x5e1   :  { %4723 = vmatprep.subr.bf16.mxu1 %v4722_v22  ;;  %v2186_v22 = vld [vmem:[#allocation19 + $0x780] sm:$0xff] }
 0x5e2   :  { %v4760_v28 = vpack.c.bf16 %v2190_v19, %v2186_v22  ;;  %v2262_v22 = vld [vmem:[#allocation19 + $0x9e0] sm:$0xff]  ;;  %v2267_v19 = vld [vmem:[#allocation19 + $0xa08] sm:$0xff] }
 0x5e4   :  { %4725 = vmatpush1.bf16.msra.mxu1 %v4724_v30  ;;  %v4762_v30 = vpack.c.bf16 %v2199_v26, %v2195_v25  ;;  %v2271_v25 = vld [vmem:[#allocation19 + $0xa28] sm:$0xff] }
 0x5e5   :  { %4727 = vmatprep.subr.bf16.mxu1 %v4726_v29  ;;  %v2194_v29 = vld [vmem:[#allocation19 + $0x7c0] sm:$0xff] }
 0x5e6   :  { %v4764_v36 = vpack.c.bf16 %v2198_v31, %v2194_v29  ;;  %v2270_v29 = vld [vmem:[#allocation19 + $0xa20] sm:$0xff]  ;;  %v2275_v31 = vld [vmem:[#allocation19 + $0xa48] sm:$0xff] }
 0x5e8   :  { %4729 = vmatpush1.bf16.msra.mxu1 %v4728_v37  ;;  %v4766_v37 = vpack.c.bf16 %v2207_v35, %v2203_v34  ;;  %v2279_v34 = vld [vmem:[#allocation19 + $0xa68] sm:$0xff] }
 0x5e9   :  { %4731 = vmatprep.subr.bf16.mxu1 %v4730_v38  ;;  %v2202_v38 = vld [vmem:[#allocation19 + $0x800] sm:$0xff] }
 0x5ea   :  { %v4768_v42 = vpack.c.bf16 %v2206_v39, %v2202_v38  ;;  %v2278_v38 = vld [vmem:[#allocation19 + $0xa60] sm:$0xff]  ;;  %v2283_v39 = vld [vmem:[#allocation19 + $0xa88] sm:$0xff] }
 0x5ec   :  { %4733 = vmatpush1.bf16.msra.mxu1 %v4732_v43  ;;  %v4770_v43 = vpack.c.bf16 %v2215_v41, %v2211_v40  ;;  %v2287_v40 = vld [vmem:[#allocation19 + $0xaa8] sm:$0xff] }
 0x5ed   :  { %4735 = vmatprep.subr.bf16.mxu1 %v4734_v44  ;;  %v2210_v44 = vld [vmem:[#allocation19 + $0x840] sm:$0xff] }
 0x5f0   :  { %4737 = vmatpush1.bf16.msra.mxu1 %v4736_v49  ;;  %v4772_v49 = vpack.c.bf16 %v2214_v45, %v2210_v44  ;;  %v2286_v44 = vld [vmem:[#allocation19 + $0xaa0] sm:$0xff]  ;;  %v2291_v45 = vld [vmem:[#allocation19 + $0xac8] sm:$0xff] }
 0x5f1   :  { %4739 = vmatprep.subr.bf16.mxu1 %v4738_v50  ;;  %v4774_v50 = vpack.c.bf16 %v2223_v47, %v2219_v46  ;;  %v2295_v46 = vld [vmem:[#allocation19 + $0xae8] sm:$0xff] }
 0x5f4   :  { %4741 = vmatpush1.bf16.msra.mxu1 %v4740_v55  ;;  %v4776_v55 = vpack.c.bf16 %v2222_v52, %v2218_v51  ;;  %v2299_v51 = vld [vmem:[#allocation19 + $0xb08] sm:$0xff] }
 0x5f5   :  { %4743 = vmatprep.subr.bf16.mxu1 %v4742_v56  ;;  %v4778_v56 = vpack.c.bf16 %v2231_v54, %v2227_v53  ;;  %v2303_v52 = vld [vmem:[#allocation19 + $0xb28] sm:$0xff] }
 0x5f6   :  { %v4814_v54 = vpack.c.bf16 %v2303_v52, %v2299_v51 }
 0x5f8   :  { %4745 = vmatpush1.bf16.msra.mxu1 %v4744_v61  ;;  %v4780_v61 = vpack.c.bf16 %v2230_v58, %v2226_v57  ;;  %v2307_v57 = vld [vmem:[#allocation19 + $0xb48] sm:$0xff] }
 0x5f9   :  { %4747 = vmatprep.subr.bf16.mxu1 %v4746_v62  ;;  %v4782_v62 = vpack.c.bf16 %v2239_v60, %v2235_v59  ;;  %v2311_v58 = vld [vmem:[#allocation19 + $0xb68] sm:$0xff] }
 0x5fa   :  { %v4818_v60 = vpack.c.bf16 %v2311_v58, %v2307_v57  ;;  %v3708_v57 = vld [vmem:[#allocation17] ss:$0 sm:$0xff] }
 0x5fc   :  { %4749 = vmatpush1.bf16.msra.mxu1 %v4748_v5  ;;  %v4786_v5 = vpack.c.bf16 %v2247_v3, %v2243_v1 }
 0x5fd   :  { %4751 = vmatprep.subr.bf16.mxu1 %v4750_v6  ;;  %v2242_v6 = vld [vmem:[#allocation19 + $0x940] sm:$0xff] }
 0x5fe   :  { %v4788_v11 = vpack.c.bf16 %v2246_v8, %v2242_v6  ;;  %v2323_v6 = vld [vmem:[#allocation19 + $0xbc8] sm:$0xff] }
 0x5ff   :  { %v2327_v8 = vld [vmem:[#allocation19 + $0xbe8] sm:$0xff] }
 0x600   :  { %4753 = vmatpush1.bf16.msra.mxu1 %v4752_v12  ;;  %v4790_v12 = vpack.c.bf16 %v2255_v10, %v2251_v9  ;;  %v4826_v10 = vpack.c.bf16 %v2327_v8, %v2323_v6  ;;  %v3712_v8 = vld [vmem:[#allocation31] ss:$0 sm:$0xff] }
 0x601   :  { %4755 = vmatprep.subr.bf16.mxu1 %v4754_v13  ;;  %v2250_v13 = vld [vmem:[#allocation19 + $0x980] sm:$0xff] }
 0x602   :  { %v4792_v16 = vpack.c.bf16 %v2254_v14, %v2250_v13  ;;  %v2331_v13 = vld [vmem:[#allocation19 + $0xc08] sm:$0xff] }
 0x603   :  { %v2335_v14 = vld [vmem:[#allocation19 + $0xc28] sm:$0xff] }
 0x604   :  { %4757 = vmatpush1.bf16.msra.mxu1 %v4756_v17  ;;  %v4794_v17 = vpack.c.bf16 %v2263_v27, %v2259_v15  ;;  %v4830_v27 = vpack.c.bf16 %v2335_v14, %v2331_v13  ;;  %v2395_v13 = vld [vmem:[#allocation19 + $0xe08] sm:$0xff] }
 0x605   :  { %4759 = vmatprep.subr.bf16.mxu1 %v4758_v18  ;;  %v2258_v18 = vld [vmem:[#allocation19 + $0x9c0] sm:$0xff]  ;;  %v2399_v14 = vld [vmem:[#allocation19 + $0xe28] sm:$0xff] }
 0x606   :  { %v4796_v26 = vpack.c.bf16 %v2262_v22, %v2258_v18  ;;  %v2339_v18 = vld [vmem:[#allocation19 + $0xc48] sm:$0xff] }
 0x607   :  { %v2343_v22 = vld [vmem:[#allocation19 + $0xc68] sm:$0xff] }
 0x608   :  { %4761 = vmatpush1.bf16.msra.mxu1 %v4760_v28  ;;  %v4798_v28 = vpack.c.bf16 %v2271_v25, %v2267_v19  ;;  %v4834_v25 = vpack.c.bf16 %v2343_v22, %v2339_v18  ;;  %v2394_v18 = vld [vmem:[#allocation19 + $0xe00] sm:$0xff] }
 0x609   :  { %4763 = vmatprep.subr.bf16.mxu1 %v4762_v30  ;;  %v2266_v30 = vld [vmem:[#allocation19 + $0xa00] sm:$0xff] }
 0x60a   :  { %v4800_v35 = vpack.c.bf16 %v2270_v29, %v2266_v30  ;;  %v2347_v30 = vld [vmem:[#allocation19 + $0xc88] sm:$0xff]  ;;  %v2398_v22 = vld [vmem:[#allocation19 + $0xe20] sm:$0xff] }
 0x60b   :  { %v2351_v29 = vld [vmem:[#allocation19 + $0xca8] sm:$0xff] }
 0x60c   :  { %4765 = vmatpush1.bf16.msra.mxu1 %v4764_v36  ;;  %v4802_v36 = vpack.c.bf16 %v2279_v34, %v2275_v31  ;;  %v5435_v31 = vld [vmem:[#allocation5 + $0x20] sm:$0xff] }
 0x60d   :  { %4767 = vmatprep.subr.bf16.mxu1 %v4766_v37  ;;  %v2274_v37 = vld [vmem:[#allocation19 + $0xa40] sm:$0xff] }
 0x60e   :  { %v4804_v41 = vpack.c.bf16 %v2278_v38, %v2274_v37  ;;  %v2350_v37 = vld [vmem:[#allocation19 + $0xca0] sm:$0xff]  ;;  %v2355_v38 = vld [vmem:[#allocation19 + $0xcc8] sm:$0xff] }
 0x60f   :  { %2616 = vmatmul.mubr.f32.vlgmr.msra.gmra.mrb[6].mxu1 %v5434_v48  ;;  %v4810_v48 = vpack.c.bf16 %v2295_v46, %v2291_v45  ;;  %v2367_v45 = vld [vmem:[#allocation19 + $0xd28] sm:$0xff] }
 0x610   :  { %4769 = vmatpush1.bf16.msra.mxu1 %v4768_v42  ;;  %2686 = vmatprep.mubr.f32.mxu1 %v6463_v7  ;;  %v2238_v7 = vld [vmem:[#allocation19 + $0x920] sm:$0xff]  ;;  %v4806_v42 = vpack.c.bf16 %v2287_v40, %v2283_v39  ;;  %v2359_v39 = vld [vmem:[#allocation19 + $0xce8] sm:$0xff] }
 0x611   :  { %4771 = vmatprep.subr.bf16.mxu1 %v4770_v43  ;;  %v4784_v4 = vpack.c.bf16 %v2238_v7, %v2234_v0  ;;  %v2282_v43 = vld [vmem:[#allocation19 + $0xa80] sm:$0xff]  ;;  %v2315_v0 = vld [vmem:[#allocation19 + $0xb88] sm:$0xff] }
 0x612   :  { %v4808_v47 = vpack.c.bf16 %v2286_v44, %v2282_v43  ;;  %v2319_v7 = vld [vmem:[#allocation19 + $0xba8] sm:$0xff]  ;;  %v2358_v43 = vld [vmem:[#allocation19 + $0xce0] sm:$0xff] }
 0x613   :  { %v4822_v3 = vpack.c.bf16 %v2319_v7, %v2315_v0  ;;  %v2363_v44 = vld [vmem:[#allocation19 + $0xd08] sm:$0xff] }
 0x614   :  { %4773 = vmatpush1.bf16.msra.mxu1 %v4772_v49  ;;  %v2290_v49 = vld [vmem:[#allocation19 + $0xac0] sm:$0xff]  ;;  %v2387_v0 = vld [vmem:[#allocation19 + $0xdc8] sm:$0xff] }
 0x615   :  { %4775 = vmatprep.subr.bf16.mxu1 %v4774_v50  ;;  %v2294_v50 = vld [vmem:[#allocation19 + $0xae0] sm:$0xff]  ;;  %v2391_v7 = vld [vmem:[#allocation19 + $0xde8] sm:$0xff] }
 0x616   :  { %v4812_v53 = vpack.c.bf16 %v2294_v50, %v2290_v49  ;;  %v2371_v49 = vld [vmem:[#allocation19 + $0xd48] sm:$0xff] }
 0x617   :  { %v2375_v50 = vld [vmem:[#allocation19 + $0xd68] sm:$0xff] }
 0x618   :  { %4777 = vmatpush1.bf16.msra.mxu1 %v4776_v55  ;;  %v2298_v55 = vld [vmem:[#allocation19 + $0xb00] sm:$0xff]  ;;  %v4850_v52 = vpack.c.bf16 %v2375_v50, %v2371_v49  ;;  %v2435_v50 = vld [vmem:[#allocation19 + $0xf48] sm:$0xff] }
 0x619   :  { %4779 = vmatprep.subr.bf16.mxu1 %v4778_v56  ;;  %v2302_v56 = vld [vmem:[#allocation19 + $0xb20] sm:$0xff] }
 0x61a   :  { %v4816_v59 = vpack.c.bf16 %v2302_v56, %v2298_v55  ;;  %v2379_v55 = vld [vmem:[#allocation19 + $0xd88] sm:$0xff]  ;;  %v2430_v49 = vld [vmem:[#allocation19 + $0xf20] sm:$0xff] }
 0x61b   :  { %v2383_v56 = vld [vmem:[#allocation19 + $0xda8] sm:$0xff] }
 0x61c   :  { %4781 = vmatpush1.bf16.msra.mxu1 %v4780_v61  ;;  %v2306_v61 = vld [vmem:[#allocation19 + $0xb40] sm:$0xff] }
 0x61d   :  { %4783 = vmatprep.subr.bf16.mxu1 %v4782_v62  ;;  %v2310_v62 = vld [vmem:[#allocation19 + $0xb60] sm:$0xff] }
 0x61e   :  { %v4820_v1 = vpack.c.bf16 %v2310_v62, %v2306_v61  ;;  %v2382_v61 = vld [vmem:[#allocation19 + $0xda0] sm:$0xff] }
 0x620   :  { %4785 = vmatpush1.bf16.msra.mxu1 %v4784_v4  ;;  %v2314_v4 = vld [vmem:[#allocation19 + $0xb80] sm:$0xff] }
 0x621   :  { %4787 = vmatprep.subr.bf16.mxu1 %v4786_v5  ;;  %v2318_v5 = vld [vmem:[#allocation19 + $0xba0] sm:$0xff] }
 0x622   :  { %v4824_v9 = vpack.c.bf16 %v2318_v5, %v2314_v4 }
 0x624   :  { %4789 = vmatpush1.bf16.msra.mxu1 %v4788_v11  ;;  %v2322_v11 = vld [vmem:[#allocation19 + $0xbc0] sm:$0xff] }
 0x625   :  { %4791 = vmatprep.subr.bf16.mxu1 %v4790_v12  ;;  %v2326_v12 = vld [vmem:[#allocation19 + $0xbe0] sm:$0xff] }
 0x626   :  { %v4828_v15 = vpack.c.bf16 %v2326_v12, %v2322_v11  ;;  %v2386_v11 = vld [vmem:[#allocation19 + $0xdc0] sm:$0xff] }
 0x627   :  { %v2390_v12 = vld [vmem:[#allocation19 + $0xde0] sm:$0xff] }
 0x628   :  { %4793 = vmatpush1.bf16.msra.mxu1 %v4792_v16  ;;  %v2330_v16 = vld [vmem:[#allocation19 + $0xc00] sm:$0xff] }
 0x629   :  { %4795 = vmatprep.subr.bf16.mxu1 %v4794_v17  ;;  %v2334_v17 = vld [vmem:[#allocation19 + $0xc20] sm:$0xff] }
 0x62a   :  { %v4832_v19 = vpack.c.bf16 %v2334_v17, %v2330_v16  ;;  %v4862_v17 = vpack.c.bf16 %v2399_v14, %v2395_v13  ;;  %v3054_v13 = vld [vmem:[#allocation22 + $0x10] sm:$0xff]  ;;  %v3057_v14 = vld [vmem:[#allocation22 + $0x28] sm:$0xff] }
 0x62c   :  { %4797 = vmatpush1.bf16.msra.mxu1 %v4796_v26  ;;  %v2338_v26 = vld [vmem:[#allocation19 + $0xc40] sm:$0xff] }
 0x62d   :  { %4799 = vmatprep.subr.bf16.mxu1 %v4798_v28  ;;  %v2342_v28 = vld [vmem:[#allocation19 + $0xc60] sm:$0xff] }
 0x62e   :  { %v4836_v34 = vpack.c.bf16 %v2342_v28, %v2338_v26  ;;  %v4864_v26 = vpack.c.bf16 %v2398_v22, %v2394_v18  ;;  %v3058_v18 = vld [vmem:[#allocation22 + $0x30] sm:$0xff]  ;;  %v3061_v22 = vld [vmem:[#allocation22 + $0x48] sm:$0xff] }
 0x630   :  { %4801 = vmatpush1.bf16.msra.mxu1 %v4800_v35  ;;  %v4838_v35 = vpack.c.bf16 %v2351_v29, %v2347_v30  ;;  %v2402_v30 = vld [vmem:[#allocation19 + $0xe40] sm:$0xff] }
 0x631   :  { %4803 = vmatprep.subr.bf16.mxu1 %v4802_v36  ;;  %v2346_v36 = vld [vmem:[#allocation19 + $0xc80] sm:$0xff] }
 0x632   :  { %v4840_v40 = vpack.c.bf16 %v2350_v37, %v2346_v36  ;;  %v2406_v29 = vld [vmem:[#allocation19 + $0xe60] sm:$0xff] }
 0x633   :  { %v2410_v37 = vld [vmem:[#allocation19 + $0xe80] sm:$0xff] }
 0x634   :  { %4805 = vmatpush1.bf16.msra.mxu1 %v4804_v41  ;;  %v4842_v41 = vpack.c.bf16 %v2359_v39, %v2355_v38  ;;  %v2414_v38 = vld [vmem:[#allocation19 + $0xea0] sm:$0xff]  ;;  %v2419_v39 = vld [vmem:[#allocation19 + $0xec8] sm:$0xff] }
 0x635   :  { %4807 = vmatprep.subr.bf16.mxu1 %v4806_v42  ;;  %v2354_v42 = vld [vmem:[#allocation19 + $0xcc0] sm:$0xff] }
 0x636   :  { %v4844_v46 = vpack.c.bf16 %v2358_v43, %v2354_v42  ;;  %v2418_v43 = vld [vmem:[#allocation19 + $0xec0] sm:$0xff] }
 0x638   :  { %4809 = vmatpush1.bf16.msra.mxu1 %v4808_v47  ;;  %v4846_v47 = vpack.c.bf16 %v2367_v45, %v2363_v44  ;;  %v2422_v44 = vld [vmem:[#allocation19 + $0xee0] sm:$0xff]  ;;  %v2427_v45 = vld [vmem:[#allocation19 + $0xf08] sm:$0xff] }
 0x639   :  { %4811 = vmatprep.subr.bf16.mxu1 %v4810_v48  ;;  %v2362_v48 = vld [vmem:[#allocation19 + $0xd00] sm:$0xff] }
 0x63c   :  { %4813 = vmatpush1.bf16.msra.mxu1 %v4812_v53  ;;  %v2370_v53 = vld [vmem:[#allocation19 + $0xd40] sm:$0xff] }
 0x63d   :  { %4815 = vmatprep.subr.bf16.mxu1 %v4814_v54  ;;  %v2374_v54 = vld [vmem:[#allocation19 + $0xd60] sm:$0xff] }
 0x63e   :  { %v4852_v58 = vpack.c.bf16 %v2374_v54, %v2370_v53  ;;  %v2434_v54 = vld [vmem:[#allocation19 + $0xf40] sm:$0xff] }
 0x640   :  { %4817 = vmatpush1.bf16.msra.mxu1 %v4816_v59  ;;  %v4854_v59 = vpack.c.bf16 %v2383_v56, %v2379_v55  ;;  %v2438_v55 = vld [vmem:[#allocation19 + $0xf60] sm:$0xff]  ;;  %v2443_v56 = vld [vmem:[#allocation19 + $0xf88] sm:$0xff] }
 0x641   :  { %4819 = vmatprep.subr.bf16.mxu1 %v4818_v60  ;;  %v2378_v60 = vld [vmem:[#allocation19 + $0xd80] sm:$0xff] }
 0x642   :  { %v4856_v6 = vpack.c.bf16 %v2382_v61, %v2378_v60  ;;  %v2442_v60 = vld [vmem:[#allocation19 + $0xf80] sm:$0xff] }
 0x643   :  { %v2446_v61 = vld [vmem:[#allocation19 + $0xfa0] sm:$0xff] }
 0x644   :  { %4821 = vmatpush1.bf16.msra.mxu1 %v4820_v1  ;;  %v6472_v1 = vpop.f32.mrb[4].mxu0 }
 0x645   :  { %4823 = vmatprep.subr.bf16.mxu1 %v4822_v3  ;;  %v6474_v5 = vpop.f32.mrb[5].mxu0 }
 0x648   :  { %4825 = vmatpush1.bf16.msra.mxu1 %v4824_v9 }
 0x649   :  { %4827 = vmatprep.subr.bf16.mxu1 %v4826_v10  ;;  %v4858_v10 = vpack.c.bf16 %v2391_v7, %v2387_v0  ;;  %v2455_v0 = vld [vmem:[#allocation19 + $0xfe8] sm:$0xff]  ;;  %v4888_v7 = vpack.c.bf16 %v2446_v61, %v2442_v60  ;;  %v3082_v61 = vld [vmem:[#allocation22 + $0xf0] sm:$0xff] }
 0x64a   :  { %v3080_v60 = vld [vmem:[#allocation22 + $0xe0] sm:$0xff] }
 0x64c   :  { %4829 = vmatpush1.bf16.msra.mxu1 %v4828_v15 }
 0x64d   :  { %4831 = vmatprep.subr.bf16.mxu1 %v4830_v27  ;;  %v4860_v27 = vpack.c.bf16 %v2390_v12, %v2386_v11  ;;  %v3052_v12 = vld [vmem:[#allocation22] sm:$0xff] }
 0x64f   :  { %2687 = vmatmul.mubr.f32.vlgmr.msra.gmra.mrb[6].mxu1 %v5435_v31  ;;  %v2411_v31 = vld [vmem:[#allocation19 + $0xe88] sm:$0xff] }
 0x650   :  { %4833 = vmatpush1.bf16.msra.mxu1 %v4832_v19  ;;  %2757 = vmatprep.mubr.f32.mxu1 %v6466_v2  ;;  %v2366_v2 = vld [vmem:[#allocation19 + $0xd20] sm:$0xff]  ;;  %v2403_v19 = vld [vmem:[#allocation19 + $0xe48] sm:$0xff] }
 0x651   :  { %4835 = vmatprep.subr.bf16.mxu1 %v4834_v25  ;;  %v4848_v51 = vpack.c.bf16 %v2366_v2, %v2362_v48  ;;  %v2407_v25 = vld [vmem:[#allocation19 + $0xe68] sm:$0xff]  ;;  %v2426_v2 = vld [vmem:[#allocation19 + $0xf00] sm:$0xff] }
 0x652   :  { %v4866_v28 = vpack.c.bf16 %v2407_v25, %v2403_v19  ;;  %v3063_v19 = vld [vmem:[#allocation22 + $0x58] sm:$0xff] }
 0x653   :  { %v5436_v25 = vld [vmem:[#allocation5 + $0x30] sm:$0xff] }
 0x654   :  { %4837 = vmatpush1.bf16.msra.mxu1 %v4836_v34  ;;  %v2415_v34 = vld [vmem:[#allocation19 + $0xea8] sm:$0xff] }
 0x655   :  { %4839 = vmatprep.subr.bf16.mxu1 %v4838_v35  ;;  %v4868_v35 = vpack.c.bf16 %v2406_v29, %v2402_v30  ;;  %v4870_v36 = vpack.c.bf16 %v2415_v34, %v2411_v31  ;;  %v3060_v30 = vld [vmem:[#allocation22 + $0x40] sm:$0xff]  ;;  %v3062_v29 = vld [vmem:[#allocation22 + $0x50] sm:$0xff]  ;;  %v3065_v31 = vld [vmem:[#allocation22 + $0x68] sm:$0xff] }
 0x656   :  { %v3067_v34 = vld [vmem:[#allocation22 + $0x78] sm:$0xff] }
 0x658   :  { %4841 = vmatpush1.bf16.msra.mxu1 %v4840_v40  ;;  %v2423_v40 = vld [vmem:[#allocation19 + $0xee8] sm:$0xff] }
 0x659   :  { %4843 = vmatprep.subr.bf16.mxu1 %v4842_v41  ;;  %v4872_v41 = vpack.c.bf16 %v2414_v38, %v2410_v37  ;;  %v4874_v42 = vpack.c.bf16 %v2423_v40, %v2419_v39  ;;  %v3064_v37 = vld [vmem:[#allocation22 + $0x60] sm:$0xff]  ;;  %v3066_v38 = vld [vmem:[#allocation22 + $0x70] sm:$0xff]  ;;  %v3069_v39 = vld [vmem:[#allocation22 + $0x88] sm:$0xff] }
 0x65a   :  { %v3071_v40 = vld [vmem:[#allocation22 + $0x98] sm:$0xff] }
 0x65c   :  { %4845 = vmatpush1.bf16.msra.mxu1 %v4844_v46  ;;  %v2431_v46 = vld [vmem:[#allocation19 + $0xf28] sm:$0xff] }
 0x65d   :  { %4847 = vmatprep.subr.bf16.mxu1 %v4846_v47  ;;  %v4876_v47 = vpack.c.bf16 %v2422_v44, %v2418_v43  ;;  %v4878_v48 = vpack.c.bf16 %v2431_v46, %v2427_v45  ;;  %v3068_v43 = vld [vmem:[#allocation22 + $0x80] sm:$0xff]  ;;  %v3070_v44 = vld [vmem:[#allocation22 + $0x90] sm:$0xff]  ;;  %v3073_v45 = vld [vmem:[#allocation22 + $0xa8] sm:$0xff] }
 0x65e   :  { %v3075_v46 = vld [vmem:[#allocation22 + $0xb8] sm:$0xff] }
 0x660   :  { %4849 = vmatpush1.bf16.msra.mxu1 %v4848_v51  ;;  %v2439_v51 = vld [vmem:[#allocation19 + $0xf68] sm:$0xff] }
 0x661   :  { %4851 = vmatprep.subr.bf16.mxu1 %v4850_v52  ;;  %v4880_v52 = vpack.c.bf16 %v2430_v49, %v2426_v2  ;;  %v4882_v53 = vpack.c.bf16 %v2439_v51, %v2435_v50  ;;  %v3072_v2 = vld [vmem:[#allocation22 + $0xa0] sm:$0xff]  ;;  %v3074_v49 = vld [vmem:[#allocation22 + $0xb0] sm:$0xff]  ;;  %v3077_v50 = vld [vmem:[#allocation22 + $0xc8] sm:$0xff] }
 0x662   :  { %v1933_v62 = vpop.f32.mrb[4].mxu1  ;;  %v3079_v51 = vld [vmem:[#allocation22 + $0xd8] sm:$0xff] }
 0x663   :  { %v1934_v3 = vadd.f32 %v3708_v57, %v1933_v62  ;;  %v3871_v4 = vpop.f32.mrb[5].mxu1  ;;  %v2447_v57 = vld [vmem:[#allocation19 + $0xfa8] sm:$0xff] }
 0x664   :  { %4853 = vmatpush1.bf16.msra.mxu1 %v4852_v58  ;;  %v4884_v58 = vpack.c.bf16 %v2438_v55, %v2434_v54  ;;  %v2451_v62 = vld [vmem:[#allocation19 + $0xfc8] sm:$0xff]  ;;  %v2450_v4 = vld [vmem:[#allocation19 + $0xfc0] sm:$0xff]  ;;  %v3078_v55 = vld [vmem:[#allocation22 + $0xd0] sm:$0xff] }
 0x665   :  { %v1937_v9 = vmax.f32 %v1934_v3, 0.0  ;;  %4855 = vmatprep.subr.bf16.mxu1 %v4854_v59  ;;  %v4886_v59 = vpack.c.bf16 %v2447_v57, %v2443_v56  ;;  %v4890_v3 = vpack.c.bf16 %v2455_v0, %v2451_v62  ;;  %v3076_v54 = vld [vmem:[#allocation22 + $0xc0] sm:$0xff]  ;;  %v3081_v56 = vld [vmem:[#allocation22 + $0xe8] sm:$0xff]  ;;  %v3083_v57 = vld [vmem:[#allocation22 + $0xf8] sm:$0xff] }
 0x666   :  { %v3085_v62 = vld [vmem:[#allocation22 + $0x108] sm:$0xff]  ;;  %v3087_v0 = vld [vmem:[#allocation22 + $0x118] sm:$0xff] }
 0x667   :  { %v3642_v15 = vmul.f32 %v3712_v8, %v1937_v9  ;;  %v3053_v8 = vld [vmem:[#allocation22 + $0x8] sm:$0xff]  ;;  %v3055_v9 = vld [vmem:[#allocation22 + $0x18] sm:$0xff] }
 0x668   :  { %4857 = vmatpush1.bf16.msra.mxu1 %v4856_v6  ;;  %v2454_v6 = vld [vmem:[#allocation19 + $0xfe0] sm:$0xff]  ;;  %v5150_v11 = vpack.c.bf16 %v3055_v9, %v3053_v8  ;;  %v3089_v8 = vld [vmem:[#allocation22 + $0x128] sm:$0xff] }
 0x669   :  { %4859 = vmatprep.subr.bf16.mxu1 %v4858_v10  ;;  %v3644_v16 = vsel %vm3643_vm1, %v3642_v15, 0.0  ;;  %v4892_v10 = vpack.c.bf16 %v2454_v6, %v2450_v4  ;;  %v3059_v15 = vld [vmem:[#allocation22 + $0x38] sm:$0xff]  ;;  %v3084_v4 = vld [vmem:[#allocation22 + $0x100] sm:$0xff]  ;;  %v3086_v6 = vld [vmem:[#allocation22 + $0x110] sm:$0xff] }
 0x66a   :  { %3645 = vadd.xlane.f32.xlu0 %v3644_v16  ;;  %v5154_v16 = vpack.c.bf16 %v3059_v15, %v3057_v14  ;;  %v3091_v9 = vld [vmem:[#allocation22 + $0x138] sm:$0xff]  ;;  %v3093_v14 = vld [vmem:[#allocation22 + $0x148] sm:$0xff] }
 0x66b   :  { %v3095_v15 = vld [vmem:[#allocation22 + $0x158] sm:$0xff] }
 0x66c   :  { %4861 = vmatpush1.bf16.msra.mxu1 %v4860_v27  ;;  %v5152_v27 = vpack.c.bf16 %v3054_v13, %v3052_v12  ;;  %v3088_v12 = vld [vmem:[#allocation22 + $0x120] sm:$0xff]  ;;  %v3090_v13 = vld [vmem:[#allocation22 + $0x130] sm:$0xff] }
 0x66d   :  { %4863 = vmatprep.subr.bf16.mxu1 %v4862_v17  ;;  %v3056_v17 = vld [vmem:[#allocation22 + $0x20] sm:$0xff] }
 0x670   :  { %4865 = vmatpush1.bf16.msra.mxu1 %v4864_v26  ;;  %v5156_v26 = vpack.c.bf16 %v3058_v18, %v3056_v17  ;;  %v3092_v17 = vld [vmem:[#allocation22 + $0x140] sm:$0xff]  ;;  %v3094_v18 = vld [vmem:[#allocation22 + $0x150] sm:$0xff] }
 0x671   :  { %4867 = vmatprep.subr.bf16.mxu1 %v4866_v28  ;;  %v5158_v28 = vpack.c.bf16 %v3063_v19, %v3061_v22  ;;  %v3097_v22 = vld [vmem:[#allocation22 + $0x168] sm:$0xff]  ;;  %v3099_v19 = vld [vmem:[#allocation22 + $0x178] sm:$0xff] }
 0x674   :  { %4869 = vmatpush1.bf16.msra.mxu1 %v4868_v35  ;;  %v5160_v35 = vpack.c.bf16 %v3062_v29, %v3060_v30  ;;  %v3098_v30 = vld [vmem:[#allocation22 + $0x170] sm:$0xff]  ;;  %v3101_v29 = vld [vmem:[#allocation22 + $0x188] sm:$0xff] }
 0x675   :  { %4871 = vmatprep.subr.bf16.mxu1 %v4870_v36  ;;  %v5162_v36 = vpack.c.bf16 %v3067_v34, %v3065_v31  ;;  %v3103_v31 = vld [vmem:[#allocation22 + $0x198] sm:$0xff] }
 0x678   :  { %4873 = vmatpush1.bf16.msra.mxu1 %v4872_v41  ;;  %v5164_v41 = vpack.c.bf16 %v3066_v38, %v3064_v37  ;;  %v3102_v37 = vld [vmem:[#allocation22 + $0x190] sm:$0xff]  ;;  %v3105_v38 = vld [vmem:[#allocation22 + $0x1a8] sm:$0xff] }
 0x679   :  { %4875 = vmatprep.subr.bf16.mxu1 %v4874_v42  ;;  %v5166_v42 = vpack.c.bf16 %v3071_v40, %v3069_v39  ;;  %v3107_v39 = vld [vmem:[#allocation22 + $0x1b8] sm:$0xff] }
 0x67c   :  { %4877 = vmatpush1.bf16.msra.mxu1 %v4876_v47  ;;  %v5168_v47 = vpack.c.bf16 %v3070_v44, %v3068_v43  ;;  %v3106_v43 = vld [vmem:[#allocation22 + $0x1b0] sm:$0xff]  ;;  %v3109_v44 = vld [vmem:[#allocation22 + $0x1c8] sm:$0xff] }
 0x67d   :  { %4879 = vmatprep.subr.bf16.mxu1 %v4878_v48  ;;  %v5170_v48 = vpack.c.bf16 %v3075_v46, %v3073_v45  ;;  %v3111_v45 = vld [vmem:[#allocation22 + $0x1d8] sm:$0xff] }
 0x680   :  { %4881 = vmatpush1.bf16.msra.mxu1 %v4880_v52  ;;  %v5172_v52 = vpack.c.bf16 %v3074_v49, %v3072_v2  ;;  %v3110_v2 = vld [vmem:[#allocation22 + $0x1d0] sm:$0xff] }
 0x681   :  { %4883 = vmatprep.subr.bf16.mxu1 %v4882_v53  ;;  %v5174_v53 = vpack.c.bf16 %v3079_v51, %v3077_v50  ;;  %v3113_v50 = vld [vmem:[#allocation22 + $0x1e8] sm:$0xff]  ;;  %v3115_v51 = vld [vmem:[#allocation22 + $0x1f8] sm:$0xff] }
 0x684   :  { %4885 = vmatpush1.bf16.msra.mxu1 %v4884_v58  ;;  %v5176_v58 = vpack.c.bf16 %v3078_v55, %v3076_v54  ;;  %v3114_v54 = vld [vmem:[#allocation22 + $0x1f0] sm:$0xff] }
 0x685   :  { %4887 = vmatprep.subr.bf16.mxu1 %v4886_v59  ;;  %v5178_v59 = vpack.c.bf16 %v3083_v57, %v3081_v56  ;;  %v3117_v56 = vld [vmem:[#allocation22 + $0x208] sm:$0xff]  ;;  %v3119_v57 = vld [vmem:[#allocation22 + $0x218] sm:$0xff] }
 0x688   :  { %4889 = vmatpush1.bf16.msra.mxu1 %v4888_v7  ;;  %v5180_v7 = vpack.c.bf16 %v3082_v61, %v3080_v60  ;;  %v3353_v60 = vld [vmem:[#allocation25 + $0x88] sm:$0xff]  ;;  %v3336_v61 = vld [vmem:[#allocation25] sm:$0xff] }
 0x689   :  { %4891 = vmatprep.subr.bf16.mxu1 %v4890_v3  ;;  %v5182_v3 = vpack.c.bf16 %v3087_v0, %v3085_v62  ;;  %v3337_v0 = vld [vmem:[#allocation25 + $0x8] sm:$0xff] }
 0x68c   :  { %4893 = vmatpush1.bf16.msra.mxu1 %v4892_v10  ;;  %v5184_v10 = vpack.c.bf16 %v3086_v6, %v3084_v4  ;;  %v5280_v4 = vpack.c.bf16 %v3337_v0, %v3336_v61  ;;  %v3122_v61 = vld [vmem:[#allocation22 + $0x230] sm:$0xff]  ;;  %v3127_v0 = vld [vmem:[#allocation22 + $0x258] sm:$0xff] }
 0x68d   :  { %5151 = vmatprep.subr.bf16.mxu1 %v5150_v11  ;;  %v5186_v11 = vpack.c.bf16 %v3091_v9, %v3089_v8  ;;  %v3338_v8 = vld [vmem:[#allocation25 + $0x10] sm:$0xff]  ;;  %v3339_v9 = vld [vmem:[#allocation25 + $0x18] sm:$0xff] }
 0x68f   :  { %2758 = vmatmul.mubr.f32.vlgmr.msra.gmra.mrb[6].mxu1 %v5436_v25  ;;  %v5192_v25 = vpack.c.bf16 %v3094_v18, %v3092_v17 }
 0x690   :  { %5153 = vmatpush1.bf16.msra.mxu1 %v5152_v27  ;;  %v5188_v27 = vpack.c.bf16 %v3090_v13, %v3088_v12  ;;  %v5284_v12 = vpack.c.bf16 %v3339_v9, %v3338_v8  ;;  %v3131_v8 = vld [vmem:[#allocation22 + $0x278] sm:$0xff] }
 0x691   :  { %5155 = vmatprep.subr.bf16.mxu1 %v5154_v16  ;;  %v5190_v16 = vpack.c.bf16 %v3095_v15, %v3093_v14  ;;  %v3340_v14 = vld [vmem:[#allocation25 + $0x20] sm:$0xff]  ;;  %v3341_v15 = vld [vmem:[#allocation25 + $0x28] sm:$0xff] }
 0x692   :  { %v5288_v17 = vpack.c.bf16 %v3341_v15, %v3340_v14  ;;  %v3135_v14 = vld [vmem:[#allocation22 + $0x298] sm:$0xff] }
 0x694   :  { %5157 = vmatpush1.bf16.msra.mxu1 %v5156_v26  ;;  %v5194_v26 = vpack.c.bf16 %v3099_v19, %v3097_v22  ;;  %v3342_v22 = vld [vmem:[#allocation25 + $0x30] sm:$0xff]  ;;  %v3343_v19 = vld [vmem:[#allocation25 + $0x38] sm:$0xff] }
 0x695   :  { %5159 = vmatprep.subr.bf16.mxu1 %v5158_v28  ;;  %v3096_v28 = vld [vmem:[#allocation22 + $0x160] sm:$0xff] }
 0x696   :  { %v5196_v34 = vpack.c.bf16 %v3098_v30, %v3096_v28  ;;  %v5292_v28 = vpack.c.bf16 %v3343_v19, %v3342_v22  ;;  %v3139_v22 = vld [vmem:[#allocation22 + $0x2b8] sm:$0xff] }
 0x698   :  { %5161 = vmatpush1.bf16.msra.mxu1 %v5160_v35  ;;  %v5198_v35 = vpack.c.bf16 %v3103_v31, %v3101_v29  ;;  %v3344_v29 = vld [vmem:[#allocation25 + $0x40] sm:$0xff]  ;;  %v3345_v31 = vld [vmem:[#allocation25 + $0x48] sm:$0xff] }
 0x699   :  { %5163 = vmatprep.subr.bf16.mxu1 %v5162_v36  ;;  %v3100_v36 = vld [vmem:[#allocation22 + $0x180] sm:$0xff] }
 0x69a   :  { %v5200_v40 = vpack.c.bf16 %v3102_v37, %v3100_v36  ;;  %v5296_v36 = vpack.c.bf16 %v3345_v31, %v3344_v29  ;;  %v3143_v29 = vld [vmem:[#allocation22 + $0x2d8] sm:$0xff] }
 0x69c   :  { %5165 = vmatpush1.bf16.msra.mxu1 %v5164_v41  ;;  %v5202_v41 = vpack.c.bf16 %v3107_v39, %v3105_v38  ;;  %v3346_v38 = vld [vmem:[#allocation25 + $0x50] sm:$0xff]  ;;  %v3347_v39 = vld [vmem:[#allocation25 + $0x58] sm:$0xff] }
 0x69d   :  { %5167 = vmatprep.subr.bf16.mxu1 %v5166_v42  ;;  %v3104_v42 = vld [vmem:[#allocation22 + $0x1a0] sm:$0xff] }
 0x69e   :  { %v5204_v46 = vpack.c.bf16 %v3106_v43, %v3104_v42  ;;  %v5300_v42 = vpack.c.bf16 %v3347_v39, %v3346_v38  ;;  %v3147_v38 = vld [vmem:[#allocation22 + $0x2f8] sm:$0xff] }
 0x6a0   :  { %5169 = vmatpush1.bf16.msra.mxu1 %v5168_v47  ;;  %v5206_v47 = vpack.c.bf16 %v3111_v45, %v3109_v44  ;;  %v6477_v44 = vld [vmem:[#allocation20] sm:$0xf] }
 0x6a1   :  { %5171 = vmatprep.subr.bf16.mxu1 %v5170_v48  ;;  %v3108_v48 = vld [vmem:[#allocation22 + $0x1c0] sm:$0xff]  ;;  %v2463_v45 = vrot.slane %v6477_v44, %v6378_v21 }
 0x6a2   :  { %v5208_v49 = vpack.c.bf16 %v3110_v2, %v3108_v48 }
 0x6a4   :  { %5173 = vmatpush1.bf16.msra.mxu1 %v5172_v52  ;;  %v5210_v52 = vpack.c.bf16 %v3115_v51, %v3113_v50  ;;  %v3116_v50 = vld [vmem:[#allocation22 + $0x200] sm:$0xff]  ;;  %v3118_v51 = vld [vmem:[#allocation22 + $0x210] sm:$0xff] }
 0x6a5   :  { %5175 = vmatprep.subr.bf16.mxu1 %v5174_v53  ;;  %v3112_v53 = vld [vmem:[#allocation22 + $0x1e0] sm:$0xff] }
 0x6a6   :  { %v5212_v55 = vpack.c.bf16 %v3114_v54, %v3112_v53  ;;  %v3121_v54 = vld [vmem:[#allocation22 + $0x228] sm:$0xff] }
 0x6a8   :  { %5177 = vmatpush1.bf16.msra.mxu1 %v5176_v58  ;;  %v5214_v58 = vpack.c.bf16 %v3119_v57, %v3117_v56  ;;  %v5216_v57 = vpack.c.bf16 %v3118_v51, %v3116_v50  ;;  %v3155_v50 = vld [vmem:[#allocation22 + $0x338] sm:$0xff] }
 0x6a9   :  { %5179 = vmatprep.subr.bf16.mxu1 %v5178_v59  ;;  %v3352_v59 = vld [vmem:[#allocation25 + $0x80] sm:$0xff] }
 0x6aa   :  { %v5278_v62 = vpack.c.bf16 %v3353_v60, %v3352_v59  ;;  %v3120_v60 = vld [vmem:[#allocation22 + $0x220] sm:$0xff] }
 0x6ac   :  { %5181 = vmatpush1.bf16.msra.mxu1 %v5180_v7  ;;  %v3354_v7 = vld [vmem:[#allocation25 + $0x90] sm:$0xff]  ;;  %5279 = vmatprep.subr.bf16.mxu0 %v5278_v62  ;;  %v3125_v62 = vld [vmem:[#allocation22 + $0x248] sm:$0xff] }
 0x6ad   :  { %5183 = vmatprep.subr.bf16.mxu1 %v5182_v3  ;;  %v3355_v3 = vld [vmem:[#allocation25 + $0x98] sm:$0xff]  ;;  %5281 = vmatpush3.bf16.msra.mxu0 %v5280_v4  ;;  %v3126_v4 = vld [vmem:[#allocation22 + $0x250] sm:$0xff] }
 0x6ae   :  { %v5282_v6 = vpack.c.bf16 %v3355_v3, %v3354_v7  ;;  %v5220_v7 = vpack.c.bf16 %v3122_v61, %v3120_v60  ;;  %v5222_v3 = vpack.c.bf16 %v3127_v0, %v3125_v62  ;;  %v3158_v60 = vld [vmem:[#allocation22 + $0x350] sm:$0xff]  ;;  %v3161_v61 = vld [vmem:[#allocation22 + $0x368] sm:$0xff] }
 0x6b0   :  { %5185 = vmatpush1.bf16.msra.mxu1 %v5184_v10  ;;  %v3356_v10 = vld [vmem:[#allocation25 + $0xa0] sm:$0xff]  ;;  %5283 = vmatprep.subr.bf16.mxu0 %v5282_v6 }
 0x6b1   :  { %5187 = vmatprep.subr.bf16.mxu1 %v5186_v11  ;;  %v3357_v11 = vld [vmem:[#allocation25 + $0xa8] sm:$0xff]  ;;  %5285 = vmatpush3.bf16.msra.mxu0 %v5284_v12 }
 0x6b2   :  { %v5286_v13 = vpack.c.bf16 %v3357_v11, %v3356_v10  ;;  %v3129_v6 = vld [vmem:[#allocation22 + $0x268] sm:$0xff]  ;;  %v3128_v11 = vld [vmem:[#allocation22 + $0x260] sm:$0xff]  ;;  %v3130_v12 = vld [vmem:[#allocation22 + $0x270] sm:$0xff] }
 0x6b3   :  { %v5226_v10 = vpack.c.bf16 %v3131_v8, %v3129_v6  ;;  %v5228_v15 = vpack.c.bf16 %v3130_v12, %v3128_v11  ;;  %v3169_v11 = vld [vmem:[#allocation22 + $0x3a8] sm:$0xff]  ;;  %v3171_v12 = vld [vmem:[#allocation22 + $0x3b8] sm:$0xff] }
 0x6b4   :  { %5189 = vmatpush1.bf16.msra.mxu1 %v5188_v27  ;;  %v3358_v27 = vld [vmem:[#allocation25 + $0xb0] sm:$0xff]  ;;  %5287 = vmatprep.subr.bf16.mxu0 %v5286_v13  ;;  %v3133_v13 = vld [vmem:[#allocation22 + $0x288] sm:$0xff] }
 0x6b5   :  { %5191 = vmatprep.subr.bf16.mxu1 %v5190_v16  ;;  %v3359_v16 = vld [vmem:[#allocation25 + $0xb8] sm:$0xff]  ;;  %5289 = vmatpush3.bf16.msra.mxu0 %v5288_v17  ;;  %v3134_v17 = vld [vmem:[#allocation22 + $0x290] sm:$0xff] }
 0x6b6   :  { %v5290_v18 = vpack.c.bf16 %v3359_v16, %v3358_v27  ;;  %v5230_v27 = vpack.c.bf16 %v3135_v14, %v3133_v13  ;;  %v3132_v16 = vld [vmem:[#allocation22 + $0x280] sm:$0xff]  ;;  %v5266_v14 = vpack.c.bf16 %v3171_v12, %v3169_v11 }
 0x6b7   :  { %v5232_v19 = vpack.c.bf16 %v3134_v17, %v3132_v16  ;;  %v3173_v16 = vld [vmem:[#allocation22 + $0x3c8] sm:$0xff]  ;;  %v3175_v17 = vld [vmem:[#allocation22 + $0x3d8] sm:$0xff] }
 0x6b8   :  { %5193 = vmatpush1.bf16.msra.mxu1 %v5192_v25  ;;  %v3360_v25 = vld [vmem:[#allocation25 + $0xc0] sm:$0xff]  ;;  %5291 = vmatprep.subr.bf16.mxu0 %v5290_v18 }
 0x6b9   :  { %5195 = vmatprep.subr.bf16.mxu1 %v5194_v26  ;;  %v3361_v26 = vld [vmem:[#allocation25 + $0xc8] sm:$0xff]  ;;  %5293 = vmatpush3.bf16.msra.mxu0 %v5292_v28  ;;  %v3461_v11 = vld [vmem:[%s6631_s17 + $0x78] sm:$0xff] }
 0x6ba   :  { %v5294_v30 = vpack.c.bf16 %v3361_v26, %v3360_v25  ;;  %v3137_v18 = vld [vmem:[#allocation22 + $0x2a8] sm:$0xff]  ;;  %v3136_v26 = vld [vmem:[#allocation22 + $0x2a0] sm:$0xff]  ;;  %v3138_v28 = vld [vmem:[#allocation22 + $0x2b0] sm:$0xff] }
 0x6bb   :  { %v5234_v25 = vpack.c.bf16 %v3139_v22, %v3137_v18  ;;  %v5236_v31 = vpack.c.bf16 %v3138_v28, %v3136_v26  ;;  %v5270_v22 = vpack.c.bf16 %v3175_v17, %v3173_v16  ;;  %v3177_v26 = vld [vmem:[#allocation22 + $0x3e8] sm:$0xff]  ;;  %v3179_v28 = vld [vmem:[#allocation22 + $0x3f8] sm:$0xff] }
 0x6bc   :  { %5197 = vmatpush1.bf16.msra.mxu1 %v5196_v34  ;;  %v3362_v34 = vld [vmem:[#allocation25 + $0xd0] sm:$0xff]  ;;  %5295 = vmatprep.subr.bf16.mxu0 %v5294_v30  ;;  %v3141_v30 = vld [vmem:[#allocation22 + $0x2c8] sm:$0xff] }
 0x6bd   :  { %5199 = vmatprep.subr.bf16.mxu1 %v5198_v35  ;;  %v3363_v35 = vld [vmem:[#allocation25 + $0xd8] sm:$0xff]  ;;  %5297 = vmatpush3.bf16.msra.mxu0 %v5296_v36  ;;  %v3142_v36 = vld [vmem:[#allocation22 + $0x2d0] sm:$0xff] }
 0x6be   :  { %v5298_v37 = vpack.c.bf16 %v3363_v35, %v3362_v34  ;;  %v5238_v34 = vpack.c.bf16 %v3143_v29, %v3141_v30  ;;  %v3140_v35 = vld [vmem:[#allocation22 + $0x2c0] sm:$0xff]  ;;  %v2471_v29 = vrot.slane %v6477_v44, %v868_v63  ;;  %v3350_v63 = vld [vmem:[#allocation25 + $0x70] sm:$0xff]  ;;  %v3541_v16 = vld [vmem:[%s6633_s19] sm:$0xff] }
 0x6bf   :  { %v5240_v39 = vpack.c.bf16 %v3142_v36, %v3140_v35  ;;  %v3178_v35 = vld [vmem:[#allocation22 + $0x3f0] sm:$0xff] }
 0x6c0   :  { %5201 = vmatpush1.bf16.msra.mxu1 %v5200_v40  ;;  %v3364_v40 = vld [vmem:[#allocation25 + $0xe0] sm:$0xff]  ;;  %5299 = vmatprep.subr.bf16.mxu0 %v5298_v37  ;;  %v3542_v17 = vld [vmem:[%s6633_s19 + $0x8] sm:$0xff] }
 0x6c1   :  { %5203 = vmatprep.subr.bf16.mxu1 %v5202_v41  ;;  %v3365_v41 = vld [vmem:[#allocation25 + $0xe8] sm:$0xff]  ;;  %5301 = vmatpush3.bf16.msra.mxu0 %v5300_v42 }
 0x6c2   :  { %v5302_v43 = vpack.c.bf16 %v3365_v41, %v3364_v40  ;;  %v3145_v37 = vld [vmem:[#allocation22 + $0x2e8] sm:$0xff]  ;;  %v3144_v41 = vld [vmem:[#allocation22 + $0x2e0] sm:$0xff]  ;;  %v3146_v42 = vld [vmem:[#allocation22 + $0x2f0] sm:$0xff] }
 0x6c3   :  { %v5242_v40 = vpack.c.bf16 %v3147_v38, %v3145_v37  ;;  %v5366_v37 = vadd.f32 %v6472_v1, %v2471_v29  ;;  %v3546_v29 = vld [vmem:[%s6633_s19 + $0x28] sm:$0xff] }
 0x6c4   :  { %5205 = vmatpush1.bf16.msra.mxu1 %v5204_v46  ;;  %5303 = vmatprep.subr.bf16.mxu0 %v5302_v43  ;;  %v2475_v46 = vrot.slane %v6477_v44, %v872_v24  ;;  %v3149_v43 = vld [vmem:[#allocation22 + $0x308] sm:$0xff] }
 0x6c5   :  { %5207 = vmatprep.subr.bf16.mxu1 %v5206_v47  ;;  %v2467_v47 = vrot.slane %v6477_v44, %v6383_v23  ;;  %v3050_v38 = vmax.f32 %v5366_v37, 0.0  ;;  %v3351_v44 = vld [vmem:[#allocation25 + $0x78] sm:$0xff]  ;;  %v3550_v37 = vld [vmem:[%s6633_s19 + $0x48] sm:$0xff] }
 0x6c8   :  { %5209 = vmatpush1.bf16.msra.mxu1 %v5208_v49 }
 0x6c9   :  { %5211 = vmatprep.subr.bf16.mxu1 %v5210_v52  ;;  %v5367_v52 = vadd.f32 %v6474_v5, %v2475_v46  ;;  %v3124_v5 = vld [vmem:[#allocation22 + $0x240] sm:$0xff]  ;;  %v5244_v46 = vpack.c.bf16 %v3146_v42, %v3144_v41  ;;  %v3366_v42 = vld [vmem:[#allocation25 + $0xf0] sm:$0xff] }
 0x6ca   :  { %v5224_v9 = vpack.c.bf16 %v3126_v4, %v3124_v5  ;;  %v3165_v5 = vld [vmem:[#allocation22 + $0x388] sm:$0xff]  ;;  %v3167_v4 = vld [vmem:[#allocation22 + $0x398] sm:$0xff] }
 0x6cb   :  { %v3051_v24 = vmax.f32 %v5367_v52, 0.0  ;;  %v5262_v8 = vpack.c.bf16 %v3167_v4, %v3165_v5  ;;  %v3457_v5 = vld [vmem:[%s6631_s17 + $0x58] sm:$0xff] }
 0x6cc   :  { %5213 = vmatpush1.bf16.msra.mxu1 %v5212_v55  ;;  %v3123_v55 = vld [vmem:[#allocation22 + $0x238] sm:$0xff] }
 0x6cd   :  { %5215 = vmatprep.subr.bf16.mxu1 %v5214_v58  ;;  %v5218_v59 = vpack.c.bf16 %v3123_v55, %v3121_v54  ;;  %v3154_v54 = vld [vmem:[#allocation22 + $0x330] sm:$0xff]  ;;  %v3157_v55 = vld [vmem:[#allocation22 + $0x348] sm:$0xff] }
 0x762   :  { %v2759_v48 = vpop.f32.mrb[6].mxu1 }
 0x763   :  { %v5364_v2 = vadd.f32 %v2759_v48, %v2463_v45  ;;  %v2761_v49 = vpop.f32.mrb[7].mxu1  ;;  %v3151_v45 = vld [vmem:[#allocation22 + $0x318] sm:$0xff]  ;;  %v3148_v48 = vld [vmem:[#allocation22 + $0x300] sm:$0xff] }
 0x764   :  { %v5365_v53 = vadd.f32 %v2761_v49, %v2467_v47  ;;  %v5246_v47 = vpack.c.bf16 %v3151_v45, %v3149_v43  ;;  %v3153_v49 = vld [vmem:[#allocation22 + $0x328] sm:$0xff]  ;;  %v5306_v43 = vpack.c.bf16 %v3367_v20, %v3366_v42  ;;  %v5308_v45 = vpack.c.bf16 %v3351_v44, %v3350_v63  ;;  %v3554_v20 = vld [vmem:[%s6633_s19 + $0x68] sm:$0xff]  ;;  %v3555_v63 = vld [vmem:[%s6633_s19 + $0x70] sm:$0xff] }
 0x765   :  { %v3048_v58 = vmax.f32 %v5364_v2, 0.0  ;;  %v3150_v2 = vld [vmem:[#allocation22 + $0x310] sm:$0xff]  ;;  %v5250_v52 = vpack.c.bf16 %v3155_v50, %v3153_v49  ;;  %v3556_v44 = vld [vmem:[%s6633_s19 + $0x78] sm:$0xff] }
 0x766   :  { %v3049_v56 = vmax.f32 %v5365_v53, 0.0  ;;  %v5248_v51 = vpack.c.bf16 %v3150_v2, %v3148_v48  ;;  %v3152_v53 = vld [vmem:[#allocation22 + $0x320] sm:$0xff]  ;;  %v3446_v50 = vld [vmem:[%s6631_s17] sm:$0xff] }
 0x767   :  { %v3553_v42 = vld [vmem:[%s6633_s19 + $0x60] sm:$0xff] }
 0x768   :  { %3256 = vmatprep.mubr.f32.mxu1 %v3049_v56  ;;  %v3159_v56 = vld [vmem:[#allocation22 + $0x358] sm:$0xff] }
 0x769   :  { %3257 = vmatmul.mubr.f32.vlgmr.msra.gmra.mrb[8].mxu1 %v3048_v58  ;;  %v5254_v58 = vpack.c.bf16 %v3159_v56, %v3157_v55 }
 0x76a   :  { %5217 = vmatpush1.bf16.msra.mxu1 %v5216_v57  ;;  %3327 = vmatprep.mubr.f32.mxu1 %v3051_v24  ;;  %v5252_v57 = vpack.c.bf16 %v3154_v54, %v3152_v53  ;;  %v3163_v24 = vld [vmem:[#allocation22 + $0x378] sm:$0xff] }
 0x76b   :  { %5219 = vmatprep.subr.bf16.mxu1 %v5218_v59  ;;  %v3156_v59 = vld [vmem:[#allocation22 + $0x340] sm:$0xff]  ;;  %v5258_v0 = vpack.c.bf16 %v3163_v24, %v3161_v61 }
 0x76c   :  { %v5256_v62 = vpack.c.bf16 %v3158_v60, %v3156_v59  ;;  %v3452_v60 = vld [vmem:[%s6631_s17 + $0x30] sm:$0xff]  ;;  %v3453_v61 = vld [vmem:[%s6631_s17 + $0x38] sm:$0xff] }
 0x76d   :  { %v5320_v24 = vpack.c.bf16 %v3453_v61, %v3452_v60  ;;  %v3715_v61 = vld [vmem:[#allocation2] ss:$0 sm:$0xff] }
 0x76e   :  { %5221 = vmatpush1.bf16.msra.mxu1 %v5220_v7  ;;  %v3160_v7 = vld [vmem:[#allocation22 + $0x360] sm:$0xff] }
 0x76f   :  { %5223 = vmatprep.subr.bf16.mxu1 %v5222_v3  ;;  %v3162_v3 = vld [vmem:[#allocation22 + $0x370] sm:$0xff] }
 0x770   :  { %v5260_v6 = vpack.c.bf16 %v3162_v3, %v3160_v7  ;;  %v3456_v3 = vld [vmem:[%s6631_s17 + $0x50] sm:$0xff] }
 0x771   :  { %v5326_v4 = vpack.c.bf16 %v3457_v5, %v3456_v3 }
 0x772   :  { %5225 = vmatpush1.bf16.msra.mxu1 %v5224_v9  ;;  %v3164_v9 = vld [vmem:[#allocation22 + $0x380] sm:$0xff] }
 0x773   :  { %5227 = vmatprep.subr.bf16.mxu1 %v5226_v10  ;;  %v3166_v10 = vld [vmem:[#allocation22 + $0x390] sm:$0xff] }
 0x774   :  { %v5264_v13 = vpack.c.bf16 %v3166_v10, %v3164_v9  ;;  %v3460_v10 = vld [vmem:[%s6631_s17 + $0x70] sm:$0xff] }
 0x775   :  { %v5332_v12 = vpack.c.bf16 %v3461_v11, %v3460_v10 }
 0x776   :  { %5229 = vmatpush1.bf16.msra.mxu1 %v5228_v15  ;;  %v3168_v15 = vld [vmem:[#allocation22 + $0x3a0] sm:$0xff] }
 0x777   :  { %5231 = vmatprep.subr.bf16.mxu1 %v5230_v27  ;;  %v3170_v27 = vld [vmem:[#allocation22 + $0x3b0] sm:$0xff] }
 0x778   :  { %v5268_v18 = vpack.c.bf16 %v3170_v27, %v3168_v15 }
 0x77a   :  { %5233 = vmatpush1.bf16.msra.mxu1 %v5232_v19  ;;  %v3172_v19 = vld [vmem:[#allocation22 + $0x3c0] sm:$0xff] }
 0x77b   :  { %5235 = vmatprep.subr.bf16.mxu1 %v5234_v25  ;;  %v3174_v25 = vld [vmem:[#allocation22 + $0x3d0] sm:$0xff] }
 0x77c   :  { %v5272_v30 = vpack.c.bf16 %v3174_v25, %v3172_v19  ;;  %v3543_v25 = vld [vmem:[%s6633_s19 + $0x10] sm:$0xff] }
 0x77e   :  { %5237 = vmatpush1.bf16.msra.mxu1 %v5236_v31  ;;  %v5274_v31 = vpack.c.bf16 %v3179_v28, %v3177_v26  ;;  %v3544_v26 = vld [vmem:[%s6633_s19 + $0x18] sm:$0xff] }
 0x77f   :  { %5239 = vmatprep.subr.bf16.mxu1 %v5238_v34  ;;  %v3176_v34 = vld [vmem:[#allocation22 + $0x3e0] sm:$0xff]  ;;  %v5338_v28 = vpack.c.bf16 %v3544_v26, %v3543_v25 }
 0x780   :  { %v5276_v36 = vpack.c.bf16 %v3178_v35, %v3176_v34  ;;  %v3547_v34 = vld [vmem:[%s6633_s19 + $0x30] sm:$0xff] }
 0x782   :  { %5241 = vmatpush1.bf16.msra.mxu1 %v5240_v39  ;;  %v3348_v39 = vld [vmem:[#allocation25 + $0x60] sm:$0xff] }
 0x783   :  { %5243 = vmatprep.subr.bf16.mxu1 %v5242_v40  ;;  %v3349_v40 = vld [vmem:[#allocation25 + $0x68] sm:$0xff] }
 0x784   :  { %v5304_v41 = vpack.c.bf16 %v3349_v40, %v3348_v39  ;;  %v3551_v39 = vld [vmem:[%s6633_s19 + $0x50] sm:$0xff]  ;;  %v3552_v40 = vld [vmem:[%s6633_s19 + $0x58] sm:$0xff] }
 0x786   :  { %5245 = vmatpush1.bf16.msra.mxu1 %v5244_v46  ;;  %5305 = vmatpush3.bf16.msra.mxu0 %v5304_v41  ;;  %v3180_v46 = vld [vmem:[#allocation23] sm:$0x3]  ;;  %v5350_v41 = vpack.c.bf16 %v3552_v40, %v3551_v39 }
 0x787   :  { %5247 = vmatprep.subr.bf16.mxu1 %v5246_v47  ;;  %5307 = vmatprep.subr.bf16.mxu0 %v5306_v43  ;;  %v3185_v1 = vrot.slane %v3180_v46, %v6378_v21  ;;  %v3189_v47 = vrot.slane %v3180_v46, %v6383_v23  ;;  %v3448_v21 = vld [vmem:[%s6631_s17 + $0x10] sm:$0xff]  ;;  %v3449_v23 = vld [vmem:[%s6631_s17 + $0x18] sm:$0xff]  ;;  %v5353_v43 = vpack.c.bf16 %v3554_v20, %v3553_v42  ;;  %v3540_v46 = vld [vmem:[#allocation7] sm:$0xff] }
 0x788   :  { %v5314_v56 = vpack.c.bf16 %v3449_v23, %v3448_v21  ;;  %v3714_v23 = vld [vmem:[#allocation34] ss:$0 sm:$0xff] }
 0x78a   :  { %5249 = vmatpush1.bf16.msra.mxu1 %v5248_v51  ;;  %5309 = vmatpush3.bf16.msra.mxu0 %v5308_v45  ;;  %v3447_v51 = vld [vmem:[%s6631_s17 + $0x8] sm:$0xff]  ;;  %v5356_v45 = vpack.c.bf16 %v3556_v44, %v3555_v63 }
 0x78b   :  { %5251 = vmatprep.subr.bf16.mxu1 %v5250_v52  ;;  %5310 = vmatprep.subr.bf16.mxu0 %v5948_v33  ;;  %v5311_v54 = vpack.c.bf16 %v3447_v51, %v3446_v50 }
 0x78e   :  { %5253 = vmatpush1.bf16.msra.mxu1 %v5252_v57  ;;  %v3450_v57 = vld [vmem:[%s6631_s17 + $0x20] sm:$0xff] }
 0x78f   :  { %5255 = vmatprep.subr.bf16.mxu1 %v5254_v58  ;;  %v3451_v58 = vld [vmem:[%s6631_s17 + $0x28] sm:$0xff] }
 0x790   :  { %v5317_v59 = vpack.c.bf16 %v3451_v58, %v3450_v57  ;;  %v3646_v58 = vpop.xlane.xlu0 %3645 }
 0x792   :  { %5257 = vmatpush1.bf16.msra.mxu1 %v5256_v62  ;;  %v3454_v62 = vld [vmem:[%s6631_s17 + $0x40] sm:$0xff] }
 0x793   :  { %5259 = vmatprep.subr.bf16.mxu1 %v5258_v0  ;;  %v3455_v0 = vld [vmem:[%s6631_s17 + $0x48] sm:$0xff] }
 0x794   :  { %v5323_v7 = vpack.c.bf16 %v3455_v0, %v3454_v62 }
 0x796   :  { %5261 = vmatpush1.bf16.msra.mxu1 %v5260_v6  ;;  %v3458_v6 = vld [vmem:[%s6631_s17 + $0x60] sm:$0xff] }
 0x797   :  { %5263 = vmatprep.subr.bf16.mxu1 %v5262_v8  ;;  %v3459_v8 = vld [vmem:[%s6631_s17 + $0x68] sm:$0xff] }
 0x798   :  { %v5329_v9 = vpack.c.bf16 %v3459_v8, %v3458_v6 }
 0x79a   :  { %5265 = vmatpush1.bf16.msra.mxu1 %v5264_v13 }
 0x79b   :  { %5267 = vmatprep.subr.bf16.mxu1 %v5266_v14  ;;  %v3709_v14 = vld [vmem:[#allocation26] ss:$0 sm:$0xff] }
 0x79e   :  { %5269 = vmatpush1.bf16.msra.mxu1 %v5268_v18 }
 0x79f   :  { %5271 = vmatprep.subr.bf16.mxu1 %v5270_v22  ;;  %v5335_v22 = vpack.c.bf16 %v3542_v17, %v3541_v16 }
 0x7a2   :  { %5273 = vmatpush1.bf16.msra.mxu1 %v5272_v30  ;;  %v3545_v30 = vld [vmem:[%s6633_s19 + $0x20] sm:$0xff] }
 0x7a3   :  { %5275 = vmatprep.subr.bf16.mxu1 %v5274_v31  ;;  %v5341_v31 = vpack.c.bf16 %v3546_v29, %v3545_v30 }
 0x7a6   :  { %5277 = vmatpush1.bf16.msra.mxu1 %v5276_v36  ;;  %v3549_v36 = vld [vmem:[%s6633_s19 + $0x40] sm:$0xff] }
 0x7a9   :  { %3328 = vmatmul.mubr.f32.vlgmr.msra.gmra.mrb[8].mxu1 %v3050_v38  ;;  %v5347_v38 = vpack.c.bf16 %v3550_v37, %v3549_v36 }
 0x87c   :  { %v3329_v48 = vpop.f32.mrb[8].mxu1 }
 0x87d   :  { %v5368_v2 = vadd.f32 %v3329_v48, %v3185_v1  ;;  %v3331_v49 = vpop.f32.mrb[9].mxu1  ;;  %v3710_v1 = vld [vmem:[#allocation28] ss:$0 sm:$0xff] }
 0x87e   :  { %v5369_v52 = vadd.f32 %v3331_v49, %v3189_v47  ;;  %v3713_v49 = vld [vmem:[#allocation32] ss:$0 sm:$0xff] }
 0x87f   :  { %v3334_v55 = vmax.f32 %v5368_v2, 0.0 }
 0x880   :  { %v3335_v53 = vmax.f32 %v5369_v52, 0.0 }
 0x882   :  { %3439 = vmatprep.mubr.f32.mxu0 %v3335_v53  ;;  %v3711_v53 = vld [vmem:[#allocation29] ss:$0 sm:$0xff] }
 0x883   :  { %3440 = vmatmul.mubr.f32.vlgmr.msra.gmra.mrb[6].mxu0 %v3334_v55 }
 0x884   :  { %5312 = vmatpush3.bf16.msra.mxu0 %v5311_v54  ;;  %3904 = vmatprep.mubr.msk.f32.mxu0 %vm5949_vm0, %v5950_v32 }
 0x885   :  { %5313 = vmatprep.subr.bf16.mxu0 %v5948_v33 }
 0x888   :  { %5315 = vmatpush3.bf16.msra.mxu0 %v5314_v56 }
 0x889   :  { %5316 = vmatprep.subr.bf16.mxu0 %v5948_v33 }
 0x88c   :  { %5318 = vmatpush3.bf16.msra.mxu0 %v5317_v59 }
 0x88d   :  { %5319 = vmatprep.subr.bf16.mxu0 %v5948_v33 }
 0x890   :  { %5321 = vmatpush3.bf16.msra.mxu0 %v5320_v24 }
 0x891   :  { %5322 = vmatprep.subr.bf16.mxu0 %v5948_v33 }
 0x894   :  { %5324 = vmatpush3.bf16.msra.mxu0 %v5323_v7 }
 0x895   :  { %5325 = vmatprep.subr.bf16.mxu0 %v5948_v33 }
 0x898   :  { %5327 = vmatpush3.bf16.msra.mxu0 %v5326_v4 }
 0x899   :  { %5328 = vmatprep.subr.bf16.mxu0 %v5948_v33 }
 0x89c   :  { %5330 = vmatpush3.bf16.msra.mxu0 %v5329_v9 }
 0x89d   :  { %5331 = vmatprep.subr.bf16.mxu0 %v5948_v33 }
 0x8a0   :  { %5333 = vmatpush3.bf16.msra.mxu0 %v5332_v12 }
 0x8a1   :  { %5334 = vmatprep.subr.bf16.mxu0 %v5948_v33 }
 0x956   :  { %v3800_v13 = vpop.f32.mrb[6].mxu0 }
 0x957   :  { %v3801_v15 = vpop.f32.mrb[7].mxu0 }
 0x958   :  { %v3802_v27 = vadd.f32 %v3801_v15, %v3800_v13 }
 0x95a   :  { %v3442_v18 = vadd.f32 %v3802_v27, %v3709_v14 }
 0x95c   :  { %v3445_v19 = vmax.f32 %v3442_v18, 0.0 }
 0x95e   :  { %3905 = vmatmul.mubr.f32.vlgmr.msra.gmra.mrb[8].mxu0 %v3445_v19 }
 0x95f   :  { %5336 = vmatpush3.bf16.msra.mxu0 %v5335_v22  ;;  %3939 = vmatprep.mubr.msk.f32.mxu0 %vm5949_vm0, %v5950_v32  ;;  %v3548_v32 = vld [vmem:[%s6633_s19 + $0x38] sm:$0xff] }
 0x960   :  { %5337 = vmatprep.subr.bf16.mxu0 %v5948_v33  ;;  %v5344_v35 = vpack.c.bf16 %v3548_v32, %v3547_v34 }
 0x963   :  { %5339 = vmatpush3.bf16.msra.mxu0 %v5338_v28 }
 0x964   :  { %5340 = vmatprep.subr.bf16.mxu0 %v5948_v33 }
 0x967   :  { %5342 = vmatpush3.bf16.msra.mxu0 %v5341_v31 }
 0x968   :  { %5343 = vmatprep.subr.bf16.mxu0 %v5948_v33 }
 0x96b   :  { %5345 = vmatpush3.bf16.msra.mxu0 %v5344_v35 }
 0x96c   :  { %5346 = vmatprep.subr.bf16.mxu0 %v5948_v33 }
 0x96f   :  { %5348 = vmatpush3.bf16.msra.mxu0 %v5347_v38 }
 0x970   :  { %5349 = vmatprep.subr.bf16.mxu0 %v5948_v33 }
 0x973   :  { %5351 = vmatpush3.bf16.msra.mxu0 %v5350_v41 }
 0x974   :  { %5352 = vmatprep.subr.bf16.mxu0 %v5948_v33 }
 0x977   :  { %5354 = vmatpush3.bf16.msra.mxu0 %v5353_v43 }
 0x978   :  { %5355 = vmatprep.subr.bf16.mxu0 %v5948_v33 }
 0x97b   :  { %5357 = vmatpush3.bf16.msra.mxu0 %v5356_v45 }
 0x97e   :  { %3940 = vmatmul.mubr.f32.vlgmr.msra.gmra.mrb[10].mxu0 %v3540_v46 }
 0xa31   :  { %v3535_v47 = vpop.f32.mrb[8].mxu0 }
 0xa32   :  { %v3536_v48 = vadd.f32 %v3710_v1, %v3535_v47  ;;  %v3906_v2 = vpop.f32.mrb[9].mxu0 }
 0xa34   :  { %v3539_v50 = vmax.f32 %v3536_v48, 0.0 }
 0xa36   :  { %v3654_v51 = vmul.f32 %v3713_v49, %v3539_v50 }
 0xa38   :  { %v3655_v52 = vsel %vm3643_vm1, %v3654_v51, 0.0 }
 0xa39   :  { %3656 = vadd.xlane.f32.xlu0 %v3655_v52 }
 0xa51   :  { %v3630_v54 = vpop.f32.mrb[10].mxu0 }
 0xa52   :  { %v3631_v55 = vadd.f32 %v3711_v53, %v3630_v54  ;;  %v3941_v21 = vpop.f32.mrb[11].mxu0 }
 0xa54   :  { %v3634_v56 = vmax.f32 %v3631_v55, 0.0 }
 0xa56   :  { %v3666_v33 = vmul.f32 %v3714_v23, %v3634_v56 }
 0xa58   :  { %v3667_v57 = vsel %vm3643_vm1, %v3666_v33, 0.0 }
 0xa59   :  { %3668 = vadd.xlane.f32.xlu1 %v3667_v57 }
 0xac6   :  { %v3657_v59 = vpop.xlane.xlu0 %3656 }
 0xac7   :  { %v3658_v60 = vadd.f32 %v3657_v59, %v3646_v58 }
 0xae6   :  { %v3669_v24 = vpop.xlane.xlu1 %3668 }
 0xae7   :  { %v3670_v62 = vadd.f32 %v3669_v24, %v3658_v60 }
 0xae9   :  { %v3678_v0 = vadd.f32 %v3715_v61, %v3670_v62 }
 0xaeb   :  { %v3679_v7 = vsub.f32 0.0, %v3678_v0 }
 0xaed   :  { %v3680_v3 = vmul.f32 1.442695, %v3679_v7 }
 0xaef   :  { %5428 = vpow2.f32 %v3680_v3 }
 0xaf9   :  { %v5429_v5 = vpop.eup %5428 }
 0xafa   :  { %v3682_v4 = vadd.f32 1.0, %v5429_v5 }
 0xafc   :  { %5430 = vrcp.f32 %v3682_v4  ;;  %v3687_v9 = vand.u32 2147483647, %v3682_v4 }
 0xafe   :  { %vm3688_vm3 = vcmp.eq.f32.partialorder %v3687_v9, inf }
 0xb06   :  { %v5431_v6 = vpop.eup %5430 }
 0xb07   :  { %v3684_v8 = vmul.f32 %v5431_v6, %v3682_v4 }
 0xb09   :  { %v3685_v10 = vsub.f32 2.0, %v3684_v8 }
 0xb0b   :  { %v3686_v11 = vmul.f32 %v5431_v6, %v3685_v10 }
 0xb0d   :  { %v3689_v12 = vsel %vm3688_vm3, 0.0, %v3686_v11 }
 0xb0e   :  { %3691 = vst.msk [vmem:[%s6679_s27] sm:$0xff] %vm3690_vm2, %v3689_v12 }
 0xb0f   :  { %3696 = vsyncpa [#allocation4], 1 }
 0xb10   :  { %3697 = vsyncpa [#allocation6], 1 }
 0xb11   :  { %3698 = vsyncpa [#allocation9], 1 }
 0xb12   :  { %3699 = vsyncpa [#allocation12], 1 }
 0xb13   :  { %3700 = vsyncpa [#allocation15], 1 }
 0xb14   :  { %3701 = vsyncpa [#allocation18], 1 }
 0xb15   :  { %3702 = vsyncpa [#allocation21], 1 }
 0xb16   :  { %3703 = vsyncpa [#allocation24], 1 }
 0xb17   :  { %3704 = vsyncpa [#allocation27], 1 }
 0xb18   :  { %3705 = vsyncpa [#allocation30], 1 }
 0xb19   :  { %3706 = vsyncpa [#allocation33], 1 }

</bundles_post_ra>
